<compile_context>
chip_gen: v6e
topology: v6e:2x2x1
jax: 0.10.0
libtpu: 0.0.40
codegen_flags: <defaults>
</compile_context>

<pallas_src>
import functools

import jax
import jax.numpy as jnp
import numpy as np
from jax.experimental import pallas as pl
from jax.experimental.pallas import tpu as pltpu


def _basic_block_kernel(xp_ref, w1_ref, b1_ref, w2_ref, b2_ref, out_ref,
                        o1_scr, *, H, W, TH, no_relu):
    """One (batch, row-tile) grid step.

    xp_ref : (1, H+4, W+2, C1) bf16  zero-padded NHWC input (2 rows / 1 col)
    w1_ref : (9*C1, C2)        bf16  conv1 weights * BN1 scale, (dy,dx,cin)-major
    b1_ref : (1, C2)           f32   BN1 bias
    w2_ref : (9*C2, C2)        bf16  conv2 weights * BN2 scale
    b2_ref : (1, C2)           f32   BN2 bias
    out_ref: (1, TH, W, C2)    bf16  output row tile (NHWC)
    o1_scr : (TH+2, W+2, C2)   bf16  conv1 slab incl. conv2 halo rows / pad cols
    """
    C1 = xp_ref.shape[-1]
    C2 = out_ref.shape[-1]
    R = TH + 2                                    # conv1 rows incl. 1-row halo

    t0 = pl.multiple_of(pl.program_id(1) * TH, TH)   # first output row of tile

    # ---- conv1 (+ folded BN1 scale): 3 accumulated MXU matmuls, K = 3*C1 -----
    # conv1 slab covers absolute rows [t0-1, t0+TH]; tap (dy, dx) reads padded
    # input rows [t0+dy, t0+dy+R) and cols [dx, dx+W).
    acc1 = jnp.zeros((R * W, C2), jnp.float32)
    for dy in range(3):
        taps = [xp_ref[0, pl.ds(t0 + dy, R), dx:dx + W, :] for dx in range(3)]
        patch = jnp.concatenate(taps, axis=-1).reshape(R * W, 3 * C1)
        acc1 = acc1 + jnp.dot(patch, w1_ref[dy * 3 * C1:(dy + 1) * 3 * C1, :],
                              preferred_element_type=jnp.float32)
    out1 = jnp.maximum(acc1 + b1_ref[...], 0.0)                # BN1 bias + ReLU
    o1 = out1.reshape(R, W, C2).astype(jnp.bfloat16)

    # ---- stash conv1 slab in VMEM scratch with conv2's zero padding ----------
    o1_scr[:, 1:W + 1, :] = o1
    zcol = jnp.zeros((R, 1, C2), jnp.bfloat16)
    o1_scr[:, 0:1, :] = zcol                      # zero pad columns (tiny)
    o1_scr[:, W + 1:W + 2, :] = zcol
    # Halo rows outside the image are conv2's zero row-padding of conv1's
    # output (not conv1 evaluated on padding rows): zero them only on the
    # boundary tiles (no full-slab copy / select).
    zrow = jnp.zeros((1, W + 2, C2), jnp.bfloat16)

    @pl.when(t0 == 0)
    def _():
        o1_scr[0:1, :, :] = zrow

    @pl.when(t0 + TH == H)
    def _():
        o1_scr[R - 1:R, :, :] = zrow

    # ---- conv2 (+ folded BN2 scale): 3 accumulated MXU matmuls, K = 3*C2 -----
    acc2 = jnp.zeros((TH * W, C2), jnp.float32)
    for dy in range(3):
        taps = [o1_scr[dy:dy + TH, dx:dx + W, :] for dx in range(3)]
        patch = jnp.concatenate(taps, axis=-1).reshape(TH * W, 3 * C2)
        acc2 = acc2 + jnp.dot(patch, w2_ref[dy * 3 * C2:(dy + 1) * 3 * C2, :],
                              preferred_element_type=jnp.float32)

    # ---- BN2 bias + identity residual (+ optional ReLU) ----------------------
    # Residual read from the bf16 padded input (bf16 rounding on the skip path,
    # well within the test tolerance).
    residual = xp_ref[0, pl.ds(t0 + 2, TH), 1:W + 1, :].astype(jnp.float32)
    out = (acc2 + b2_ref[...]).reshape(TH, W, C2) + residual
    if not no_relu:
        out = jnp.maximum(out, 0.0)
    out_ref[0] = out.astype(out_ref.dtype)


def basic_block_pallas(x_nchw, w1_oihw, scale1, bias1, w2_oihw, scale2, bias2,
                       *, no_relu=False, row_tile=16):
    """BasicBlock forward. x_nchw: (N, C1, H, W) float32. stride=1, no downsample."""
    N, C1, H, W = x_nchw.shape
    C2 = w1_oihw.shape[0]
    assert w1_oihw.shape == (C2, C1, 3, 3)
    assert w2_oihw.shape == (C2, C2, 3, 3)
    assert C1 == C2, "identity residual requires c1 == c2 when downsample is None"
    assert W % 8 == 0, "W must be a multiple of 8 (sublane tile)"
    TH = min(row_tile, H)
    assert H % TH == 0, "H must be divisible by the row tile"

    # NCHW -> NHWC in bf16 (channels on lanes); cast first so the transpose/pad
    # pass moves half the bytes.
    x_nhwc = jnp.transpose(x_nchw.astype(jnp.bfloat16), (0, 2, 3, 1))
    xp = jnp.pad(x_nhwc, ((0, 0), (2, 2), (1, 1), (0, 0)))    # (N, H+4, W+2, C1)

    # Fold BN scale into the conv weights (f32 multiply, THEN bf16 cast, to avoid
    # double rounding); only the bias add remains in the kernel.
    w1f = w1_oihw.astype(jnp.float32) * scale1.astype(jnp.float32)[:, None, None, None]
    w2f = w2_oihw.astype(jnp.float32) * scale2.astype(jnp.float32)[:, None, None, None]
    # OIHW -> (dy, dx, cin, cout) -> (9*cin, cout); matches per-dy tap order.
    w1_k = jnp.transpose(w1f, (2, 3, 1, 0)).reshape(9 * C1, C2).astype(jnp.bfloat16)
    w2_k = jnp.transpose(w2f, (2, 3, 1, 0)).reshape(9 * C2, C2).astype(jnp.bfloat16)
    b1 = bias1.astype(jnp.float32).reshape(1, C2)
    b2 = bias2.astype(jnp.float32).reshape(1, C2)

    kernel = functools.partial(_basic_block_kernel, H=H, W=W, TH=TH,
                               no_relu=no_relu)

    out_nhwc = pl.pallas_call(
        kernel,
        out_shape=jax.ShapeDtypeStruct((N, H, W, C2), jnp.bfloat16),
        grid_spec=pltpu.PrefetchScalarGridSpec(
            num_scalar_prefetch=0,
            grid=(N, H // TH),
            in_specs=[
                # Padded image stays resident across the row-tile axis
                # (index_map ignores t) -> halo rows are plain pl.ds reads.
                pl.BlockSpec((1, H + 4, W + 2, C1), lambda n, t: (n, 0, 0, 0)),
                pl.BlockSpec((9 * C1, C2), lambda n, t: (0, 0)),
                pl.BlockSpec((1, C2), lambda n, t: (0, 0)),
                pl.BlockSpec((9 * C2, C2), lambda n, t: (0, 0)),
                pl.BlockSpec((1, C2), lambda n, t: (0, 0)),
            ],
            out_specs=pl.BlockSpec((1, TH, W, C2), lambda n, t: (n, t, 0, 0)),
            scratch_shapes=[pltpu.VMEM((TH + 2, W + 2, C2), jnp.bfloat16)],
        ),
        compiler_params=pltpu.CompilerParams(
            dimension_semantics=("parallel", "parallel"),
            vmem_limit_bytes=40 * 1024 * 1024),
    )(xp, w1_k, b1, w2_k, b2)

    # NHWC -> NCHW while still bf16 (half the transpose bytes), f32 at the end.
    return jnp.transpose(out_nhwc, (0, 3, 1, 2)).astype(jnp.float32)


# ----------------------------- reference (pure JAX, f32) ----------------------
def _convbn_ref(x_nchw, w_oihw, scale, bias, act):
    y = jax.lax.conv_general_dilated(
        x_nchw, w_oihw, window_strides=(1, 1), padding=((1, 1), (1, 1)),
        dimension_numbers=("NCHW", "OIHW", "NCHW"))
    y = y * scale[None, :, None, None] + bias[None, :, None, None]
    return jnp.maximum(y, 0.0) if act else y


def basic_block_ref(x, w1, s1, b1, w2, s2, b2, no_relu=False):
    out = _convbn_ref(x, w1, s1, b1, act=True)
    out = _convbn_ref(out, w2, s2, b2, act=False)
    out = out + x
    return out if no_relu else jnp.maximum(out, 0.0)


if __name__ == "__main__":
    key = jax.random.PRNGKey(0)
    N, C, H, W = 2, 8, 16, 16        # c1 == c2 == 8, stride 1, no downsample

    keys = jax.random.split(key, 11)
    x = jax.random.normal(keys[0], (N, C, H, W), jnp.float32)

    w1 = jax.random.normal(keys[1], (C, C, 3, 3), jnp.float32) * 0.2
    w2 = jax.random.normal(keys[2], (C, C, 3, 3), jnp.float32) * 0.2

    # Folded BatchNorm (inference): scale = gamma / sqrt(var + eps),
    # bias = beta - mean * scale.
    eps = 1e-5
    gamma1 = jax.random.normal(keys[3], (C,)) * 0.1 + 1.0
    beta1 = jax.random.normal(keys[4], (C,)) * 0.1
    mean1 = jax.random.normal(keys[5], (C,)) * 0.1
    var1 = jnp.abs(jax.random.normal(keys[6], (C,))) * 0.1 + 1.0
    gamma2 = jax.random.normal(keys[7], (C,)) * 0.1 + 1.0
    beta2 = jax.random.normal(keys[8], (C,)) * 0.1
    mean2 = jax.random.normal(keys[9], (C,)) * 0.1
    var2 = jnp.abs(jax.random.normal(keys[10], (C,))) * 0.1 + 1.0

    scale1 = gamma1 / jnp.sqrt(var1 + eps)
    bias1 = beta1 - mean1 * scale1
    scale2 = gamma2 / jnp.sqrt(var2 + eps)
    bias2 = beta2 - mean2 * scale2

    out = basic_block_pallas(x, w1, scale1, bias1, w2, scale2, bias2,
                             no_relu=False)
    out = jax.block_until_ready(out)

    ref = basic_block_ref(x, w1, scale1, bias1, w2, scale2, bias2,
                          no_relu=False)
    # bf16 activations/weights/output with f32 MXU accumulation -> loose tolerance.
    np.testing.assert_allclose(np.asarray(out), np.asarray(ref),
                               rtol=5e-2, atol=6e-2)
    print("KERNEL_OK")
</pallas_src>

<mosaic_0001>
module attributes {stable_mosaic.version = 11 : i64} {
  func.func @_basic_block_kernel(%arg0: i32, %arg1: i32, %arg2: memref<1x20x18x8xbf16, #tpu.memory_space<vmem>>, %arg3: memref<72x8xbf16, #tpu.memory_space<vmem>>, %arg4: memref<1x8xf32, #tpu.memory_space<vmem>>, %arg5: memref<72x8xbf16, #tpu.memory_space<vmem>>, %arg6: memref<1x8xf32, #tpu.memory_space<vmem>>, %arg7: memref<1x16x16x8xbf16, #tpu.memory_space<vmem>>, %arg8: memref<18x18x8xbf16, #tpu.memory_space<vmem>>) attributes {dimension_semantics = [#tpu.dimension_semantics<parallel>, #tpu.dimension_semantics<parallel>], iteration_bounds = array<i64: 2, 1>, scalar_prefetch = 0 : i64, scratch_operands = 1 : i64, tpu.core_type = #tpu.core_type<tc>, window_params = [{transform_indices = @transform_0, window_bounds = array<i64: 1, 20, 18, 8>}, {pipeline_mode = #tpu.pipeline_mode<synchronous>, transform_indices = @transform_1, window_bounds = array<i64: 72, 8>}, {pipeline_mode = #tpu.pipeline_mode<synchronous>, transform_indices = @transform_2, window_bounds = array<i64: 1, 8>}, {pipeline_mode = #tpu.pipeline_mode<synchronous>, transform_indices = @transform_3, window_bounds = array<i64: 72, 8>}, {pipeline_mode = #tpu.pipeline_mode<synchronous>, transform_indices = @transform_4, window_bounds = array<i64: 1, 8>}, {transform_indices = @transform_5, window_bounds = array<i64: 1, 16, 16, 8>}]} {
    %c16_i32 = arith.constant 16 : i32
    %0 = arith.muli %arg1, %c16_i32 : i32
    %1 = tpu.assume_multiple %0, 16 : i32
    %cst = arith.constant 0.000000e+00 : f32
    %2 = vector.broadcast %cst : f32 to vector<288x8xf32>
    %c0_i32 = arith.constant 0 : i32
    %3 = arith.addi %1, %c0_i32 : i32
    %c0 = arith.constant 0 : index
    %4 = arith.index_cast %3 : i32 to index
    %c0_0 = arith.constant 0 : index
    %c0_1 = arith.constant 0 : index
    %5 = vector.load %arg2[%c0, %4, %c0_0, %c0_1] : memref<1x20x18x8xbf16, #tpu.memory_space<vmem>>, vector<1x18x16x8xbf16>
    %6 = vector.shape_cast %5 : vector<1x18x16x8xbf16> to vector<18x16x8xbf16>
    %c0_i32_2 = arith.constant 0 : i32
    %7 = arith.addi %1, %c0_i32_2 : i32
    %c0_3 = arith.constant 0 : index
    %8 = arith.index_cast %7 : i32 to index
    %c1 = arith.constant 1 : index
    %c0_4 = arith.constant 0 : index
    %9 = vector.load %arg2[%c0_3, %8, %c1, %c0_4] : memref<1x20x18x8xbf16, #tpu.memory_space<vmem>>, vector<1x18x16x8xbf16>
    %10 = vector.shape_cast %9 : vector<1x18x16x8xbf16> to vector<18x16x8xbf16>
    %c0_i32_5 = arith.constant 0 : i32
    %11 = arith.addi %1, %c0_i32_5 : i32
    %c0_6 = arith.constant 0 : index
    %12 = arith.index_cast %11 : i32 to index
    %c2 = arith.constant 2 : index
    %c0_7 = arith.constant 0 : index
    %13 = vector.load %arg2[%c0_6, %12, %c2, %c0_7] : memref<1x20x18x8xbf16, #tpu.memory_space<vmem>>, vector<1x18x16x8xbf16>
    %14 = vector.shape_cast %13 : vector<1x18x16x8xbf16> to vector<18x16x8xbf16>
    %15 = tpu.concatenate %6, %10, %14 in 2 : vector<18x16x8xbf16>, vector<18x16x8xbf16>, vector<18x16x8xbf16> -> vector<18x16x24xbf16>
    %16 = vector.shape_cast %15 : vector<18x16x24xbf16> to vector<288x24xbf16>
    %c0_8 = arith.constant 0 : index
    %c0_9 = arith.constant 0 : index
    %17 = vector.load %arg3[%c0_8, %c0_9] : memref<72x8xbf16, #tpu.memory_space<vmem>>, vector<24x8xbf16>
    %cst_10 = arith.constant dense<0.000000e+00> : vector<288x8xf32>
    %18 = tpu.matmul %16, %17, %cst_10 {dimension_numbers = #tpu.dot_dimension_numbers<[1], [0], [0], [1], [0, 0, 1, 1], [], []>} : vector<288x24xbf16>, vector<24x8xbf16>, vector<288x8xf32> -> vector<288x8xf32>
    %19 = arith.addf %2, %18 : vector<288x8xf32>
    %c1_i32 = arith.constant 1 : i32
    %20 = arith.addi %1, %c1_i32 : i32
    %c0_11 = arith.constant 0 : index
    %21 = arith.index_cast %20 : i32 to index
    %c0_12 = arith.constant 0 : index
    %c0_13 = arith.constant 0 : index
    %22 = vector.load %arg2[%c0_11, %21, %c0_12, %c0_13] : memref<1x20x18x8xbf16, #tpu.memory_space<vmem>>, vector<1x18x16x8xbf16>
    %23 = vector.shape_cast %22 : vector<1x18x16x8xbf16> to vector<18x16x8xbf16>
    %c1_i32_14 = arith.constant 1 : i32
    %24 = arith.addi %1, %c1_i32_14 : i32
    %c0_15 = arith.constant 0 : index
    %25 = arith.index_cast %24 : i32 to index
    %c1_16 = arith.constant 1 : index
    %c0_17 = arith.constant 0 : index
    %26 = vector.load %arg2[%c0_15, %25, %c1_16, %c0_17] : memref<1x20x18x8xbf16, #tpu.memory_space<vmem>>, vector<1x18x16x8xbf16>
    %27 = vector.shape_cast %26 : vector<1x18x16x8xbf16> to vector<18x16x8xbf16>
    %c1_i32_18 = arith.constant 1 : i32
    %28 = arith.addi %1, %c1_i32_18 : i32
    %c0_19 = arith.constant 0 : index
    %29 = arith.index_cast %28 : i32 to index
    %c2_20 = arith.constant 2 : index
    %c0_21 = arith.constant 0 : index
    %30 = vector.load %arg2[%c0_19, %29, %c2_20, %c0_21] : memref<1x20x18x8xbf16, #tpu.memory_space<vmem>>, vector<1x18x16x8xbf16>
    %31 = vector.shape_cast %30 : vector<1x18x16x8xbf16> to vector<18x16x8xbf16>
    %32 = tpu.concatenate %23, %27, %31 in 2 : vector<18x16x8xbf16>, vector<18x16x8xbf16>, vector<18x16x8xbf16> -> vector<18x16x24xbf16>
    %33 = vector.shape_cast %32 : vector<18x16x24xbf16> to vector<288x24xbf16>
    %c24 = arith.constant 24 : index
    %c0_22 = arith.constant 0 : index
    %34 = vector.load %arg3[%c24, %c0_22] : memref<72x8xbf16, #tpu.memory_space<vmem>>, vector<24x8xbf16>
    %cst_23 = arith.constant dense<0.000000e+00> : vector<288x8xf32>
    %35 = tpu.matmul %33, %34, %cst_23 {dimension_numbers = #tpu.dot_dimension_numbers<[1], [0], [0], [1], [0, 0, 1, 1], [], []>} : vector<288x24xbf16>, vector<24x8xbf16>, vector<288x8xf32> -> vector<288x8xf32>
    %36 = arith.addf %19, %35 : vector<288x8xf32>
    %c2_i32 = arith.constant 2 : i32
    %37 = arith.addi %1, %c2_i32 : i32
    %c0_24 = arith.constant 0 : index
    %38 = arith.index_cast %37 : i32 to index
    %c0_25 = arith.constant 0 : index
    %c0_26 = arith.constant 0 : index
    %39 = vector.load %arg2[%c0_24, %38, %c0_25, %c0_26] : memref<1x20x18x8xbf16, #tpu.memory_space<vmem>>, vector<1x18x16x8xbf16>
    %40 = vector.shape_cast %39 : vector<1x18x16x8xbf16> to vector<18x16x8xbf16>
    %c2_i32_27 = arith.constant 2 : i32
    %41 = arith.addi %1, %c2_i32_27 : i32
    %c0_28 = arith.constant 0 : index
    %42 = arith.index_cast %41 : i32 to index
    %c1_29 = arith.constant 1 : index
    %c0_30 = arith.constant 0 : index
    %43 = vector.load %arg2[%c0_28, %42, %c1_29, %c0_30] : memref<1x20x18x8xbf16, #tpu.memory_space<vmem>>, vector<1x18x16x8xbf16>
    %44 = vector.shape_cast %43 : vector<1x18x16x8xbf16> to vector<18x16x8xbf16>
    %c2_i32_31 = arith.constant 2 : i32
    %45 = arith.addi %1, %c2_i32_31 : i32
    %c0_32 = arith.constant 0 : index
    %46 = arith.index_cast %45 : i32 to index
    %c2_33 = arith.constant 2 : index
    %c0_34 = arith.constant 0 : index
    %47 = vector.load %arg2[%c0_32, %46, %c2_33, %c0_34] : memref<1x20x18x8xbf16, #tpu.memory_space<vmem>>, vector<1x18x16x8xbf16>
    %48 = vector.shape_cast %47 : vector<1x18x16x8xbf16> to vector<18x16x8xbf16>
    %49 = tpu.concatenate %40, %44, %48 in 2 : vector<18x16x8xbf16>, vector<18x16x8xbf16>, vector<18x16x8xbf16> -> vector<18x16x24xbf16>
    %50 = vector.shape_cast %49 : vector<18x16x24xbf16> to vector<288x24xbf16>
    %c48 = arith.constant 48 : index
    %c0_35 = arith.constant 0 : index
    %51 = vector.load %arg3[%c48, %c0_35] : memref<72x8xbf16, #tpu.memory_space<vmem>>, vector<24x8xbf16>
    %cst_36 = arith.constant dense<0.000000e+00> : vector<288x8xf32>
    %52 = tpu.matmul %50, %51, %cst_36 {dimension_numbers = #tpu.dot_dimension_numbers<[1], [0], [0], [1], [0, 0, 1, 1], [], []>} : vector<288x24xbf16>, vector<24x8xbf16>, vector<288x8xf32> -> vector<288x8xf32>
    %53 = arith.addf %36, %52 : vector<288x8xf32>
    %c0_37 = arith.constant 0 : index
    %c0_38 = arith.constant 0 : index
    %54 = vector.load %arg4[%c0_37, %c0_38] : memref<1x8xf32, #tpu.memory_space<vmem>>, vector<1x8xf32>
    %55 = vector.broadcast %54 : vector<1x8xf32> to vector<288x8xf32>
    %56 = arith.addf %53, %55 : vector<288x8xf32>
    %cst_39 = arith.constant 0.000000e+00 : f32
    %57 = vector.broadcast %cst_39 : f32 to vector<288x8xf32>
    %58 = arith.maximumf %56, %57 : vector<288x8xf32>
    %59 = vector.shape_cast %58 : vector<288x8xf32> to vector<18x16x8xf32>
    %60 = arith.truncf %59 : vector<18x16x8xf32> to vector<18x16x8xbf16>
    %c0_40 = arith.constant 0 : index
    %c1_41 = arith.constant 1 : index
    %c0_42 = arith.constant 0 : index
    %61 = vector.load %arg8[%c0_40, %c1_41, %c0_42] : memref<18x18x8xbf16, #tpu.memory_space<vmem>>, vector<18x16x8xbf16>
    tpu.vector_store %arg8[%c0_40, %c1_41, %c0_42], %60 {strides = array<i32>} : memref<18x18x8xbf16, #tpu.memory_space<vmem>>, vector<18x16x8xbf16>,
    %cst_43 = arith.constant 0.000000e+00 : bf16
    %62 = vector.broadcast %cst_43 : bf16 to vector<18x1x8xbf16>
    %c0_44 = arith.constant 0 : index
    %c0_45 = arith.constant 0 : index
    %c0_46 = arith.constant 0 : index
    %63 = vector.load %arg8[%c0_44, %c0_45, %c0_46] : memref<18x18x8xbf16, #tpu.memory_space<vmem>>, vector<18x1x8xbf16>
    tpu.vector_store %arg8[%c0_44, %c0_45, %c0_46], %62 {strides = array<i32>} : memref<18x18x8xbf16, #tpu.memory_space<vmem>>, vector<18x1x8xbf16>,
    %c0_47 = arith.constant 0 : index
    %c17 = arith.constant 17 : index
    %c0_48 = arith.constant 0 : index
    %64 = vector.load %arg8[%c0_47, %c17, %c0_48] : memref<18x18x8xbf16, #tpu.memory_space<vmem>>, vector<18x1x8xbf16>
    tpu.vector_store %arg8[%c0_47, %c17, %c0_48], %62 {strides = array<i32>} : memref<18x18x8xbf16, #tpu.memory_space<vmem>>, vector<18x1x8xbf16>,
    %cst_49 = arith.constant 0.000000e+00 : bf16
    %65 = vector.broadcast %cst_49 : bf16 to vector<1x18x8xbf16>
    %c0_i32_50 = arith.constant 0 : i32
    %66 = arith.cmpi eq, %1, %c0_i32_50 : i32
    %67 = arith.extui %66 : i1 to i32
    %c0_i32_51 = arith.constant 0 : i32
    %68 = arith.cmpi ne, %67, %c0_i32_51 : i32
    scf.if %68 {
      %c0_103 = arith.constant 0 : index
      %c0_104 = arith.constant 0 : index
      %c0_105 = arith.constant 0 : index
      %114 = vector.load %arg8[%c0_103, %c0_104, %c0_105] : memref<18x18x8xbf16, #tpu.memory_space<vmem>>, vector<1x18x8xbf16>
      tpu.vector_store %arg8[%c0_103, %c0_104, %c0_105], %65 {strides = array<i32>} : memref<18x18x8xbf16, #tpu.memory_space<vmem>>, vector<1x18x8xbf16>,
    } else {
    }
    %c16_i32_52 = arith.constant 16 : i32
    %69 = arith.addi %1, %c16_i32_52 : i32
    %c16_i32_53 = arith.constant 16 : i32
    %70 = arith.cmpi eq, %69, %c16_i32_53 : i32
    %71 = arith.extui %70 : i1 to i32
    %c0_i32_54 = arith.constant 0 : i32
    %72 = arith.cmpi ne, %71, %c0_i32_54 : i32
    scf.if %72 {
      %c17_103 = arith.constant 17 : index
      %c0_104 = arith.constant 0 : index
      %c0_105 = arith.constant 0 : index
      %114 = vector.load %arg8[%c17_103, %c0_104, %c0_105] : memref<18x18x8xbf16, #tpu.memory_space<vmem>>, vector<1x18x8xbf16>
      tpu.vector_store %arg8[%c17_103, %c0_104, %c0_105], %65 {strides = array<i32>} : memref<18x18x8xbf16, #tpu.memory_space<vmem>>, vector<1x18x8xbf16>,
    } else {
    }
    %cst_55 = arith.constant 0.000000e+00 : f32
    %73 = vector.broadcast %cst_55 : f32 to vector<256x8xf32>
    %c0_56 = arith.constant 0 : index
    %c0_57 = arith.constant 0 : index
    %c0_58 = arith.constant 0 : index
    %74 = vector.load %arg8[%c0_56, %c0_57, %c0_58] : memref<18x18x8xbf16, #tpu.memory_space<vmem>>, vector<16x16x8xbf16>
    %c0_59 = arith.constant 0 : index
    %c1_60 = arith.constant 1 : index
    %c0_61 = arith.constant 0 : index
    %75 = vector.load %arg8[%c0_59, %c1_60, %c0_61] : memref<18x18x8xbf16, #tpu.memory_space<vmem>>, vector<16x16x8xbf16>
    %c0_62 = arith.constant 0 : index
    %c2_63 = arith.constant 2 : index
    %c0_64 = arith.constant 0 : index
    %76 = vector.load %arg8[%c0_62, %c2_63, %c0_64] : memref<18x18x8xbf16, #tpu.memory_space<vmem>>, vector<16x16x8xbf16>
    %77 = tpu.concatenate %74, %75, %76 in 2 : vector<16x16x8xbf16>, vector<16x16x8xbf16>, vector<16x16x8xbf16> -> vector<16x16x24xbf16>
    %78 = vector.shape_cast %77 : vector<16x16x24xbf16> to vector<256x24xbf16>
    %c0_65 = arith.constant 0 : index
    %c0_66 = arith.constant 0 : index
    %79 = vector.load %arg5[%c0_65, %c0_66] : memref<72x8xbf16, #tpu.memory_space<vmem>>, vector<24x8xbf16>
    %cst_67 = arith.constant dense<0.000000e+00> : vector<256x8xf32>
    %80 = tpu.matmul %78, %79, %cst_67 {dimension_numbers = #tpu.dot_dimension_numbers<[1], [0], [0], [1], [0, 0, 1, 1], [], []>} : vector<256x24xbf16>, vector<24x8xbf16>, vector<256x8xf32> -> vector<256x8xf32>
    %81 = arith.addf %73, %80 : vector<256x8xf32>
    %c1_68 = arith.constant 1 : index
    %c0_69 = arith.constant 0 : index
    %c0_70 = arith.constant 0 : index
    %82 = vector.load %arg8[%c1_68, %c0_69, %c0_70] : memref<18x18x8xbf16, #tpu.memory_space<vmem>>, vector<16x16x8xbf16>
    %c1_71 = arith.constant 1 : index
    %c1_72 = arith.constant 1 : index
    %c0_73 = arith.constant 0 : index
    %83 = vector.load %arg8[%c1_71, %c1_72, %c0_73] : memref<18x18x8xbf16, #tpu.memory_space<vmem>>, vector<16x16x8xbf16>
    %c1_74 = arith.constant 1 : index
    %c2_75 = arith.constant 2 : index
    %c0_76 = arith.constant 0 : index
    %84 = vector.load %arg8[%c1_74, %c2_75, %c0_76] : memref<18x18x8xbf16, #tpu.memory_space<vmem>>, vector<16x16x8xbf16>
    %85 = tpu.concatenate %82, %83, %84 in 2 : vector<16x16x8xbf16>, vector<16x16x8xbf16>, vector<16x16x8xbf16> -> vector<16x16x24xbf16>
    %86 = vector.shape_cast %85 : vector<16x16x24xbf16> to vector<256x24xbf16>
    %c24_77 = arith.constant 24 : index
    %c0_78 = arith.constant 0 : index
    %87 = vector.load %arg5[%c24_77, %c0_78] : memref<72x8xbf16, #tpu.memory_space<vmem>>, vector<24x8xbf16>
    %cst_79 = arith.constant dense<0.000000e+00> : vector<256x8xf32>
    %88 = tpu.matmul %86, %87, %cst_79 {dimension_numbers = #tpu.dot_dimension_numbers<[1], [0], [0], [1], [0, 0, 1, 1], [], []>} : vector<256x24xbf16>, vector<24x8xbf16>, vector<256x8xf32> -> vector<256x8xf32>
    %89 = arith.addf %81, %88 : vector<256x8xf32>
    %c2_80 = arith.constant 2 : index
    %c0_81 = arith.constant 0 : index
    %c0_82 = arith.constant 0 : index
    %90 = vector.load %arg8[%c2_80, %c0_81, %c0_82] : memref<18x18x8xbf16, #tpu.memory_space<vmem>>, vector<16x16x8xbf16>
    %c2_83 = arith.constant 2 : index
    %c1_84 = arith.constant 1 : index
    %c0_85 = arith.constant 0 : index
    %91 = vector.load %arg8[%c2_83, %c1_84, %c0_85] : memref<18x18x8xbf16, #tpu.memory_space<vmem>>, vector<16x16x8xbf16>
    %c2_86 = arith.constant 2 : index
    %c2_87 = arith.constant 2 : index
    %c0_88 = arith.constant 0 : index
    %92 = vector.load %arg8[%c2_86, %c2_87, %c0_88] : memref<18x18x8xbf16, #tpu.memory_space<vmem>>, vector<16x16x8xbf16>
    %93 = tpu.concatenate %90, %91, %92 in 2 : vector<16x16x8xbf16>, vector<16x16x8xbf16>, vector<16x16x8xbf16> -> vector<16x16x24xbf16>
    %94 = vector.shape_cast %93 : vector<16x16x24xbf16> to vector<256x24xbf16>
    %c48_89 = arith.constant 48 : index
    %c0_90 = arith.constant 0 : index
    %95 = vector.load %arg5[%c48_89, %c0_90] : memref<72x8xbf16, #tpu.memory_space<vmem>>, vector<24x8xbf16>
    %cst_91 = arith.constant dense<0.000000e+00> : vector<256x8xf32>
    %96 = tpu.matmul %94, %95, %cst_91 {dimension_numbers = #tpu.dot_dimension_numbers<[1], [0], [0], [1], [0, 0, 1, 1], [], []>} : vector<256x24xbf16>, vector<24x8xbf16>, vector<256x8xf32> -> vector<256x8xf32>
    %97 = arith.addf %89, %96 : vector<256x8xf32>
    %c2_i32_92 = arith.constant 2 : i32
    %98 = arith.addi %1, %c2_i32_92 : i32
    %c0_93 = arith.constant 0 : index
    %99 = arith.index_cast %98 : i32 to index
    %c1_94 = arith.constant 1 : index
    %c0_95 = arith.constant 0 : index
    %100 = vector.load %arg2[%c0_93, %99, %c1_94, %c0_95] : memref<1x20x18x8xbf16, #tpu.memory_space<vmem>>, vector<1x16x16x8xbf16>
    %101 = vector.shape_cast %100 : vector<1x16x16x8xbf16> to vector<16x16x8xbf16>
    %102 = arith.extf %101 : vector<16x16x8xbf16> to vector<16x16x8xf32>
    %c0_96 = arith.constant 0 : index
    %c0_97 = arith.constant 0 : index
    %103 = vector.load %arg6[%c0_96, %c0_97] : memref<1x8xf32, #tpu.memory_space<vmem>>, vector<1x8xf32>
    %104 = vector.broadcast %103 : vector<1x8xf32> to vector<256x8xf32>
    %105 = arith.addf %97, %104 : vector<256x8xf32>
    %106 = vector.shape_cast %105 : vector<256x8xf32> to vector<16x16x8xf32>
    %107 = arith.addf %106, %102 : vector<16x16x8xf32>
    %cst_98 = arith.constant 0.000000e+00 : f32
    %108 = vector.broadcast %cst_98 : f32 to vector<16x16x8xf32>
    %109 = arith.maximumf %107, %108 : vector<16x16x8xf32>
    %110 = arith.truncf %109 : vector<16x16x8xf32> to vector<16x16x8xbf16>
    %c0_99 = arith.constant 0 : index
    %c0_100 = arith.constant 0 : index
    %c0_101 = arith.constant 0 : index
    %c0_102 = arith.constant 0 : index
    %111 = vector.load %arg7[%c0_99, %c0_100, %c0_101, %c0_102] : memref<1x16x16x8xbf16, #tpu.memory_space<vmem>>, vector<1x16x16x8xbf16>
    %112 = vector.shape_cast %111 : vector<1x16x16x8xbf16> to vector<16x16x8xbf16>
    %113 = vector.shape_cast %110 : vector<16x16x8xbf16> to vector<1x16x16x8xbf16>
    tpu.vector_store %arg7[%c0_99, %c0_100, %c0_101, %c0_102], %113 {strides = array<i32>} : memref<1x16x16x8xbf16, #tpu.memory_space<vmem>>, vector<1x16x16x8xbf16>,
    return
  }
  func.func @transform_0(%arg0: i32, %arg1: i32) -> (i32, i32, i32, i32) {
    %c0_i32 = arith.constant 0 : i32
    %c0_i32_0 = arith.constant 0 : i32
    %c0_i32_1 = arith.constant 0 : i32
    %c0_i32_2 = arith.constant 0 : i32
    return %arg0, %c0_i32, %c0_i32_0, %c0_i32_1 : i32, i32, i32, i32
  }
  func.func @transform_1(%arg0: i32, %arg1: i32) -> (i32, i32) {
    %c0_i32 = arith.constant 0 : i32
    %c0_i32_0 = arith.constant 0 : i32
    %c0_i32_1 = arith.constant 0 : i32
    return %c0_i32, %c0_i32_0 : i32, i32
  }
  func.func @transform_2(%arg0: i32, %arg1: i32) -> (i32, i32) {
    %c0_i32 = arith.constant 0 : i32
    %c0_i32_0 = arith.constant 0 : i32
    %c0_i32_1 = arith.constant 0 : i32
    return %c0_i32, %c0_i32_0 : i32, i32
  }
  func.func @transform_3(%arg0: i32, %arg1: i32) -> (i32, i32) {
    %c0_i32 = arith.constant 0 : i32
    %c0_i32_0 = arith.constant 0 : i32
    %c0_i32_1 = arith.constant 0 : i32
    return %c0_i32, %c0_i32_0 : i32, i32
  }
  func.func @transform_4(%arg0: i32, %arg1: i32) -> (i32, i32) {
    %c0_i32 = arith.constant 0 : i32
    %c0_i32_0 = arith.constant 0 : i32
    %c0_i32_1 = arith.constant 0 : i32
    return %c0_i32, %c0_i32_0 : i32, i32
  }
  func.func @transform_5(%arg0: i32, %arg1: i32) -> (i32, i32, i32, i32) {
    %c0_i32 = arith.constant 0 : i32
    %c0_i32_0 = arith.constant 0 : i32
    %c0_i32_1 = arith.constant 0 : i32
    return %arg0, %arg1, %c0_i32, %c0_i32_0 : i32, i32, i32, i32
  }
}

</mosaic_0001>

<bundles_post_ra>
// kernel: tpu_custom_call.1
= control target key start
LH: loop header
LB: loop body
LE: loop exit
PB: predicated region body
PF: predicated region fallthrough
CT: control target
= control target key end

     0   :  { %s8504_s18 = smov 0   ;;  %s8506_s19 = smov 0   ;;  %s11632_s0 = inlined_call_operand.vmem [shape: bf16[2,20,18,8], index: 0, kind: input, shape index: {}]   ;;  %s11633_s1 = inlined_call_operand.vmem [shape: bf16[72,8], index: 1, kind: input, shape index: {}]   ;;  %s11634_s2 = inlined_call_operand.vmem [shape: f32[1,8], index: 2, kind: input, shape index: {}]   ;;  %s11635_s3 = inlined_call_operand.vmem [shape: bf16[72,8], index: 3, kind: input, shape index: {}]   ;;  %s11636_s4 = inlined_call_operand.vmem [shape: f32[1,8], index: 4, kind: input, shape index: {}]   ;;  %s11637_s5 = inlined_call_operand.vmem [shape: bf16[2,16,16,8], index: 5, kind: output, shape index: {}]  }
   0x1   :  { %s8508_s20 = smov 0  }
   0x2 LB: > { %s27_s21 = sadd.s32 1, %s8465_s19  ;;  %p6953_p0 = scmp.ge.s32.totalorder %s8469_s20, 1  ;;  %s8469_s20 = sphi %s8508_s20, %s15_s20   ;;  %s8465_s19 = sphi %s8506_s19, %s11753_s19   ;;  %s8461_s18 = sphi %s8504_s18, %s11752_s18  }
   0x3   : > { %p29_p1 = scmp.ge.s32.totalorder %s27_s21, 2  ;;  %p201_p2 = scmp.lt.s32.totalorder %s8469_s20, 3 }
   0x5   : > { %s11755_s21 = smov (%p29_p1, %s27_s21), 0  ;;  %p202_p3 = pnand %p6953_p0, %p201_p2 }
   0x7   : > { %205 = sbr.rel (%p202_p3) target bundleno = 1048 (0x418), region = 40 }
   0xc   : > { %p234_p4 = scmp.lt.s32.totalorder %s8461_s18, 1  ;;  %v8216_v0 = vld [vmem:[%s11633_s1 + $0x14] ss:$0 sps:$4 sm:$0xff]   ;;  %vm1683_vm0 = vcmask 1043456   ;;  %vm778_vm1 = vcmask 1046528   ;;  %v8221_v6 = vld [vmem:[%s11633_s1 + $0xc] sm:$0xff]  }
   0xd   : > { %8092 = vmatprep.subr.msk.bf16.mxu0 %vm1683_vm0, %v8216_v0  ;;  %v1685_v1 = vsel %vm1683_vm0, %v8216_v0, 0  ;;  %vm471_vm2 = vsmask.f32 7424  ;;  %s8471_s30 = smov 16   ;;  %s8472_s6 = smov 8   ;;  %vm869_vm3 = vcmask 64512  }
   0xe   : > { %s11757_s18 = smov (!%p234_p4, %s8461_s18), 1  ;;  %7865 = vmatpush3.bf16.msra.mxu0 %v1685_v1  ;;  %vm906_vm4 = vcmask 130048   ;;  %vm1646_vm5 = vcmask 195584   ;;  %vm3591_vm6 = vcmask 60416   ;;  %vm3592_vm7 = vsmask.f32 7938 }
   0xf   : > { %s8098_s22 = smul.u32 240, %s11757_s18  ;;  %7866 = vmatprep.subr.bf16.mxu0 %v8221_v6  ;;  %vm3228_vm8 = vsmask.f32 256  ;;  %vm9872_vm9 = vmand %vm3591_vm6, %vm3592_vm7  ;;  %vm3599_vm10 = vcmask 57344   ;;  %vm3229_vm11 = vsmask.f32 4368 }
  0x10   : > { %vm9879_vm12 = vmand %vm3599_vm10, %vm3228_vm8  ;;  %s7641_s23 = sshll.u32 %s11757_s18, 7 }
  0x11   : > { %s8531_s27 = scalar_lea.vmem %s11632_s0, %s8098_s22  ;;  %vm9887_vm13 = vmor %vm3228_vm8, %vm3229_vm11  ;;  %s11399_s25 = scalar_lea.vmem %s11637_s5, %s7641_s23 }
  0x12   : > { %v7016_v2 = vld [vmem:[%s8531_s27 + $0x28] sm:$0xf]  ;;  %v7067_v3 = vld [vmem:[%s8531_s27 + $0x24] sm:$0xe]  ;;  %v7012_v8 = vld [vmem:[%s8531_s27 + $0x10] sm:$0xf]  ;;  %7867 = vmatpush3.bf16.msra.mxu0 %v8221_v6 }
  0x13   : > { %v8538_v4 = vld [vmem:[%s8531_s27 + $0x2c] ss:$0 sps:$4 sm:$0x11]   ;;  %v7121_v5 = vcombine.low %v7067_v3, %v7016_v2  ;;  %v7015_v7 = vld [vmem:[%s8531_s27 + $0x24] sm:$0xf]  ;;  %vm9915_vm14 = vmand %vm3599_vm10, %vm3592_vm7 }
  0x14   : > { %v7065_v9 = vld [vmem:[%s8531_s27 + $0xc] sm:$0xe]  ;;  %v1479_v11 = vrot.slane %v8538_v4, 1  ;;  %v8129_v12 = vld [vmem:[%s8531_s27 + $0x14] ss:$0 sps:$4 sm:$0x11]   ;;  %v8561_v28 = vcombine.low %v7015_v7, %v7016_v2 }
  0x15   : > { %v1478_v10 = vrot.slane %v7121_v5, 1  ;;  %v7119_v13 = vcombine.low %v7065_v9, %v7012_v8  ;;  %v1198_v14 = vshll.u32 %v8538_v4, 16  ;;  %v7011_v15 = vld [vmem:[%s8531_s27 + $0xc] sm:$0xf]  ;;  %v7013_v16 = vld [vmem:[%s8531_s27 + $0x18] sm:$0xf] }
  0x16   : > { %v7014_v17 = vld [vmem:[%s8531_s27 + $0x1c] sm:$0xf]  ;;  %v1473_v20 = vrot.slane %v8129_v12, 1  ;;  %v8553_v21 = vcombine.low %v7011_v15, %v7012_v8  ;;  %v7066_v22 = vld [vmem:[%s8531_s27 + $0x18] sm:$0xe]  ;;  %v1174_v26 = vshll.u32 %v8129_v12, 16 }
  0x17   : > { %v1480_v18 = vsel %vm778_vm1, %v1478_v10, %v1479_v11  ;;  %v1472_v19 = vrot.slane %v7119_v13, 1  ;;  %v8557_v23 = vcombine.low %v7013_v16, %v7014_v17  ;;  %v8133_v24 = vld [vmem:[%s8531_s27 + $0x20] ss:$0 sps:$4 sm:$0x11]   ;;  %v7120_v25 = vcombine.low %v7066_v22, %v7014_v17  ;;  %v7017_v27 = vld [vmem:[%s8531_s27 + $0x30] sm:$0xf] }
  0x18   : > { %1530 = vrot.lane.b32.xlu0 %v1480_v18, %s8471_s30  ;;  %v1167_v30 = vshrl.u32 %v8553_v21, 16  ;;  %v1169_v31 = vshll.u32 %v8553_v21, 16  ;;  %v7018_v32 = vld [vmem:[%s8531_s27 + $0x34] sm:$0xf]  ;;  %v1476_v34 = vrot.slane %v8133_v24, 1  ;;  %v1176_v35 = vrot.slane %v1174_v26, 1 }
  0x19   : > { %v1474_v29 = vsel %vm778_vm1, %v1472_v19, %v1473_v20  ;;  %v1475_v33 = vrot.slane %v7120_v25, 1  ;;  %v7068_v36 = vld [vmem:[%s8531_s27 + $0x30] sm:$0xe]  ;;  %v8569_v37 = vcombine.low %v7017_v27, %v7018_v32  ;;  %v8136_v39 = vld [vmem:[%s8531_s27 + $0x38] ss:$0 sps:$4 sm:$0x11]  }
  0x1a   : > { %1526 = vrot.lane.b32.xlu1 %v1474_v29, %s8471_s30  ;;  %v1171_v38 = vrot.slane %v1169_v31, 1  ;;  %v7122_v40 = vcombine.low %v7068_v36, %v7018_v32  ;;  %v1179_v41 = vshrl.u32 %v8557_v23, 16  ;;  %v1181_v42 = vshll.u32 %v8557_v23, 16  ;;  %v7021_v47 = vld [vmem:[%s8531_s27 + $0x48] sm:$0xf] }
  0x1b   : > { %v1477_v43 = vsel %vm778_vm1, %v1475_v33, %v1476_v34  ;;  %v1186_v44 = vshll.u32 %v8133_v24, 16  ;;  %v1203_v45 = vshrl.u32 %v8569_v37, 16  ;;  %v1205_v46 = vshll.u32 %v8569_v37, 16  ;;  %v7022_v52 = vld [vmem:[%s8531_s27 + $0x4c] sm:$0xf] }
  0x1c   : > { %v1172_v48 = vor.u32 %v1171_v38, %v1167_v30  ;;  %v1481_v49 = vrot.slane %v7122_v40, 1  ;;  %v1482_v50 = vrot.slane %v8136_v39, 1  ;;  %v1183_v51 = vrot.slane %v1181_v42, 1  ;;  %v8139_v61 = vld [vmem:[%s8531_s27 + $0x50] ss:$0 sps:$4 sm:$0x11]  }
  0x1d   : > { %v1188_v53 = vrot.slane %v1186_v44, 1  ;;  %v1207_v54 = vrot.slane %v1205_v46, 1  ;;  %v1210_v55 = vshll.u32 %v8136_v39, 16  ;;  %v1191_v56 = vshrl.u32 %v8561_v28, 16  ;;  %v7019_v62 = vld [vmem:[%s8531_s27 + $0x3c] sm:$0xf] }
  0x1e   : > { %1528 = vrot.lane.b32.xlu1 %v1477_v43, %s8471_s30  ;;  %v1177_v57 = vsel %vm471_vm2, %v1172_v48, %v1176_v35  ;;  %v1483_v58 = vsel %vm778_vm1, %v1481_v49, %v1482_v50  ;;  %v1184_v59 = vor.u32 %v1183_v51, %v1179_v41  ;;  %v1193_v60 = vshll.u32 %v8561_v28, 16  ;;  %v7020_v3 = vld [vmem:[%s8531_s27 + $0x40] sm:$0xf]  ;;  %v8141_v8 = vld [vmem:[%s8531_s27 + $0x44] ss:$0 sps:$4 sm:$0x11]  }
  0x1f   : > { %1382 = vrot.lane.b32.xlu0 %v1177_v57, %s8472_s6  ;;  %v1208_v63 = vor.u32 %v1207_v54, %v1203_v45  ;;  %v1212_v0 = vrot.slane %v1210_v55, 1  ;;  %v1200_v1 = vrot.slane %v1198_v14, 1  ;;  %v8587_v2 = vcombine.low %v7021_v47, %v7022_v52  ;;  %v7070_v12 = vld [vmem:[%s8531_s27 + $0x48] sm:$0xe]  ;;  %v7069_v18 = vld [vmem:[%s8531_s27 + $0x3c] sm:$0xe] }
  0x20   : > { %v1189_v4 = vsel %vm471_vm2, %v1184_v59, %v1188_v53  ;;  %v1195_v5 = vrot.slane %v1193_v60, 1  ;;  %v1234_v6 = vshll.u32 %v8139_v61, 16  ;;  %v8591_v7 = vcombine.low %v7019_v62, %v7020_v3  ;;  %v7025_v24 = vld [vmem:[%s8531_s27 + $0x60] sm:$0xf]  ;;  %v7026_v25 = vld [vmem:[%s8531_s27 + $0x64] sm:$0xf] }
  0x21   : > { %v1213_v9 = vsel %vm471_vm2, %v1208_v63, %v1212_v0  ;;  %v1227_v10 = vshrl.u32 %v8587_v2, 16  ;;  %v1229_v11 = vshll.u32 %v8587_v2, 16  ;;  %v1488_v13 = vrot.slane %v8139_v61, 1  ;;  %v7023_v31 = vld [vmem:[%s8531_s27 + $0x54] sm:$0xf] }
  0x22   : > { %1532 = vrot.lane.b32.xlu1 %v1483_v58, %s8471_s30  ;;  %v1196_v14 = vor.u32 %v1195_v5, %v1191_v56  ;;  %v1236_v15 = vrot.slane %v1234_v6, 1  ;;  %v1215_v16 = vshrl.u32 %v8591_v7, 16  ;;  %v1217_v17 = vshll.u32 %v8591_v7, 16  ;;  %v8145_v36 = vld [vmem:[%s8531_s27 + $0x68] ss:$0 sps:$4 sm:$0x11]  }
  0x23   : > { %1384 = vrot.lane.b32.xlu0 %v1189_v4, %s8472_s6  ;;  %v1231_v19 = vrot.slane %v1229_v11, 1  ;;  %v1222_v20 = vshll.u32 %v8141_v8, 16  ;;  %v7124_v22 = vcombine.low %v7070_v12, %v7022_v52  ;;  %v7123_v29 = vcombine.low %v7069_v18, %v7020_v3  ;;  %v7024_v41 = vld [vmem:[%s8531_s27 + $0x58] sm:$0xf]  ;;  %v7072_v45 = vld [vmem:[%s8531_s27 + $0x60] sm:$0xe] }
  0x24   : > { %v1201_v26 = vsel %vm471_vm2, %v1196_v14, %v1200_v1  ;;  %v1219_v27 = vrot.slane %v1217_v17, 1  ;;  %v8606_v30 = vcombine.low %v7025_v24, %v7026_v25  ;;  %v1485_v35 = vrot.slane %v8141_v8, 1  ;;  %v8617_v44 = vld [vmem:[%s8531_s27 + $0x5c] ss:$0 sps:$4 sm:$0x11]  }
  0x25   : > { %v1232_v32 = vor.u32 %v1231_v19, %v1227_v10  ;;  %v1224_v33 = vrot.slane %v1222_v20, 1  ;;  %v1487_v34 = vrot.slane %v7124_v22, 1  ;;  %v1258_v43 = vshll.u32 %v8145_v36, 16  ;;  %v7071_v50 = vld [vmem:[%s8531_s27 + $0x54] sm:$0xe] }
  0x26   : > { %1388 = vrot.lane.b32.xlu1 %v1213_v9, %s8472_s6  ;;  %v1220_v38 = vor.u32 %v1219_v27, %v1215_v16  ;;  %v1251_v39 = vshrl.u32 %v8606_v30, 16  ;;  %v1253_v40 = vshll.u32 %v8606_v30, 16  ;;  %v1484_v47 = vrot.slane %v7123_v29, 1  ;;  %v7029_v51 = vld [vmem:[%s8531_s27 + $0x78] sm:$0xf] }
  0x27   : > { %1386 = vrot.lane.b32.xlu0 %v1201_v26, %s8472_s6  ;;  %v1237_v42 = vsel %vm471_vm2, %v1232_v32, %v1236_v15  ;;  %v8621_v49 = vcombine.low %v7023_v31, %v7024_v41  ;;  %v1489_v52 = vsel %vm778_vm1, %v1487_v34, %v1488_v13  ;;  %v1246_v53 = vshll.u32 %v8617_v44, 16  ;;  %v7030_v56 = vld [vmem:[%s8531_s27 + $0x7c] sm:$0xf]  ;;  %v8635_v63 = vld [vmem:[%s8531_s27 + $0x80] ss:$0 sps:$4 sm:$0x11]  }
  0x28   : > { %v1225_v46 = vsel %vm471_vm2, %v1220_v38, %v1224_v33  ;;  %v1255_v48 = vrot.slane %v1253_v40, 1  ;;  %v7126_v54 = vcombine.low %v7072_v45, %v7026_v25  ;;  %v7125_v55 = vcombine.low %v7071_v50, %v7024_v41  ;;  %v7027_v4 = vld [vmem:[%s8531_s27 + $0x6c] sm:$0xf]  ;;  %v7028_v5 = vld [vmem:[%s8531_s27 + $0x70] sm:$0xf] }
  0x29   : > { %v1260_v58 = vrot.slane %v1258_v43, 1  ;;  %v1239_v59 = vshrl.u32 %v8621_v49, 16  ;;  %v1241_v60 = vshll.u32 %v8621_v49, 16  ;;  %v1494_v61 = vrot.slane %v8145_v36, 1  ;;  %v7074_v16 = vld [vmem:[%s8531_s27 + $0x78] sm:$0xe] }
  0x2a   : > { %1392 = vrot.lane.b32.xlu1 %v1237_v42, %s8472_s6  ;;  %v1256_v57 = vor.u32 %v1255_v48, %v1251_v39  ;;  %v8632_v62 = vcombine.low %v7029_v51, %v7030_v56  ;;  %v1486_v0 = vsel %vm778_vm1, %v1484_v47, %v1485_v35  ;;  %v1248_v3 = vrot.slane %v1246_v53, 1  ;;  %v8153_v15 = vld [vmem:[%s8531_s27 + $0x74] ss:$0 sps:$4 sm:$0x11]   ;;  %v7073_v19 = vld [vmem:[%s8531_s27 + $0x6c] sm:$0xe] }
  0x2b   : > { %1390 = vrot.lane.b32.xlu0 %v1225_v46, %s8472_s6  ;;  %v1243_v1 = vrot.slane %v1241_v60, 1  ;;  %v1493_v6 = vrot.slane %v7126_v54, 1  ;;  %v1490_v8 = vrot.slane %v7125_v55, 1  ;;  %v1282_v10 = vshll.u32 %v8635_v63, 16  ;;  %v7033_v20 = vld [vmem:[%s8531_s27 + $0x90] sm:$0xf] }
  0x2c   : > { %v1277_v9 = vshll.u32 %v8632_v62, 16  ;;  %v1261_v11 = vsel %vm471_vm2, %v1256_v57, %v1260_v58  ;;  %v1275_v13 = vshrl.u32 %v8632_v62, 16  ;;  %v8645_v14 = vcombine.low %v7027_v4, %v7028_v5  ;;  %v7034_v27 = vld [vmem:[%s8531_s27 + $0x94] sm:$0xf]  ;;  %v7031_v38 = vld [vmem:[%s8531_s27 + $0x84] sm:$0xf] }
  0x2d   : > { %v1244_v12 = vor.u32 %v1243_v1, %v1239_v59  ;;  %v1491_v17 = vrot.slane %v8617_v44, 1  ;;  %v1270_v26 = vshll.u32 %v8153_v15, 16  ;;  %v1284_v29 = vrot.slane %v1282_v10, 1  ;;  %v8662_v36 = vld [vmem:[%s8531_s27 + $0x98] ss:$0 sps:$4 sm:$0x11]  }
  0x2e   : > { %1536 = vrot.lane.b32.xlu1 %v1489_v52, %s8471_s30  ;;  %v1279_v18 = vrot.slane %v1277_v9, 1  ;;  %v1263_v24 = vshrl.u32 %v8645_v14, 16  ;;  %v1265_v25 = vshll.u32 %v8645_v14, 16  ;;  %v7128_v31 = vcombine.low %v7074_v16, %v7030_v56  ;;  %v7032_v41 = vld [vmem:[%s8531_s27 + $0x88] sm:$0xf] }
  0x2f   : > { %1534 = vrot.lane.b32.xlu0 %v1486_v0, %s8471_s30  ;;  %v1249_v22 = vsel %vm471_vm2, %v1244_v12, %v1248_v3  ;;  %v1495_v32 = vsel %vm778_vm1, %v1493_v6, %v1494_v61  ;;  %v8659_v35 = vcombine.low %v7033_v20, %v7034_v27  ;;  %v1272_v39 = vrot.slane %v1270_v26, 1  ;;  %v8670_v45 = vld [vmem:[%s8531_s27 + $0x8c] ss:$0 sps:$4 sm:$0x11]   ;;  %v7076_v51 = vld [vmem:[%s8531_s27 + $0x90] sm:$0xe] }
  0x30   : > { %v1280_v33 = vor.u32 %v1279_v18, %v1275_v13  ;;  %v1267_v34 = vrot.slane %v1265_v25, 1  ;;  %v7127_v40 = vcombine.low %v7073_v19, %v7028_v5  ;;  %v1492_v42 = vsel %vm778_vm1, %v1490_v8, %v1491_v17  ;;  %v7037_v56 = vld [vmem:[%s8531_s27 + $0xa8] sm:$0xf]  ;;  %v7038_v60 = vld [vmem:[%s8531_s27 + $0xac] sm:$0xf] }
  0x31   : > { %v1301_v44 = vshll.u32 %v8659_v35, 16  ;;  %v1499_v46 = vrot.slane %v7128_v31, 1  ;;  %v1500_v47 = vrot.slane %v8635_v63, 1  ;;  %v1497_v48 = vrot.slane %v8153_v15, 1  ;;  %v7075_v1 = vld [vmem:[%s8531_s27 + $0x84] sm:$0xe] }
  0x32   : > { %1396 = vrot.lane.b32.xlu1 %v1261_v11, %s8472_s6  ;;  %v1268_v43 = vor.u32 %v1267_v34, %v1263_v24  ;;  %v8674_v50 = vcombine.low %v7031_v38, %v7032_v41  ;;  %v1285_v52 = vsel %vm471_vm2, %v1280_v33, %v1284_v29  ;;  %v1299_v53 = vshrl.u32 %v8659_v35, 16  ;;  %v8692_v5 = vld [vmem:[%s8531_s27 + $0xb0] ss:$0 sps:$4 sm:$0x11]   ;;  %v7035_v6 = vld [vmem:[%s8531_s27 + $0x9c] sm:$0xf] }
  0x33   : > { %1394 = vrot.lane.b32.xlu0 %v1249_v22, %s8472_s6  ;;  %v1303_v54 = vrot.slane %v1301_v44, 1  ;;  %v1306_v55 = vshll.u32 %v8662_v36, 16  ;;  %v1496_v58 = vrot.slane %v7127_v40, 1  ;;  %v1294_v63 = vshll.u32 %v8670_v45, 16  ;;  %v8698_v12 = vld [vmem:[%s8531_s27 + $0xa0] sm:$0xf] }
  0x34   : > { %v1273_v57 = vsel %vm471_vm2, %v1268_v43, %v1272_v39  ;;  %v1289_v59 = vshll.u32 %v8674_v50, 16  ;;  %v1287_v61 = vshrl.u32 %v8674_v50, 16  ;;  %v7130_v0 = vcombine.low %v7076_v51, %v7034_v27  ;;  %v8707_v22 = vld [vmem:[%s8531_s27 + $0xa4] ss:$0 sps:$4 sm:$0x11]  }
  0x35   : > { %v8688_v3 = vcombine.low %v7037_v56, %v7038_v60  ;;  %v1501_v8 = vsel %vm778_vm1, %v1499_v46, %v1500_v47  ;;  %v1304_v9 = vor.u32 %v1303_v54, %v1299_v53  ;;  %v1308_v10 = vrot.slane %v1306_v55, 1  ;;  %v7078_v31 = vld [vmem:[%s8531_s27 + $0xa8] sm:$0xe]  ;;  %v8717_v33 = vld [vmem:[%s8531_s27 + $0xc4] sm:$0xf] }
  0x36   : > { %1540 = vrot.lane.b32.xlu1 %v1495_v32, %s8471_s30  ;;  %v1291_v4 = vrot.slane %v1289_v59, 1  ;;  %v1498_v13 = vsel %vm778_vm1, %v1496_v58, %v1497_v48  ;;  %v7129_v15 = vcombine.low %v7075_v1, %v7032_v41  ;;  %v8703_v16 = vcombine.low %v7035_v6, %v8698_v12  ;;  %v7041_v32 = vld [vmem:[%s8531_s27 + $0xc0] sm:$0xf]  ;;  %v7039_v39 = vld [vmem:[%s8531_s27 + $0xb4] sm:$0xf] }
  0x37   : > { %1538 = vrot.lane.b32.xlu0 %v1492_v42, %s8471_s30  ;;  %v1325_v11 = vshll.u32 %v8688_v3, 16  ;;  %v1296_v18 = vrot.slane %v1294_v63, 1  ;;  %v1505_v19 = vrot.slane %v7130_v0, 1  ;;  %v1506_v20 = vrot.slane %v8662_v36, 1  ;;  %v7077_v47 = vld [vmem:[%s8531_s27 + $0x9c] sm:$0xe] }
  0x38   : > { %v1292_v17 = vor.u32 %v1291_v4, %v1287_v61  ;;  %v1323_v24 = vshrl.u32 %v8688_v3, 16  ;;  %v1330_v26 = vshll.u32 %v8692_v5, 16  ;;  %v1313_v27 = vshll.u32 %v8703_v16, 16  ;;  %v8729_v44 = vld [vmem:[%s8531_s27 + $0xc8] ss:$0 sps:$4 sm:$0x11]  }
  0x39   : > { %v1327_v25 = vrot.slane %v1325_v11, 1  ;;  %v1309_v29 = vsel %vm471_vm2, %v1304_v9, %v1308_v10  ;;  %v1502_v34 = vrot.slane %v7129_v15, 1  ;;  %v1503_v36 = vrot.slane %v8670_v45, 1  ;;  %v8735_v48 = vld [vmem:[%s8531_s27 + $0xb8] sm:$0xf] }
  0x3a   : > { %1400 = vrot.lane.b32.xlu1 %v1285_v52, %s8472_s6  ;;  %v8722_v38 = vcombine.low %v7041_v32, %v8717_v33  ;;  %v1297_v40 = vsel %vm471_vm2, %v1292_v17, %v1296_v18  ;;  %v1311_v41 = vshrl.u32 %v8703_v16, 16  ;;  %v1315_v42 = vrot.slane %v1313_v27, 1  ;;  %v8744_v56 = vld [vmem:[%s8531_s27 + $0xbc] ss:$0 sps:$4 sm:$0x11]  }
  0x3b   : > { %1398 = vrot.lane.b32.xlu0 %v1273_v57, %s8472_s6  ;;  %v1318_v43 = vshll.u32 %v8707_v22, 16  ;;  %v1507_v46 = vsel %vm778_vm1, %v1505_v19, %v1506_v20  ;;  %v7132_v45 = vcombine.low %v7078_v31, %v7038_v60  ;;  %v1328_v51 = vor.u32 %v1327_v25, %v1323_v24  ;;  %v7045_v57 = vld [vmem:[%s8531_s27 + $0xd8] sm:$0xf]  ;;  %v8750_v63 = vld [vmem:[%s8531_s27 + $0xdc] sm:$0xf] }
  0x3c   : > { %v1332_v52 = vrot.slane %v1330_v26, 1  ;;  %v1349_v53 = vshll.u32 %v8722_v38, 16  ;;  %v8739_v54 = vcombine.low %v7039_v39, %v8735_v48  ;;  %v1504_v55 = vsel %vm778_vm1, %v1502_v34, %v1503_v36  ;;  %v7080_v11 = vld [vmem:[%s8531_s27 + $0xc0] sm:$0xe]  ;;  %v8766_v17 = vld [vmem:[%s8531_s27 + $0xd0] sm:$0xf] }
  0x3d   : > { %v1316_v58 = vor.u32 %v1315_v42, %v1311_v41  ;;  %v1320_v59 = vrot.slane %v1318_v43, 1  ;;  %v7131_v60 = vcombine.low %v7077_v47, %v8698_v12  ;;  %v1511_v0 = vrot.slane %v7132_v45, 1  ;;  %v7079_v24 = vld [vmem:[%s8531_s27 + $0xb4] sm:$0xe]  ;;  %v257_v36 = vld [vmem:[%s8531_s27 + $0xc] sm:$0xf] }
  0x3e   : > { %1544 = vrot.lane.b32.xlu1 %v1501_v8, %s8471_s30  ;;  %v1337_v61 = vshll.u32 %v8739_v54, 16  ;;  %v1512_v1 = vrot.slane %v8692_v5, 1  ;;  %v1347_v4 = vshrl.u32 %v8722_v38, 16  ;;  %v1354_v6 = vshll.u32 %v8729_v44, 16 }
  0x3f   : > { %1542 = vrot.lane.b32.xlu0 %v1498_v13, %s8471_s30  ;;  %v1333_v8 = vsel %vm471_vm2, %v1328_v51, %v1332_v52  ;;  %v1351_v9 = vrot.slane %v1349_v53, 1  ;;  %v1335_v10 = vshrl.u32 %v8739_v54, 16  ;;  %v8760_v12 = vcombine.low %v7045_v57, %v8750_v63  ;;  %v7043_v13 = vld [vmem:[%s8531_s27 + $0xcc] sm:$0xf]  ;;  %v255_v51 = vld [vmem:[%s8531_s27] sm:$0xf] }
  0x40   : > { %v1339_v5 = vrot.slane %v1337_v61, 1  ;;  %v1342_v15 = vshll.u32 %v8744_v56, 16  ;;  %v1321_v18 = vsel %vm471_vm2, %v1316_v58, %v1320_v59  ;;  %v1508_v19 = vrot.slane %v7131_v60, 1  ;;  %v8778_v32 = vld [vmem:[%s8531_s27 + $0xe0] ss:$0 sps:$4 sm:$0x11]  }
  0x41   : > { %v1509_v20 = vrot.slane %v8707_v22, 1  ;;  %v1356_v25 = vrot.slane %v1354_v6, 1  ;;  %v7134_v26 = vcombine.low %v7080_v11, %v8717_v33  ;;  %v8774_v27 = vcombine.low %v7043_v13, %v8766_v17  ;;  %v8785_v33 = vld [vmem:[%s8531_s27 + $0x10] sm:$0xf]  ;;  %v8802_v57 = vld [vmem:[%s8531_s27 + $0x4] sm:$0xf] }
  0x42   : > { %1404 = vrot.lane.b32.xlu1 %v1309_v29, %s8472_s6  ;;  %v1513_v29 = vsel %vm778_vm1, %v1511_v0, %v1512_v1  ;;  %v1352_v31 = vor.u32 %v1351_v9, %v1347_v4  ;;  %v1373_v34 = vshll.u32 %v8760_v12, 16  ;;  %v1340_v22 = vor.u32 %v1339_v5, %v1335_v10  ;;  %v8789_v42 = vld [vmem:[%s8531_s27 + $0xd4] ss:$0 sps:$4 sm:$0x11]   ;;  %v7082_v60 = vld [vmem:[%s8531_s27 + $0xd8] sm:$0xe] }
  0x43   : > { %1402 = vrot.lane.b32.xlu0 %v1297_v40, %s8472_s6  ;;  %v1344_v39 = vrot.slane %v1342_v15, 1  ;;  %v7133_v40 = vcombine.low %v7079_v24, %v8735_v48  ;;  %v1510_v41 = vsel %vm778_vm1, %v1508_v19, %v1509_v20  ;;  %v1361_v43 = vshll.u32 %v8774_v27, 16  ;;  %v7081_v4 = vld [vmem:[%s8531_s27 + $0xcc] sm:$0xe]  ;;  %v7179_v20 = vld [vmem:[%s8531_s27 + $0x24] sm:$0xf] }
  0x44   : > { %v1518_v45 = vrot.slane %v8729_v44, 1  ;;  %v8795_v47 = vcombine.low %v257_v36, %v8785_v33  ;;  %v1357_v48 = vsel %vm471_vm2, %v1352_v31, %v1356_v25  ;;  %v1371_v52 = vshrl.u32 %v8760_v12, 16  ;;  %v8817_v9 = vld [vmem:[%s8531_s27 + $0x14] ss:$0 sps:$4 sm:$0x11]  }
  0x45   : > { %v1375_v53 = vrot.slane %v1373_v34, 1  ;;  %v1345_v58 = vsel %vm471_vm2, %v1340_v22, %v1344_v39  ;;  %v1514_v44 = vrot.slane %v7133_v40, 1  ;;  %v1515_v59 = vrot.slane %v8744_v56, 1  ;;  %v8823_v15 = vld [vmem:[%s8531_s27 + $0x8] ss:$0 sps:$4 sm:$0x11]  }
  0x46   : > { %1548 = vrot.lane.b32.xlu1 %v1507_v46, %s8471_s30  ;;  %v1517_v46 = vrot.slane %v7134_v26, 1  ;;  %v1359_v61 = vshrl.u32 %v8774_v27, 16  ;;  %v1363_v0 = vrot.slane %v1361_v43, 1  ;;  %v1366_v1 = vshll.u32 %v8789_v42, 16  ;;  %v8830_v24 = vld [vmem:[%s8531_s27 + $0x28] sm:$0xf] }
  0x47   : > { %1546 = vrot.lane.b32.xlu0 %v1504_v55, %s8471_s30  ;;  %v1378_v55 = vshll.u32 %v8778_v32, 16  ;;  %v8812_v6 = vcombine.low %v255_v51, %v8802_v57  ;;  %v487_v56 = vshll.u32 %v8795_v47, 16  ;;  %v1376_v10 = vor.u32 %v1375_v53, %v1371_v52  ;;  %v7177_v31 = vld [vmem:[%s8531_s27 + $0x18] sm:$0xf]  ;;  %v8838_v36 = vld [vmem:[%s8531_s27 + $0x1c] sm:$0xf] }
  0x48   : > { %v7136_v13 = vcombine.low %v7082_v60, %v8750_v63  ;;  %v1524_v5 = vrot.slane %v8778_v32, 1  ;;  %v7135_v19 = vcombine.low %v7081_v4, %v8766_v17  ;;  %v1364_v25 = vor.u32 %v1363_v0, %v1359_v61  ;;  %v310_v40 = vld [vmem:[%s8531_s27 + $0xc] sm:$0xe]  ;;  %v309_v52 = vld [vmem:[%s8531_s27] sm:$0xe] }
  0x49   : > { %v1380_v11 = vrot.slane %v1378_v55, 1  ;;  %v1368_v26 = vrot.slane %v1366_v1, 1  ;;  %v475_v63 = vshll.u32 %v8812_v6, 16  ;;  %v489_v32 = vrot.slane %v487_v56, 1  ;;  %v261_v0 = vld [vmem:[%s8531_s27 + $0x24] sm:$0xf] }
  0x4a   : > { %1408 = vrot.lane.b32.xlu1 %v1333_v8, %s8472_s6  ;;  %v1519_v8 = vsel %vm778_vm1, %v1517_v46, %v1518_v45  ;;  %v492_v34 = vshll.u32 %v8817_v9, 16  ;;  %v1523_v22 = vrot.slane %v7136_v13, 1  ;;  %v1521_v39 = vrot.slane %v8789_v42, 1  ;;  %v8855_v53 = vld [vmem:[%s8531_s27 + $0x2c] ss:$0 sps:$4 sm:$0x11]  }
  0x4b   : > { %1406 = vrot.lane.b32.xlu0 %v1321_v18, %s8472_s6  ;;  %v1516_v18 = vsel %vm778_vm1, %v1514_v44, %v1515_v59  ;;  %v1381_v17 = vsel %vm471_vm2, %v1376_v10, %v1380_v11  ;;  %v1520_v43 = vrot.slane %v7135_v19, 1  ;;  %v473_v46 = vshrl.u32 %v8812_v6, 16  ;;  %v8860_v59 = vld [vmem:[%s8531_s27 + $0x20] ss:$0 sps:$4 sm:$0x11]  }
  0x4c   : > { %v480_v45 = vshll.u32 %v8823_v15, 16  ;;  %v8850_v51 = vcombine.low %v7177_v31, %v8838_v36  ;;  %v477_v42 = vrot.slane %v475_v63, 1  ;;  %v6994_v44 = vcombine.low %v310_v40, %v8785_v33  ;;  %v8866_v1 = vld [vmem:[%s8531_s27 + $0x28] sm:$0xf]  ;;  %v259_v19 = vld [vmem:[%s8531_s27 + $0x18] sm:$0xf] }
  0x4d   : > { %v1525_v60 = vsel %vm778_vm1, %v1523_v22, %v1524_v5  ;;  %v6993_v33 = vcombine.low %v309_v52, %v8802_v57  ;;  %v783_v5 = vrot.slane %v8817_v9, 1  ;;  %v2329_v57 = vshll.u32 %v8855_v53, 16  ;;  %v7232_v31 = vld [vmem:[%s8531_s27 + $0x24] sm:$0xe]  ;;  %v7231_v22 = vld [vmem:[%s8531_s27 + $0x18] sm:$0xe] }
  0x4e   : > { %1552 = vrot.lane.b32.xlu1 %v1513_v29, %s8471_s30  ;;  %v485_v29 = vshrl.u32 %v8795_v47, 16  ;;  %v2312_v4 = vshll.u32 %v8850_v51, 16  ;;  %v478_v56 = vor.u32 %v477_v42, %v473_v46  ;;  %v482_v10 = vrot.slane %v480_v45, 1  ;;  %v8902_v52 = vld [vmem:[%s8531_s27 + $0x20] ss:$0 sps:$4 sm:$0x11]  }
  0x4f   : > { %1550 = vrot.lane.b32.xlu0 %v1510_v41, %s8471_s30  ;;  %v8844_v41 = vcombine.low %v7179_v20, %v8830_v24  ;;  %v782_v13 = vrot.slane %v6994_v44, 1  ;;  %v8880_v20 = vld [vmem:[%s8531_s27 + $0x1c] sm:$0xf]  ;;  %v2310_v63 = vshrl.u32 %v8850_v51, 16 }
  0x50   : > { %v490_v55 = vor.u32 %v489_v32, %v485_v29  ;;  %v2317_v29 = vshll.u32 %v8860_v59, 16  ;;  %v2314_v9 = vrot.slane %v2312_v4, 1  ;;  %v483_v32 = vsel %vm471_vm2, %v478_v56, %v482_v10  ;;  %v7183_v44 = vld [vmem:[%s8531_s27 + $0x3c] sm:$0xf]  ;;  %v7181_v4 = vld [vmem:[%s8531_s27 + $0x30] sm:$0xf] }
  0x51   : > { %v2324_v61 = vshll.u32 %v8844_v41, 16  ;;  %v784_v40 = vsel %vm778_vm1, %v782_v13, %v783_v5  ;;  %v2619_v13 = vrot.slane %v8855_v53, 1 }
  0x52   : > { %1412 = vrot.lane.b32.xlu1 %v1357_v48, %s8472_s6  ;;  %v1369_v48 = vsel %vm471_vm2, %v1364_v25, %v1368_v26  ;;  %v2322_v25 = vshrl.u32 %v8844_v41, 16  ;;  %v2319_v42 = vrot.slane %v2317_v29, 1 }
  0x53   : > { %1410 = vrot.lane.b32.xlu0 %v1345_v58, %s8472_s6  ;;  %v494_v58 = vrot.slane %v492_v34, 1  ;;  %v2326_v26 = vrot.slane %v2324_v61, 1  ;;  %v779_v34 = vrot.slane %v6993_v33, 1 }
  0x55   : > { %v495_v11 = vsel %vm471_vm2, %v490_v55, %v494_v58  ;;  %v2327_v45 = vor.u32 %v2326_v26, %v2322_v25  ;;  %v2315_v55 = vor.u32 %v2314_v9, %v2310_v63  ;;  %v7285_v58 = vcombine.low %v7231_v22, %v8838_v36  ;;  %v312_v36 = vld [vmem:[%s8531_s27 + $0x24] sm:$0xe]  ;;  %v8940_v22 = vld [vmem:[%s8531_s27 + $0x38] ss:$0 sps:$4 sm:$0x11]  }
  0x56   : > { %1556 = vrot.lane.b32.xlu1 %v1519_v8, %s8471_s30  ;;  %v1522_v8 = vsel %vm778_vm1, %v1520_v43, %v1521_v39  ;;  %v8892_v39 = vcombine.low %v259_v19, %v8880_v20  ;;  %v8897_v43 = vld [vmem:[%s8531_s27 + $0x2c] ss:$0 sps:$4 sm:$0x11]   ;;  %v2616_v26 = vrot.slane %v8860_v59, 1  ;;  %v504_v9 = vshll.u32 %v8902_v52, 16 }
  0x57   : > { %1554 = vrot.lane.b32.xlu0 %v1516_v18, %s8471_s30  ;;  %v8876_v18 = vcombine.low %v261_v0, %v8866_v1  ;;  %v516_v10 = vshll.u32 %v8897_v43, 16  ;;  %v2320_v19 = vsel %vm471_vm2, %v2315_v55, %v2319_v42  ;;  %v2615_v25 = vrot.slane %v7285_v58, 1 }
  0x58   : > { %v499_v0 = vshll.u32 %v8892_v39, 16  ;;  %v497_v63 = vshrl.u32 %v8892_v39, 16  ;;  %v506_v55 = vrot.slane %v504_v9, 1 }
  0x59   : > { %v511_v46 = vshll.u32 %v8876_v18, 16 }
  0x5a   : > { %1416 = vrot.lane.b32.xlu1 %v1381_v17, %s8472_s6  ;;  %v780_v17 = vrot.slane %v8823_v15, 1  ;;  %v7286_v15 = vcombine.low %v7232_v31, %v8830_v24  ;;  %v509_v24 = vshrl.u32 %v8876_v18, 16  ;;  %v501_v53 = vrot.slane %v499_v0, 1 }
  0x5b   : > { %1414 = vrot.lane.b32.xlu0 %v1369_v48, %s8472_s6  ;;  %v2331_v48 = vrot.slane %v2329_v57, 1  ;;  %v513_v56 = vrot.slane %v511_v46, 1  ;;  %v311_v57 = vld [vmem:[%s8531_s27 + $0x18] sm:$0xe]  ;;  %v6996_v31 = vcombine.low %v312_v36, %v8866_v1  ;;  %v265_v46 = vld [vmem:[%s8531_s27 + $0x3c] sm:$0xf]  ;;  %v2617_v1 = vsel %vm778_vm1, %v2615_v25, %v2616_v26 }
  0x5c   : > { %v781_v61 = vsel %vm778_vm1, %v779_v34, %v780_v17  ;;  %v518_v17 = vrot.slane %v516_v10, 1  ;;  %v2341_v36 = vshll.u32 %v8940_v22, 16  ;;  %v786_v25 = vrot.slane %v8902_v52, 1  ;;  %v7233_v26 = vld [vmem:[%s8531_s27 + $0x30] sm:$0xe] }
  0x5d   : > { %v2332_v33 = vsel %vm471_vm2, %v2327_v45, %v2331_v48  ;;  %v514_v34 = vor.u32 %v513_v56, %v509_v24  ;;  %v8946_v45 = vld [vmem:[%s8531_s27 + $0x40] sm:$0xf]  ;;  %v789_v48 = vrot.slane %v8897_v43, 1  ;;  %v788_v58 = vrot.slane %v6996_v31, 1  ;;  %v8960_v24 = vld [vmem:[%s8531_s27 + $0x34] sm:$0xf] }
  0x5e   : > { %1560 = vrot.lane.b32.xlu1 %v1525_v60, %s8471_s30  ;;  %v8908_v60 = vld [vmem:[%s8531_s27 + $0x40] sm:$0xf]  ;;  %v8956_v0 = vcombine.low %v265_v46, %v8946_v45 }
  0x5f   : > { %1558 = vrot.lane.b32.xlu0 %v1522_v8, %s8471_s30  ;;  %v8914_v8 = vld [vmem:[%s8531_s27 + $0x34] sm:$0xf]  ;;  %v8923_v5 = vcombine.low %v7183_v44, %v8908_v60  ;;  %v6995_v44 = vcombine.low %v311_v57, %v8880_v20 }
  0x60   : > { %v8930_v29 = vcombine.low %v7181_v4, %v8914_v8  ;;  %v263_v4 = vld [vmem:[%s8531_s27 + $0x30] sm:$0xf]  ;;  %v535_v9 = vshll.u32 %v8956_v0, 16  ;;  %v7287_v46 = vcombine.low %v7233_v26, %v8914_v8 }
  0x61   : > { %v2346_v43 = vshrl.u32 %v8923_v5, 16  ;;  %v8972_v57 = vcombine.low %v263_v4, %v8960_v24  ;;  %v314_v4 = vld [vmem:[%s8531_s27 + $0x3c] sm:$0xe] }
  0x62   : > { %690 = vrot.lane.b32.xlu1 %v495_v11, %s8472_s6  ;;  %v2618_v11 = vrot.slane %v7286_v15, 1  ;;  %v2336_v42 = vshll.u32 %v8930_v29, 16  ;;  %v502_v15 = vor.u32 %v501_v53, %v497_v63  ;;  %v2334_v20 = vshrl.u32 %v8930_v29, 16  ;;  %v8977_v53 = vld [vmem:[%s8531_s27 + $0x44] ss:$0 sps:$4 sm:$0x11]  }
  0x63   : > { %688 = vrot.lane.b32.xlu0 %v483_v32, %s8472_s6  ;;  %v8936_v32 = vld [vmem:[%s8531_s27 + $0x44] ss:$0 sps:$4 sm:$0x11]   ;;  %11659 = vst [vmem:[#allocation3_spill] sm:$0xff] %v8972_v57  ;;  %v790_v63 = vsel %vm778_vm1, %v788_v58, %v789_v48  ;;  %v8988_v48 = vld [vmem:[%s8531_s27 + $0x58] sm:$0xf] }
  0x64   : > { %v2620_v59 = vsel %vm778_vm1, %v2618_v11, %v2619_v13  ;;  %v2353_v10 = vshll.u32 %v8936_v32, 16  ;;  %v7234_v11 = vld [vmem:[%s8531_s27 + $0x3c] sm:$0xe]  ;;  %v507_v13 = vsel %vm471_vm2, %v502_v15, %v506_v55  ;;  %v523_v15 = vshll.u32 %v8972_v57, 16  ;;  %v7185_v55 = vld [vmem:[%s8531_s27 + $0x48] sm:$0xf] }
  0x65   : > { %v7288_v52 = vcombine.low %v7234_v11, %v8908_v60  ;;  %v8994_v58 = vld [vmem:[%s8531_s27 + $0x4c] sm:$0xf]  ;;  %v533_v60 = vshrl.u32 %v8956_v0, 16 }
  0x66   : > { %835 = vrot.lane.b32.xlu1 %v784_v40, %s8471_s30  ;;  %v2348_v40 = vshll.u32 %v8923_v5, 16  ;;  %v9009_v11 = vcombine.low %v7185_v55, %v8994_v58 }
  0x67   : > { %833 = vrot.lane.b32.xlu0 %v781_v61, %s8471_s30  ;;  %v519_v61 = vsel %vm471_vm2, %v514_v34, %v518_v17  ;;  %v2355_v34 = vrot.slane %v2353_v10, 1  ;;  %v2343_v17 = vrot.slane %v2341_v36, 1 }
  0x68   : > { %v2350_v56 = vrot.slane %v2348_v40, 1  ;;  %11661 = vst [vmem:[#allocation5_spill] sm:$0xff] %v9009_v11 }
  0x6a   : > { %2527 = vrot.lane.b32.xlu1 %v2332_v33, %s8472_s6  ;;  %v2338_v33 = vrot.slane %v2336_v42, 1  ;;  %v2351_v31 = vor.u32 %v2350_v56, %v2346_v43  ;;  %v2624_v43 = vrot.slane %v7288_v52, 1  ;;  %v2625_v56 = vrot.slane %v8936_v32, 1  ;;  %v269_v52 = vld [vmem:[%s8531_s27 + $0x54] sm:$0xf] }
  0x6b   : > { %2525 = vrot.lane.b32.xlu0 %v2320_v19, %s8472_s6  ;;  %v785_v19 = vrot.slane %v6995_v44, 1  ;;  %v537_v44 = vrot.slane %v535_v9, 1  ;;  %v313_v9 = vld [vmem:[%s8531_s27 + $0x30] sm:$0xe] }
  0x6c   : > { %v2339_v40 = vor.u32 %v2338_v33, %v2334_v20  ;;  %v2356_v8 = vsel %vm471_vm2, %v2351_v31, %v2355_v34  ;;  %v2621_v20 = vrot.slane %v7287_v46, 1  ;;  %v2622_v33 = vrot.slane %v8940_v22, 1  ;;  %v9017_v31 = vld [vmem:[%s8531_s27 + $0x5c] ss:$0 sps:$4 sm:$0x11]  }
  0x6d   : > { %v787_v42 = vsel %vm778_vm1, %v785_v19, %v786_v25  ;;  %v525_v19 = vrot.slane %v523_v15, 1  ;;  %v6998_v25 = vcombine.low %v314_v4, %v8946_v45  ;;  %v538_v26 = vor.u32 %v537_v44, %v533_v60  ;;  %v9037_v4 = vld [vmem:[%s8531_s27 + $0x4c] sm:$0xf] }
  0x6e   : > { %2671 = vrot.lane.b32.xlu1 %v2620_v59, %s8471_s30  ;;  %v8982_v59 = vld [vmem:[%s8531_s27 + $0x38] ss:$0 sps:$4 sm:$0x11]   ;;  %v2344_v36 = vsel %vm471_vm2, %v2339_v40, %v2343_v17  ;;  %v2626_v22 = vsel %vm778_vm1, %v2624_v43, %v2625_v56  ;;  %v9022_v17 = vld [vmem:[%s8531_s27 + $0x50] ss:$0 sps:$4 sm:$0x11]   ;;  %v2623_v45 = vsel %vm778_vm1, %v2621_v20, %v2622_v33  ;;  %v6997_v60 = vcombine.low %v313_v9, %v8960_v24 }
  0x6f   : > { %2669 = vrot.lane.b32.xlu0 %v2617_v1, %s8471_s30  ;;  %v7187_v1 = vld [vmem:[%s8531_s27 + $0x54] sm:$0xf]  ;;  %v528_v32 = vshll.u32 %v8982_v59, 16  ;;  %v795_v40 = vrot.slane %v8977_v53, 1  ;;  %v2360_v46 = vshll.u32 %v9009_v11, 16  ;;  %v794_v55 = vrot.slane %v6998_v25, 1 }
  0x70   : > { %v9003_v10 = vcombine.low %v7187_v1, %v8988_v48  ;;  %v9030_v1 = vld [vmem:[%s8531_s27 + $0x58] sm:$0xf]  ;;  %v2377_v43 = vshll.u32 %v9017_v31, 16  ;;  %v7236_v56 = vld [vmem:[%s8531_s27 + $0x54] sm:$0xe]  ;;  %v2358_v24 = vshrl.u32 %v9009_v11, 16 }
  0x71   : > { %v530_v15 = vrot.slane %v528_v32, 1  ;;  %v2362_v20 = vrot.slane %v2360_v46, 1  ;;  %v2365_v33 = vshll.u32 %v9022_v17, 16  ;;  %v792_v32 = vrot.slane %v8982_v59, 1  ;;  %v7235_v25 = vld [vmem:[%s8531_s27 + $0x48] sm:$0xe] }
  0x72   : > { %694 = vrot.lane.b32.xlu1 %v519_v61, %s8472_s6  ;;  %v540_v61 = vshll.u32 %v8977_v53, 16  ;;  %11660 = vst [vmem:[#allocation4_spill] sm:$0xff] %v9003_v10  ;;  %v2372_v34 = vshll.u32 %v9003_v10, 16  ;;  %v9057_v9 = vld [vmem:[%s8531_s27 + $0x5c] ss:$0 sps:$4 sm:$0x11]  }
  0x73   : > { %692 = vrot.lane.b32.xlu0 %v507_v13, %s8472_s6  ;;  %v521_v13 = vshrl.u32 %v8972_v57, 16  ;;  %v7191_v59 = vld [vmem:[%s8531_s27 + $0x6c] sm:$0xf]  ;;  %v9063_v46 = vld [vmem:[%s8531_s27 + $0x70] sm:$0xf] }
  0x74   : > { %v2374_v53 = vrot.slane %v2372_v34, 1  ;;  %v9146_v57 = vld [vmem:[%s8531_s27 + $0x74] ss:$0 sps:$4 sm:$0x11]  }
  0x76   : > { %839 = vrot.lane.b32.xlu1 %v790_v63, %s8471_s30  ;;  %v542_v63 = vrot.slane %v540_v61, 1  ;;  %v267_v61 = vld [vmem:[%s8531_s27 + $0x48] sm:$0xf] }
  0x77   : > { %837 = vrot.lane.b32.xlu0 %v787_v42, %s8471_s30  ;;  %v526_v42 = vor.u32 %v525_v19, %v521_v13  ;;  %v791_v19 = vrot.slane %v6997_v60, 1  ;;  %v7289_v60 = vcombine.low %v7235_v25, %v8994_v58 }
  0x78   : > { %v543_v44 = vsel %vm471_vm2, %v538_v26, %v542_v63  ;;  %v9052_v26 = vcombine.low %v267_v61, %v9037_v4  ;;  %v7290_v63 = vcombine.low %v7236_v56, %v8988_v48  ;;  %v2631_v61 = vrot.slane %v9017_v31, 1 }
  0x79   : > { %v531_v13 = vsel %vm471_vm2, %v526_v42, %v530_v15  ;;  %v2363_v42 = vor.u32 %v2362_v20, %v2358_v24  ;;  %v2367_v15 = vrot.slane %v2365_v33, 1  ;;  %v793_v48 = vsel %vm778_vm1, %v791_v19, %v792_v32  ;;  %v9087_v33 = vld [vmem:[%s11633_s1 + $0x20] ss:$0 sps:$4 sm:$0xff]   ;;  %v316_v32 = vld [vmem:[%s8531_s27 + $0x54] sm:$0xe] }
  0x7a   : > { %2531 = vrot.lane.b32.xlu1 %v2356_v8, %s8472_s6  ;;  %v2370_v8 = vshrl.u32 %v9003_v10, 16  ;;  %11663 = vst [vmem:[#allocation7_spill] sm:$0xff] %v9052_v26  ;;  %v564_v20 = vshll.u32 %v9057_v9, 16  ;;  %v2628_v19 = vrot.slane %v9022_v17, 1  ;;  %v545_v25 = vshrl.u32 %v9052_v26, 16  ;;  %8094 = vmatprep.subr.msk.bf16.mxu0 %vm1683_vm0, %v9087_v33 }
  0x7b   : > { %2529 = vrot.lane.b32.xlu0 %v2344_v36, %s8472_s6  ;;  %v9043_v36 = vcombine.low %v269_v52, %v9030_v1  ;;  %v2379_v52 = vrot.slane %v2377_v43, 1  ;;  %v9079_v43 = vld [vmem:[%s8531_s27 + $0x64] sm:$0xf]  ;;  %v2368_v31 = vsel %vm471_vm2, %v2363_v42, %v2367_v15  ;;  %v7237_v10 = vld [vmem:[%s8531_s27 + $0x60] sm:$0xe] }
  0x7c   : > { %v2375_v34 = vor.u32 %v2374_v53, %v2370_v8  ;;  %v9075_v8 = vcombine.low %v7191_v59, %v9063_v46  ;;  %v7189_v53 = vld [vmem:[%s8531_s27 + $0x60] sm:$0xf]  ;;  %v566_v15 = vrot.slane %v564_v20, 1  ;;  %v9123_v20 = vld [vmem:[%s8531_s27 + $0x64] sm:$0xf] }
  0x7d   : > { %11662 = vst [vmem:[#allocation6_spill] sm:$0xff] %v9043_v36  ;;  %v557_v56 = vshrl.u32 %v9043_v36, 16 }
  0x7e   : > { %2675 = vrot.lane.b32.xlu1 %v2626_v22, %s8471_s30  ;;  %v796_v22 = vsel %vm778_vm1, %v794_v55, %v795_v40  ;;  %v547_v40 = vshll.u32 %v9052_v26, 16  ;;  %v2630_v55 = vrot.slane %v7290_v63, 1  ;;  %11664 = vst [vmem:[#allocation8_spill] sm:$0xff] %v9075_v8  ;;  %v2380_v58 = vsel %vm471_vm2, %v2375_v34, %v2379_v52  ;;  %v315_v52 = vld [vmem:[%s8531_s27 + $0x48] sm:$0xe] }
  0x7f   : > { %2673 = vrot.lane.b32.xlu0 %v2623_v45, %s8471_s30  ;;  %v559_v45 = vshll.u32 %v9043_v36, 16  ;;  %v9096_v34 = vcombine.low %v7189_v53, %v9079_v43  ;;  %v2396_v17 = vshll.u32 %v9075_v8, 16  ;;  %v273_v26 = vld [vmem:[%s8531_s27 + $0x6c] sm:$0xf]  ;;  %v9117_v36 = vld [vmem:[%s8531_s27 + $0x70] sm:$0xf] }
  0x80   : > { %v549_v63 = vrot.slane %v547_v40, 1  ;;  %v2632_v59 = vsel %vm778_vm1, %v2630_v55, %v2631_v61 }
  0x81   : > { %v561_v24 = vrot.slane %v559_v45, 1  ;;  %11665 = vst [vmem:[#allocation9_spill] sm:$0xff] %v9096_v34  ;;  %v9103_v45 = vld [vmem:[%s8531_s27 + $0x74] ss:$0 sps:$4 sm:$0x11]  }
  0x82   : > { %698 = vrot.lane.b32.xlu1 %v543_v44, %s8472_s6  ;;  %v9069_v44 = vld [vmem:[%s8531_s27 + $0x50] ss:$0 sps:$4 sm:$0x11]   ;;  %v550_v55 = vor.u32 %v549_v63, %v545_v25  ;;  %v801_v25 = vrot.slane %v9057_v9, 1  ;;  %v7238_v63 = vld [vmem:[%s8531_s27 + $0x6c] sm:$0xe] }
  0x83   : > { %696 = vrot.lane.b32.xlu0 %v531_v13, %s8472_s6  ;;  %v2627_v13 = vrot.slane %v7289_v60, 1  ;;  %v562_v42 = vor.u32 %v561_v24, %v557_v56  ;;  %v7000_v60 = vcombine.low %v316_v32, %v9030_v1  ;;  %v6999_v56 = vcombine.low %v315_v52, %v9037_v4  ;;  %v271_v24 = vld [vmem:[%s8531_s27 + $0x60] sm:$0xf] }
  0x84   : > { %v2384_v1 = vshll.u32 %v9096_v34, 16  ;;  %v9132_v4 = vcombine.low %v273_v26, %v9117_v36  ;;  %v798_v52 = vrot.slane %v9069_v44, 1  ;;  %v2382_v26 = vshrl.u32 %v9096_v34, 16 }
  0x85   : > { %v567_v32 = vsel %vm471_vm2, %v562_v42, %v566_v15  ;;  %v800_v11 = vrot.slane %v7000_v60, 1  ;;  %v797_v42 = vrot.slane %v6999_v56, 1  ;;  %v7195_v56 = vld [vmem:[%s8531_s27 + $0x84] sm:$0xf] }
  0x86   : > { %843 = vrot.lane.b32.xlu1 %v796_v22, %s8471_s30  ;;  %v552_v22 = vshll.u32 %v9069_v44, 16  ;;  %v2386_v15 = vrot.slane %v2384_v1, 1  ;;  %v7292_v44 = vcombine.low %v7238_v63, %v9063_v46  ;;  %v9154_v1 = vld [vmem:[%s8531_s27 + $0x88] sm:$0xf]  ;;  %v7291_v63 = vcombine.low %v7237_v10, %v9079_v43  ;;  %v318_v43 = vld [vmem:[%s8531_s27 + $0x6c] sm:$0xe] }
  0x87   : > { %841 = vrot.lane.b32.xlu0 %v793_v48, %s8471_s30  ;;  %v9109_v48 = vld [vmem:[%s8531_s27 + $0x68] ss:$0 sps:$4 sm:$0x11]   ;;  %v9176_v34 = vcombine.low %v7195_v56, %v9154_v1 }
  0x88   : > { %v554_v61 = vrot.slane %v552_v22, 1 }
  0x8a   : > { %2535 = vrot.lane.b32.xlu1 %v2380_v58, %s8472_s6  ;;  %v9112_v40 = vpop.permute.xlu0 %1530  ;;  %v2629_v58 = vsel %vm778_vm1, %v2627_v13, %v2628_v19  ;;  %v2398_v13 = vrot.slane %v2396_v17, 1  ;;  %v2401_v19 = vshll.u32 %v9103_v45, 16  ;;  %v2389_v17 = vshll.u32 %v9109_v48, 16 }
  0x8b   : > { %2533 = vrot.lane.b32.xlu0 %v2368_v31, %s8472_s6  ;;  %v2394_v31 = vshrl.u32 %v9075_v8, 16  ;;  %v555_v9 = vsel %vm471_vm2, %v550_v55, %v554_v61  ;;  %v802_v55 = vsel %vm778_vm1, %v800_v11, %v801_v25  ;;  %v583_v61 = vshll.u32 %v9132_v4, 16 }
  0x8c   : > { %v1527_v53 = vpop.permute.xlu1 %1526  ;;  %v2403_v8 = vrot.slane %v2401_v19, 1  ;;  %v2637_v19 = vrot.slane %v9103_v45, 1  ;;  %v799_v11 = vsel %vm778_vm1, %v797_v42, %v798_v52  ;;  %v2387_v25 = vor.u32 %v2386_v15, %v2382_v26 }
  0x8d   : > { %v581_v42 = vshrl.u32 %v9132_v4, 16  ;;  %v585_v10 = vrot.slane %v583_v61, 1  ;;  %v2826_v26 = vsel %vm1683_vm0, %v9087_v33, 0  ;;  %v2633_v61 = vrot.slane %v7291_v63, 1  ;;  %v277_v63 = vld [vmem:[%s8531_s27 + $0x84] sm:$0xf] }
  0x8e   : > { %2679 = vrot.lane.b32.xlu1 %v2632_v59, %s8471_s30  ;;  %v9138_v59 = vcombine.low %v271_v24, %v9123_v20 }
  0x8f   : > { %2677 = vrot.lane.b32.xlu0 %v2629_v58, %s8471_s30  ;;  %v2399_v58 = vor.u32 %v2398_v13, %v2394_v31  ;;  %v2391_v13 = vrot.slane %v2389_v17, 1  ;;  %v2636_v17 = vrot.slane %v7292_v44, 1 }
  0x90   : > { %v1529_v22 = vpop.permute.xlu1 %1528  ;;  %v569_v56 = vshrl.u32 %v9138_v59, 16 }
  0x91   : > { %v1383_v60 = vpop.permute.xlu0 %1382  ;;  %v2404_v45 = vsel %vm471_vm2, %v2399_v58, %v2403_v8  ;;  %v8265_v8 = vld [vmem:[%s11633_s1 + $0x18] sm:$0xff]   ;;  %v2392_v33 = vsel %vm471_vm2, %v2387_v25, %v2391_v13  ;;  %v2638_v25 = vsel %vm778_vm1, %v2636_v17, %v2637_v19 }
  0x92   : > { %702 = vrot.lane.b32.xlu1 %v567_v32, %s8472_s6  ;;  %v1563_v24 = vsel %vm869_vm3, %v8553_v21, %v1383_v60  ;;  %v9162_v32 = vld [vmem:[%s8531_s27 + $0x68] ss:$0 sps:$4 sm:$0x11]   ;;  %v571_v21 = vshll.u32 %v9138_v59, 16  ;;  %v9170_v60 = vld [vmem:[%s8531_s27 + $0x7c] sm:$0xf] }
  0x93   : > { %700 = vrot.lane.b32.xlu0 %v555_v9, %s8472_s6  ;;  %v1599_v31 = vsel %vm906_vm4, %v1563_v24, %v1527_v53  ;;  %v7193_v9 = vld [vmem:[%s8531_s27 + $0x78] sm:$0xf]  ;;  %v588_v24 = vshll.u32 %v9146_v57, 16  ;;  %v576_v44 = vshll.u32 %v9162_v32, 16 }
  0x94   : > { %v9158_v46 = vpop.permute.xlu1 %1532  ;;  %7868 = vmatprep.mubr.msk.bf16.mxu0 %vm1646_vm5, %v1599_v31  ;;  %v573_v31 = vrot.slane %v571_v21, 1  ;;  %v586_v21 = vor.u32 %v585_v10, %v581_v42 }
  0x95   : > { %v1385_v53 = vpop.permute.xlu0 %1384 }
  0x96   : > { %847 = vrot.lane.b32.xlu1 %v802_v55, %s8471_s30  ;;  %v1565_v52 = vsel %vm869_vm3, %v8557_v23, %v1385_v53  ;;  %v2634_v23 = vrot.slane %v9109_v48, 1  ;;  %v9192_v55 = vcombine.low %v7193_v9, %v9170_v60  ;;  %v590_v48 = vrot.slane %v588_v24, 1  ;;  %v9201_v9 = vld [vmem:[%s8531_s27 + $0x8c] ss:$0 sps:$4 sm:$0x11]  }
  0x97   : > { %845 = vrot.lane.b32.xlu0 %v799_v11, %s8471_s30  ;;  %v1601_v15 = vsel %vm906_vm4, %v1565_v52, %v1529_v22  ;;  %v317_v22 = vld [vmem:[%s8531_s27 + $0x60] sm:$0xe]  ;;  %v7002_v53 = vcombine.low %v318_v43, %v9117_v36  ;;  %v2420_v52 = vshll.u32 %v9176_v34, 16  ;;  %v578_v24 = vrot.slane %v576_v44, 1 }
  0x98   : > { %v1389_v58 = vpop.permute.xlu1 %1388  ;;  %7869 = vmatmul.mubr.msk.bf16.vlgmr.msra.gmra.mxu0 %vm1646_vm5, %v1601_v15  ;;  %v9209_v15 = vld [vmem:[%s8531_s27 + $0x88] sm:$0xf]  ;;  %v7001_v43 = vcombine.low %v317_v22, %v9123_v20  ;;  %v2408_v19 = vshll.u32 %v9192_v55, 16  ;;  %v2635_v42 = vsel %vm778_vm1, %v2633_v61, %v2634_v23  ;;  %v574_v10 = vor.u32 %v573_v31, %v569_v56 }
  0x99   : > { %v1387_v11 = vpop.permute.xlu0 %1386  ;;  %7945 = vmatpush3.bf16.msra.mxu0 %v2826_v26  ;;  %v1569_v17 = vsel %vm869_vm3, %v8569_v37, %v1389_v58  ;;  %v275_v26 = vld [vmem:[%s8531_s27 + $0x78] sm:$0xf]  ;;  %v806_v20 = vrot.slane %v7002_v53, 1  ;;  %v807_v44 = vrot.slane %v9146_v57, 1  ;;  %v9232_v22 = vcombine.low %v277_v63, %v9209_v15  ;;  %v7240_v53 = vld [vmem:[%s8531_s27 + $0x84] sm:$0xe] }
  0x9a   : > { %2539 = vrot.lane.b32.xlu1 %v2404_v45, %s8472_s6  ;;  %v1567_v13 = vsel %vm869_vm3, %v8561_v28, %v1387_v11  ;;  %7946 = vmatprep.subr.bf16.mxu0 %v8265_v8  ;;  %v9218_v28 = vld [vmem:[%s8531_s27 + $0x80] ss:$0 sps:$4 sm:$0x11]   ;;  %v591_v37 = vsel %vm471_vm2, %v586_v21, %v590_v48  ;;  %v2418_v58 = vshrl.u32 %v9176_v34, 16  ;;  %v2422_v23 = vrot.slane %v2420_v52, 1 }
  0x9b   : > { %2537 = vrot.lane.b32.xlu0 %v2392_v33, %s8472_s6  ;;  %v1603_v36 = vsel %vm906_vm4, %v1567_v13, %v9112_v40  ;;  %v9227_v33 = vld [vmem:[%s8531_s27 + $0x7c] sm:$0xf]  ;;  %v2425_v61 = vshll.u32 %v9201_v9, 16  ;;  %v1605_v56 = vsel %vm906_vm4, %v1569_v17, %v9158_v46  ;;  %v803_v57 = vrot.slane %v7001_v43, 1  ;;  %v7239_v63 = vld [vmem:[%s8531_s27 + $0x78] sm:$0xe] }
  0x9c   : > { %v9214_v45 = vpop.permute.xlu1 %1392  ;;  %7872 = vmatprep.mubr.msk.bf16.mxu0 %vm1646_vm5, %v1603_v36  ;;  %v804_v11 = vrot.slane %v9162_v32, 1  ;;  %v579_v48 = vsel %vm471_vm2, %v574_v10, %v578_v24  ;;  %v2406_v52 = vshrl.u32 %v9192_v55, 16  ;;  %v2410_v13 = vrot.slane %v2408_v19, 1  ;;  %v9255_v36 = vld [vmem:[%s8531_s27 + $0x8c] ss:$0 sps:$4 sm:$0x11]  }
  0x9d   : > { %v1391_v40 = vpop.permute.xlu0 %1390  ;;  %7947 = vmatpush3.bf16.msra.mxu0 %v8265_v8  ;;  %v9243_v8 = vcombine.low %v275_v26, %v9227_v33  ;;  %v2413_v46 = vshll.u32 %v9218_v28, 16  ;;  %v808_v32 = vsel %vm778_vm1, %v806_v20, %v807_v44  ;;  %v607_v24 = vshll.u32 %v9232_v22, 16  ;;  %v9261_v10 = vld [vmem:[%s8531_s27 + $0x80] ss:$0 sps:$4 sm:$0x11]  }
  0x9e   : > { %2683 = vrot.lane.b32.xlu1 %v2638_v25, %s8471_s30  ;;  %v1571_v25 = vsel %vm869_vm3, %v8591_v7, %v1391_v40  ;;  %v2423_v17 = vor.u32 %v2422_v23, %v2418_v58  ;;  %v2427_v19 = vrot.slane %v2425_v61, 1  ;;  %v7199_v7 = vld [vmem:[%s8531_s27 + $0x9c] sm:$0xf]  ;;  %v805_v40 = vsel %vm778_vm1, %v803_v57, %v804_v11  ;;  %v7197_v57 = vld [vmem:[%s8531_s27 + $0x90] sm:$0xf] }
  0x9f   : > { %2681 = vrot.lane.b32.xlu0 %v2635_v42, %s8471_s30  ;;  %v7294_v42 = vcombine.low %v7240_v53, %v9154_v1  ;;  %v2643_v20 = vrot.slane %v9201_v9, 1  ;;  %v595_v44 = vshll.u32 %v9243_v8, 16  ;;  %v2411_v1 = vor.u32 %v2410_v13, %v2406_v52  ;;  %v9280_v11 = vld [vmem:[%s8531_s27 + $0x94] sm:$0xf] }
  0xa0   : > { %v1537_v31 = vpop.permute.xlu1 %1536  ;;  %7873 = vmatmul.mubr.msk.bf16.gmra.mxu0 %vm1646_vm5, %v1605_v56  ;;  %v2415_v58 = vrot.slane %v2413_v46, 1  ;;  %v7293_v23 = vcombine.low %v7239_v63, %v9170_v60  ;;  %v605_v61 = vshrl.u32 %v9232_v22, 16  ;;  %v609_v53 = vrot.slane %v607_v24, 1  ;;  %v320_v60 = vld [vmem:[%s8531_s27 + $0x84] sm:$0xe] }
  0xa1   : > { %v1535_v21 = vpop.permute.xlu0 %1534  ;;  %v1573_v9 = vsel %vm869_vm3, %v8587_v2, %v9214_v45  ;;  %v2428_v52 = vsel %vm471_vm2, %v2423_v17, %v2427_v19  ;;  %v2642_v13 = vrot.slane %v7294_v42, 1  ;;  %v597_v63 = vrot.slane %v595_v44, 1  ;;  %v319_v17 = vld [vmem:[%s8531_s27 + $0x78] sm:$0xe] }
  0xa2   : > { %706 = vrot.lane.b32.xlu1 %v591_v37, %s8472_s6  ;;  %v1607_v43 = vsel %vm906_vm4, %v1571_v25, %v1535_v21  ;;  %v9272_v37 = vld [vmem:[%s8531_s27 + $0xa0] sm:$0xf]  ;;  %v1609_v25 = vsel %vm906_vm4, %v1573_v9, %v1537_v31  ;;  %v600_v24 = vshll.u32 %v9261_v10, 16  ;;  %v2416_v2 = vsel %vm471_vm2, %v2411_v1, %v2415_v58  ;;  %v9306_v1 = vld [vmem:[%s8531_s27 + $0xa4] ss:$0 sps:$4 sm:$0x11]  }
  0xa3   : > { %7876 = vmatprep.mubr.msk.bf16.mxu0 %vm1646_vm5, %v1607_v43  ;;  %704 = vrot.lane.b32.xlu0 %v579_v48, %s8472_s6  ;;  %v612_v48 = vshll.u32 %v9255_v36, 16  ;;  %v9288_v46 = vcombine.low %v7199_v7, %v9272_v37  ;;  %v2639_v45 = vrot.slane %v7293_v23, 1  ;;  %v2640_v43 = vrot.slane %v9218_v28, 1  ;;  %v9313_v9 = vld [vmem:[%s8531_s27 + $0xa0] sm:$0xf] }
  0xa4   : > { %v9266_v26 = vpop.permute.xlu1 %1396  ;;  %v9299_v31 = vcombine.low %v7197_v57, %v9280_v11  ;;  %v610_v7 = vor.u32 %v609_v53, %v605_v61  ;;  %v7004_v44 = vcombine.low %v320_v60, %v9209_v15  ;;  %v2644_v28 = vsel %vm778_vm1, %v2642_v13, %v2643_v20  ;;  %v281_v57 = vld [vmem:[%s8531_s27 + $0x9c] sm:$0xf]  ;;  %v8272_v20 = vld [vmem:[%s11633_s1 + $0x8] ss:$0 sps:$4 sm:$0xff]  }
  0xa5   : > { %v1395_v56 = vpop.permute.xlu0 %1394  ;;  %v2444_v23 = vshll.u32 %v9288_v46, 16  ;;  %v602_v61 = vrot.slane %v600_v24, 1  ;;  %v2641_v53 = vsel %vm778_vm1, %v2639_v45, %v2640_v43  ;;  %v9336_v24 = vld [vmem:[%s8531_s27 + $0x94] sm:$0xf]  ;;  %8093 = vmatprep.subr.msk.bf16.mxu1 %vm1683_vm0, %v8272_v20  ;;  %v2442_v45 = vshrl.u32 %v9288_v46, 16 }
  0xa6   : > { %851 = vrot.lane.b32.xlu1 %v808_v32, %s8471_s30  ;;  %v593_v32 = vshrl.u32 %v9243_v8, 16  ;;  %v1575_v19 = vsel %vm869_vm3, %v8621_v49, %v1395_v56  ;;  %v7003_v56 = vcombine.low %v319_v17, %v9227_v33  ;;  %v9332_v33 = vcombine.low %v281_v57, %v9313_v9 }
  0xa7   : > { %849 = vrot.lane.b32.xlu0 %v805_v40, %s8471_s30  ;;  %v614_v40 = vrot.slane %v612_v48, 1  ;;  %v9325_v48 = vld [vmem:[%s8531_s27 + $0x98] ss:$0 sps:$4 sm:$0x11]   ;;  %v2446_v43 = vrot.slane %v2444_v23, 1  ;;  %v2449_v17 = vshll.u32 %v9306_v1, 16 }
  0xa8   : > { %v1541_v21 = vpop.permute.xlu1 %1540  ;;  %7877 = vmatmul.mubr.msk.bf16.gmra.mxu0 %vm1646_vm5, %v1609_v25  ;;  %v598_v15 = vor.u32 %v597_v63, %v593_v32  ;;  %v812_v25 = vrot.slane %v7004_v44, 1  ;;  %v813_v32 = vrot.slane %v9255_v36, 1  ;;  %v279_v63 = vld [vmem:[%s8531_s27 + $0x90] sm:$0xf]  ;;  %v7242_v44 = vld [vmem:[%s8531_s27 + $0x9c] sm:$0xe] }
  0xa9   : > { %v1539_v42 = vpop.permute.xlu0 %1538  ;;  %v615_v60 = vsel %vm471_vm2, %v610_v7, %v614_v40  ;;  %v809_v7 = vrot.slane %v7003_v56, 1  ;;  %v810_v40 = vrot.slane %v9261_v10, 1  ;;  %v8275_v23 = vld [vmem:[%s11633_s1] sm:$0xff]   ;;  %v631_v56 = vshll.u32 %v9332_v33, 16 }
  0xaa   : > { %2543 = vrot.lane.b32.xlu1 %v2428_v52, %s8472_s6  ;;  %v1611_v58 = vsel %vm906_vm4, %v1575_v19, %v1539_v42  ;;  %v2432_v52 = vshll.u32 %v9299_v31, 16  ;;  %v603_v42 = vsel %vm471_vm2, %v598_v15, %v602_v61  ;;  %v814_v15 = vsel %vm778_vm1, %v812_v25, %v813_v32  ;;  %v9364_v61 = vld [vmem:[%s8531_s27 + $0xa4] ss:$0 sps:$4 sm:$0x11]   ;;  %v7203_v32 = vld [vmem:[%s8531_s27 + $0xb4] sm:$0xf] }
  0xab   : > { %7880 = vmatprep.mubr.msk.bf16.mxu0 %vm1646_vm5, %v1611_v58  ;;  %2541 = vrot.lane.b32.xlu0 %v2416_v2, %s8472_s6  ;;  %v1577_v2 = vsel %vm869_vm3, %v8606_v30, %v9266_v26  ;;  %v7241_v58 = vld [vmem:[%s8531_s27 + $0x90] sm:$0xe]  ;;  %v2430_v30 = vshrl.u32 %v9299_v31, 16 }
  0xac   : > { %v9317_v49 = vpop.permute.xlu1 %1400  ;;  %v1613_v36 = vsel %vm906_vm4, %v1577_v2, %v1541_v21  ;;  %v2434_v26 = vrot.slane %v2432_v52, 1  ;;  %v9354_v21 = vcombine.low %v279_v63, %v9336_v24  ;;  %v2447_v63 = vor.u32 %v2446_v43, %v2442_v45 }
  0xad   : > { %v1399_v13 = vpop.permute.xlu0 %1398  ;;  %v2451_v2 = vrot.slane %v2449_v17, 1  ;;  %v7295_v25 = vcombine.low %v7241_v58, %v9280_v11  ;;  %v811_v45 = vsel %vm778_vm1, %v809_v7, %v810_v40  ;;  %v629_v11 = vshrl.u32 %v9332_v33, 16 }
  0xae   : > { %2687 = vrot.lane.b32.xlu1 %v2644_v28, %s8471_s30  ;;  %v2437_v28 = vshll.u32 %v9325_v48, 16  ;;  %v1579_v10 = vsel %vm869_vm3, %v8645_v14, %v1399_v13  ;;  %v7296_v14 = vcombine.low %v7242_v44, %v9272_v37  ;;  %v9371_v13 = vld [vmem:[%s8531_s27 + $0x98] ss:$0 sps:$4 sm:$0x11]   ;;  %v2435_v43 = vor.u32 %v2434_v26, %v2430_v30  ;;  %v9386_v44 = vld [vmem:[%s8531_s27 + $0xac] sm:$0xf] }
  0xaf   : > { %2685 = vrot.lane.b32.xlu0 %v2641_v53, %s8471_s30  ;;  %v1910_v53 = vsel %vm1683_vm0, %v8272_v20, 0  ;;  %v9380_v20 = vld [vmem:[%s8531_s27 + $0xb8] sm:$0xf]  ;;  %v619_v17 = vshll.u32 %v9354_v21, 16  ;;  %v633_v58 = vrot.slane %v631_v56, 1  ;;  %v1581_v7 = vsel %vm869_vm3, %v8632_v62, %v9317_v49 }
  0xb0   : > { %v1545_v19 = vpop.permute.xlu1 %1544  ;;  %7881 = vmatmul.mubr.msk.bf16.gmra.mxu0 %vm1646_vm5, %v1613_v36  ;;  %7905 = vmatpush3.bf16.msra.mxu1 %v1910_v53  ;;  %v7201_v36 = vld [vmem:[%s8531_s27 + $0xa8] sm:$0xf]  ;;  %v2439_v37 = vrot.slane %v2437_v28, 1  ;;  %v2452_v40 = vsel %vm471_vm2, %v2447_v63, %v2451_v2  ;;  %v2648_v30 = vrot.slane %v7296_v14, 1  ;;  %v322_v26 = vld [vmem:[%s8531_s27 + $0x9c] sm:$0xe]  ;;  %v9398_v28 = vcombine.low %v7203_v32, %v9380_v20 }
  0xb1   : > { %v1543_v57 = vpop.permute.xlu0 %1542  ;;  %7906 = vmatprep.subr.bf16.mxu1 %v8275_v23  ;;  %v2645_v56 = vrot.slane %v7295_v25, 1  ;;  %v2646_v53 = vrot.slane %v9325_v48, 1  ;;  %v9404_v62 = vcombine.low %v7201_v36, %v9386_v44  ;;  %v634_v48 = vor.u32 %v633_v58, %v629_v11  ;;  %v321_v32 = vld [vmem:[%s8531_s27 + $0x90] sm:$0xe]  ;;  %v285_v11 = vld [vmem:[%s8531_s27 + $0xb4] sm:$0xf] }
  0xb2   : > { %710 = vrot.lane.b32.xlu1 %v615_v60, %s8472_s6  ;;  %v1615_v52 = vsel %vm906_vm4, %v1579_v10, %v1543_v57  ;;  %v636_v57 = vshll.u32 %v9364_v61, 16  ;;  %v2440_v49 = vsel %vm471_vm2, %v2435_v43, %v2439_v37  ;;  %v7006_v25 = vcombine.low %v322_v26, %v9313_v9  ;;  %v9416_v36 = vld [vmem:[%s8531_s27 + $0xbc] ss:$0 sps:$4 sm:$0x11]   ;;  %v9432_v58 = vld [vmem:[%s8531_s27 + $0xb8] sm:$0xf] }
  0xb3   : > { %7884 = vmatprep.mubr.msk.bf16.mxu0 %vm1646_vm5, %v1615_v52  ;;  %708 = vrot.lane.b32.xlu0 %v603_v42, %s8472_s6  ;;  %v2649_v42 = vrot.slane %v9306_v1, 1  ;;  %v621_v52 = vrot.slane %v619_v17, 1  ;;  %v2468_v37 = vshll.u32 %v9398_v28, 16  ;;  %v9422_v17 = vld [vmem:[%s8531_s27 + $0xb0] ss:$0 sps:$4 sm:$0x11]   ;;  %v2647_v9 = vsel %vm778_vm1, %v2645_v56, %v2646_v53 }
  0xb4   : > { %v9375_v60 = vpop.permute.xlu1 %1404  ;;  %7907 = vmatpush3.bf16.msra.mxu1 %v8275_v23  ;;  %v617_v23 = vshrl.u32 %v9354_v21, 16  ;;  %v638_v14 = vrot.slane %v636_v57, 1  ;;  %v2473_v56 = vshll.u32 %v9416_v36, 16  ;;  %v283_v53 = vld [vmem:[%s8531_s27 + $0xa8] sm:$0xf] }
  0xb5   : > { %v1403_v10 = vpop.permute.xlu0 %1402  ;;  %v2650_v43 = vsel %vm778_vm1, %v2648_v30, %v2649_v42 }
  0xb6   : > { %855 = vrot.lane.b32.xlu1 %v814_v15, %s8471_s30  ;;  %v1617_v15 = vsel %vm906_vm4, %v1581_v7, %v1545_v19  ;;  %v624_v19 = vshll.u32 %v9371_v13, 16  ;;  %v1583_v63 = vsel %vm869_vm3, %v8674_v50, %v1403_v10  ;;  %v2456_v10 = vshll.u32 %v9404_v62, 16 }
  0xb7   : > { %853 = vrot.lane.b32.xlu0 %v811_v45, %s8471_s30  ;;  %v622_v42 = vor.u32 %v621_v52, %v617_v23  ;;  %v819_v7 = vrot.slane %v9364_v61, 1  ;;  %v639_v26 = vsel %vm471_vm2, %v634_v48, %v638_v14  ;;  %v1585_v23 = vsel %vm869_vm3, %v8659_v35, %v9375_v60  ;;  %v9457_v35 = vld [vmem:[%s8531_s27 + $0xbc] ss:$0 sps:$4 sm:$0x11]  }
  0xb8   : > { %v1549_v1 = vpop.permute.xlu1 %1548  ;;  %7885 = vmatmul.mubr.msk.bf16.gmra.mxu0 %vm1646_vm5, %v1617_v15  ;;  %v626_v57 = vrot.slane %v624_v19, 1  ;;  %v818_v15 = vrot.slane %v7006_v25, 1  ;;  %v2466_v61 = vshrl.u32 %v9398_v28, 16  ;;  %v2470_v52 = vrot.slane %v2468_v37, 1  ;;  %v7243_v19 = vld [vmem:[%s8531_s27 + $0xa8] sm:$0xe] }
  0xb9   : > { %v1547_v2 = vpop.permute.xlu0 %1546  ;;  %v2454_v14 = vshrl.u32 %v9404_v62, 16  ;;  %v2458_v25 = vrot.slane %v2456_v10, 1 }
  0xba   : > { %2547 = vrot.lane.b32.xlu1 %v2452_v40, %s8472_s6  ;;  %v1619_v45 = vsel %vm906_vm4, %v1583_v63, %v1547_v2  ;;  %v7005_v40 = vcombine.low %v321_v32, %v9336_v24  ;;  %v7244_v24 = vld [vmem:[%s8531_s27 + $0xb4] sm:$0xe]  ;;  %v9450_v63 = vcombine.low %v285_v11, %v9432_v58  ;;  %v1621_v2 = vsel %vm906_vm4, %v1585_v23, %v1549_v1  ;;  %v7207_v23 = vld [vmem:[%s8531_s27 + $0xcc] sm:$0xf] }
  0xbb   : > { %7888 = vmatprep.mubr.msk.bf16.mxu0 %vm1646_vm5, %v1619_v45  ;;  %2545 = vrot.lane.b32.xlu0 %v2440_v49, %s8472_s6  ;;  %v9441_v49 = vld [vmem:[%s8531_s27 + $0xac] sm:$0xf]  ;;  %v2461_v32 = vshll.u32 %v9422_v17, 16  ;;  %v627_v60 = vsel %vm471_vm2, %v622_v42, %v626_v57  ;;  %v820_v10 = vsel %vm778_vm1, %v818_v15, %v819_v7  ;;  %v7298_v11 = vcombine.low %v7244_v24, %v9380_v20 }
  0xbc   : > { %v9426_v50 = vpop.permute.xlu1 %1408  ;;  %v815_v45 = vrot.slane %v7005_v40, 1  ;;  %v9463_v1 = vcombine.low %v283_v53, %v9441_v49  ;;  %v2471_v57 = vor.u32 %v2470_v52, %v2466_v61  ;;  %v2475_v40 = vrot.slane %v2473_v56, 1  ;;  %v9474_v53 = vld [vmem:[%s8531_s27 + $0xd0] sm:$0xf] }
  0xbd   : > { %v1407_v30 = vpop.permute.xlu0 %1406  ;;  %v2459_v7 = vor.u32 %v2458_v25, %v2454_v14  ;;  %v7297_v20 = vcombine.low %v7243_v19, %v9386_v44  ;;  %v2655_v15 = vrot.slane %v9416_v36, 1  ;;  %v9484_v56 = vld [vmem:[%s8531_s27 + $0xb0] ss:$0 sps:$4 sm:$0x11]   ;;  %v2654_v24 = vrot.slane %v7298_v11, 1 }
  0xbe   : > { %2691 = vrot.lane.b32.xlu1 %v2650_v43, %s8471_s30  ;;  %v816_v43 = vrot.slane %v9371_v13, 1  ;;  %v1587_v37 = vsel %vm869_vm3, %v8703_v16, %v1407_v30  ;;  %v655_v13 = vshll.u32 %v9450_v63, 16  ;;  %v2463_v30 = vrot.slane %v2461_v32, 1  ;;  %v7205_v44 = vld [vmem:[%s8531_s27 + $0xc0] sm:$0xf] }
  0xbf   : > { %2689 = vrot.lane.b32.xlu0 %v2647_v9, %s8471_s30  ;;  %v643_v61 = vshll.u32 %v9463_v1, 16  ;;  %v9490_v14 = vcombine.low %v7207_v23, %v9474_v53  ;;  %v9494_v19 = vld [vmem:[%s8531_s27 + $0xc4] sm:$0xf]  ;;  %v1589_v36 = vsel %vm869_vm3, %v8688_v3, %v9426_v50  ;;  %v2476_v25 = vsel %vm471_vm2, %v2471_v57, %v2475_v40  ;;  %v323_v23 = vld [vmem:[%s8531_s27 + $0xa8] sm:$0xe] }
  0xc0   : > { %v1553_v48 = vpop.permute.xlu1 %1552  ;;  %7889 = vmatmul.mubr.msk.bf16.gmra.mxu0 %vm1646_vm5, %v1621_v2  ;;  %v660_v2 = vshll.u32 %v9457_v35, 16  ;;  %v653_v32 = vshrl.u32 %v9450_v63, 16  ;;  %v2652_v11 = vrot.slane %v9422_v17, 1  ;;  %v641_v3 = vshrl.u32 %v9463_v1, 16 }
  0xc1   : > { %v1551_v9 = vpop.permute.xlu0 %1550  ;;  %v645_v50 = vrot.slane %v643_v61, 1  ;;  %v2656_v17 = vsel %vm778_vm1, %v2654_v24, %v2655_v15  ;;  %v289_v24 = vld [vmem:[%s8531_s27 + $0xcc] sm:$0xf] }
  0xc2   : > { %714 = vrot.lane.b32.xlu1 %v639_v26, %s8472_s6  ;;  %v1623_v42 = vsel %vm906_vm4, %v1587_v37, %v1551_v9  ;;  %v817_v26 = vsel %vm778_vm1, %v815_v45, %v816_v43  ;;  %v324_v45 = vld [vmem:[%s8531_s27 + $0xb4] sm:$0xe]  ;;  %v1625_v43 = vsel %vm906_vm4, %v1589_v36, %v1553_v48  ;;  %v2464_v9 = vsel %vm471_vm2, %v2459_v7, %v2463_v30  ;;  %v9519_v7 = vld [vmem:[%s8531_s27 + $0xd4] ss:$0 sps:$4 sm:$0x11]  }
  0xc3   : > { %7892 = vmatprep.mubr.msk.bf16.mxu0 %vm1646_vm5, %v1623_v42  ;;  %712 = vrot.lane.b32.xlu0 %v627_v60, %s8472_s6  ;;  %v657_v60 = vrot.slane %v655_v13, 1  ;;  %v648_v42 = vshll.u32 %v9484_v56, 16  ;;  %v9511_v48 = vcombine.low %v7205_v44, %v9494_v19  ;;  %v7008_v13 = vcombine.low %v324_v45, %v9432_v58  ;;  %v9534_v44 = vld [vmem:[%s8531_s27 + $0xd0] sm:$0xf] }
  0xc4   : > { %v9478_v16 = vpop.permute.xlu1 %1412  ;;  %v2492_v30 = vshll.u32 %v9490_v14, 16  ;;  %v662_v61 = vrot.slane %v660_v2, 1  ;;  %v825_v58 = vrot.slane %v9457_v35, 1  ;;  %v2497_v35 = vshll.u32 %v9519_v7, 16 }
  0xc5   : > { %v1411_v52 = vpop.permute.xlu0 %1410  ;;  %v650_v2 = vrot.slane %v648_v42, 1 }
  0xc6   : > { %859 = vrot.lane.b32.xlu1 %v820_v10, %s8471_s30  ;;  %v2651_v10 = vrot.slane %v7297_v20, 1  ;;  %v1591_v57 = vsel %vm869_vm3, %v8739_v54, %v1411_v52  ;;  %v7007_v54 = vcombine.low %v323_v23, %v9441_v49  ;;  %v9525_v52 = vld [vmem:[%s8531_s27 + $0xc8] ss:$0 sps:$4 sm:$0x11]   ;;  %v2480_v49 = vshll.u32 %v9511_v48, 16 }
  0xc7   : > { %857 = vrot.lane.b32.xlu0 %v817_v26, %s8471_s30  ;;  %v658_v26 = vor.u32 %v657_v60, %v653_v32  ;;  %v287_v32 = vld [vmem:[%s8531_s27 + $0xc0] sm:$0xf]  ;;  %v9540_v60 = vld [vmem:[%s8531_s27 + $0xc4] sm:$0xf]  ;;  %v2494_v23 = vrot.slane %v2492_v30, 1 }
  0xc8   : > { %v1557_v37 = vpop.permute.xlu1 %1556  ;;  %7893 = vmatmul.mubr.msk.bf16.gmra.mxu0 %vm1646_vm5, %v1625_v43  ;;  %v2653_v36 = vsel %vm778_vm1, %v2651_v10, %v2652_v11  ;;  %v824_v43 = vrot.slane %v7008_v13, 1  ;;  %v1593_v10 = vsel %vm869_vm3, %v8722_v38, %v9478_v16  ;;  %v2485_v13 = vshll.u32 %v9525_v52, 16 }
  0xc9   : > { %v1555_v40 = vpop.permute.xlu0 %1554  ;;  %v663_v11 = vsel %vm471_vm2, %v658_v26, %v662_v61  ;;  %v1629_v42 = vsel %vm906_vm4, %v1593_v10, %v1557_v37  ;;  %v9558_v30 = vcombine.low %v287_v32, %v9540_v60  ;;  %v2478_v16 = vshrl.u32 %v9511_v48, 16 }
  0xca   : > { %2551 = vrot.lane.b32.xlu1 %v2476_v25, %s8472_s6  ;;  %v1627_v20 = vsel %vm906_vm4, %v1591_v57, %v1555_v40  ;;  %v646_v25 = vor.u32 %v645_v50, %v641_v3  ;;  %v7246_v57 = vld [vmem:[%s8531_s27 + $0xcc] sm:$0xe]  ;;  %v821_v3 = vrot.slane %v7007_v54, 1  ;;  %v9551_v50 = vcombine.low %v289_v24, %v9534_v44  ;;  %v7245_v24 = vld [vmem:[%s8531_s27 + $0xc0] sm:$0xe] }
  0xcb   : > { %7896 = vmatprep.mubr.msk.bf16.mxu0 %vm1646_vm5, %v1627_v20  ;;  %2549 = vrot.lane.b32.xlu0 %v2464_v9, %s8472_s6  ;;  %v2490_v9 = vshrl.u32 %v9490_v14, 16  ;;  %v2482_v37 = vrot.slane %v2480_v49, 1  ;;  %v7300_v20 = vcombine.low %v7246_v57, %v9474_v53  ;;  %v2499_v54 = vrot.slane %v2497_v35, 1  ;;  %v9575_v53 = vld [vmem:[%s8531_s27 + $0xc8] ss:$0 sps:$4 sm:$0x11]  }
  0xcc   : > { %v9529_v15 = vpop.permute.xlu1 %1416  ;;  %v651_v38 = vsel %vm471_vm2, %v646_v25, %v650_v2  ;;  %v826_v2 = vsel %vm778_vm1, %v824_v43, %v825_v58  ;;  %v679_v49 = vshll.u32 %v9551_v50, 16  ;;  %v9583_v35 = vld [vmem:[%s8531_s27 + $0xe8] sm:$0xf]  ;;  %v2661_v57 = vrot.slane %v9519_v7, 1 }
  0xcd   : > { %v1415_v45 = vpop.permute.xlu0 %1414  ;;  %v2483_v58 = vor.u32 %v2482_v37, %v2478_v16  ;;  %v2660_v43 = vrot.slane %v7300_v20, 1  ;;  %v7299_v10 = vcombine.low %v7245_v24, %v9494_v19  ;;  %v1597_v16 = vsel %vm869_vm3, %v8760_v12, %v9529_v15  ;;  %v326_v37 = vld [vmem:[%s8531_s27 + $0xcc] sm:$0xe] }
  0xce   : > { %2695 = vrot.lane.b32.xlu1 %v2656_v17, %s8471_s30  ;;  %v822_v17 = vrot.slane %v9484_v56, 1  ;;  %v1595_v26 = vsel %vm869_vm3, %v8774_v27, %v1415_v45  ;;  %v2495_v56 = vor.u32 %v2494_v23, %v2490_v9  ;;  %v2487_v45 = vrot.slane %v2485_v13, 1  ;;  %v7211_v23 = vld [vmem:[%s8531_s27 + $0xe4] sm:$0xf]  ;;  %v7209_v13 = vld [vmem:[%s8531_s27 + $0xd8] sm:$0xf] }
  0xcf   : > { %2693 = vrot.lane.b32.xlu0 %v2653_v36, %s8471_s30  ;;  %v9569_v36 = vld [vmem:[%s8531_s27 + $0xd4] ss:$0 sps:$4 sm:$0x11]   ;;  %v667_v9 = vshll.u32 %v9558_v30, 16  ;;  %v677_v7 = vshrl.u32 %v9551_v50, 16  ;;  %v681_v19 = vrot.slane %v679_v49, 1  ;;  %v9601_v20 = vcombine.low %v7211_v23, %v9583_v35 }
  0xd0   : > { %v1561_v40 = vpop.permute.xlu1 %1560  ;;  %7897 = vmatmul.mubr.msk.bf16.gmra.mxu0 %vm1646_vm5, %v1629_v42  ;;  %v823_v32 = vsel %vm778_vm1, %v821_v3, %v822_v17  ;;  %v2500_v42 = vsel %vm471_vm2, %v2495_v56, %v2499_v54  ;;  %v2658_v3 = vrot.slane %v9525_v52, 1  ;;  %v684_v17 = vshll.u32 %v9569_v36, 16 }
  0xd1   : > { %v1559_v61 = vpop.permute.xlu0 %1558  ;;  %v669_v56 = vrot.slane %v667_v9, 1  ;;  %v672_v54 = vshll.u32 %v9575_v53, 16  ;;  %v2488_v15 = vsel %vm471_vm2, %v2483_v58, %v2487_v45  ;;  %v2657_v24 = vrot.slane %v7299_v10, 1  ;;  %v9623_v58 = vld [vmem:[%s8531_s27 + $0xec] ss:$0 sps:$4 sm:$0x11]  }
  0xd2   : > { %718 = vrot.lane.b32.xlu1 %v663_v11, %s8472_s6  ;;  %v1631_v25 = vsel %vm906_vm4, %v1595_v26, %v1559_v61  ;;  %v1633_v26 = vsel %vm906_vm4, %v1597_v16, %v1561_v40  ;;  %v665_v61 = vshrl.u32 %v9558_v30, 16  ;;  %v682_v9 = vor.u32 %v681_v19, %v677_v7 }
  0xd3   : > { %7900 = vmatprep.mubr.msk.bf16.mxu0 %vm1646_vm5, %v1631_v25  ;;  %716 = vrot.lane.b32.xlu0 %v651_v38, %s8472_s6  ;;  %v9593_v38 = vld [vmem:[%s8531_s27 + $0xdc] sm:$0xf]  ;;  %v325_v25 = vld [vmem:[%s8531_s27 + $0xc0] sm:$0xe]  ;;  %v686_v23 = vrot.slane %v684_v17, 1  ;;  %v2516_v10 = vshll.u32 %v9601_v20, 16 }
  0xd4   : > { %v691_v27 = vpop.permute.xlu1 %690  ;;  %v9613_v40 = vcombine.low %v7209_v13, %v9593_v38  ;;  %v7009_v13 = vcombine.low %v325_v25, %v9540_v60  ;;  %v831_v7 = vrot.slane %v9569_v36, 1  ;;  %v2521_v60 = vshll.u32 %v9623_v58, 16 }
  0xd5   : > { %v689_v11 = vpop.permute.xlu0 %688  ;;  %v873_v12 = vsel %vm869_vm3, %v8795_v47, %v691_v27  ;;  %v2662_v47 = vsel %vm778_vm1, %v2660_v43, %v2661_v57  ;;  %v7010_v27 = vcombine.low %v326_v37, %v9534_v44  ;;  %v2659_v44 = vsel %vm778_vm1, %v2657_v24, %v2658_v3  ;;  %v8291_v43 = vld [vmem:[%s8531_s27 + $0xe0] ss:$0 sps:$4 sm:$0x11]  }
  0xd6   : > { %863 = vrot.lane.b32.xlu1 %v826_v2, %s8471_s30  ;;  %v871_v2 = vsel %vm869_vm3, %v8812_v6, %v689_v11  ;;  %v670_v11 = vor.u32 %v669_v56, %v665_v61  ;;  %v2504_v57 = vshll.u32 %v9613_v40, 16  ;;  %v687_v19 = vsel %vm471_vm2, %v682_v9, %v686_v23 }
  0xd7   : > { %861 = vrot.lane.b32.xlu0 %v823_v32, %s8471_s30  ;;  %v830_v16 = vrot.slane %v7010_v27, 1  ;;  %v2514_v37 = vshrl.u32 %v9601_v20, 16  ;;  %v827_v61 = vrot.slane %v7009_v13, 1  ;;  %v828_v56 = vrot.slane %v9575_v53, 1 }
  0xd8   : > { %v836_v52 = vpop.permute.xlu1 %835  ;;  %7901 = vmatmul.mubr.msk.bf16.gmra.mxu0 %vm1646_vm5, %v1633_v26  ;;  %v2518_v26 = vrot.slane %v2516_v10, 1  ;;  %v2509_v24 = vshll.u32 %v8291_v43, 16 }
  0xd9   : > { %v910_v49 = vsel %vm906_vm4, %v873_v12, %v836_v52  ;;  %v834_v32 = vpop.permute.xlu0 %833  ;;  %v2502_v12 = vshrl.u32 %v9613_v40, 16 }
  0xda   : > { %2555 = vrot.lane.b32.xlu1 %v2500_v42, %s8472_s6  ;;  %v908_v45 = vsel %vm906_vm4, %v871_v2, %v834_v32  ;;  %v674_v42 = vrot.slane %v672_v54, 1  ;;  %v7248_v54 = vld [vmem:[%s8531_s27 + $0xe4] sm:$0xe]  ;;  %v832_v32 = vsel %vm778_vm1, %v830_v16, %v831_v7  ;;  %v2519_v27 = vor.u32 %v2518_v26, %v2514_v37 }
  0xdb   : > { %2553 = vrot.lane.b32.xlu0 %v2488_v15, %s8472_s6  ;;  %7908 = vmatprep.mubr.msk.bf16.mxu1 %vm1646_vm5, %v908_v45  ;;  %v2506_v15 = vrot.slane %v2504_v57, 1  ;;  %v2523_v45 = vrot.slane %v2521_v60, 1  ;;  %v2511_v10 = vrot.slane %v2509_v24, 1  ;;  %v2664_v7 = vrot.slane %v8291_v43, 1 }
  0xdc   : > { %v2528_v6 = vpop.permute.xlu1 %2527  ;;  %7909 = vmatmul.mubr.msk.bf16.vlgmr.msra.gmra.mxu1 %vm1646_vm5, %v910_v49  ;;  %v675_v52 = vsel %vm471_vm2, %v670_v11, %v674_v42 }
  0xdd   : > { %v2526_v17 = vpop.permute.xlu0 %2525  ;;  %v2708_v36 = vsel %vm869_vm3, %v8844_v41, %v2528_v6  ;;  %v7302_v41 = vcombine.low %v7248_v54, %v9583_v35  ;;  %v2507_v23 = vor.u32 %v2506_v15, %v2502_v12  ;;  %v2524_v42 = vsel %vm471_vm2, %v2519_v27, %v2523_v45  ;;  %v11667_v27 = vld [vmem:[#allocation4_spill] sm:$0xff] }
  0xde   : > { %2699 = vrot.lane.b32.xlu1 %v2662_v47, %s8471_s30  ;;  %v2706_v25 = vsel %vm869_vm3, %v8850_v51, %v2526_v17  ;;  %v7247_v47 = vld [vmem:[%s8531_s27 + $0xd8] sm:$0xe]  ;;  %v829_v51 = vsel %vm778_vm1, %v827_v61, %v828_v56  ;;  %v2667_v35 = vrot.slane %v9623_v58, 1 }
  0xdf   : > { %2697 = vrot.lane.b32.xlu0 %v2659_v44, %s8471_s30  ;;  %v7301_v6 = vcombine.low %v7247_v47, %v9593_v38  ;;  %v2666_v13 = vrot.slane %v7302_v41, 1  ;;  %v2512_v17 = vsel %vm471_vm2, %v2507_v23, %v2511_v10  ;;  %v11668_v41 = vld [vmem:[#allocation5_spill] sm:$0xff] }
  0xe0   : > { %v2672_v3 = vpop.permute.xlu1 %2671 }
  0xe1   : > { %v2744_v2 = vsel %vm906_vm4, %v2708_v36, %v2672_v3  ;;  %v2670_v49 = vpop.permute.xlu0 %2669  ;;  %v2663_v16 = vrot.slane %v7301_v6, 1  ;;  %v2668_v26 = vsel %vm778_vm1, %v2666_v13, %v2667_v35  ;;  %v11670_v35 = vld [vmem:[#allocation7_spill] sm:$0xff] }
  0xe2   : > { %722 = vrot.lane.b32.xlu1 %v687_v19, %s8472_s6  ;;  %v2742_v53 = vsel %vm906_vm4, %v2706_v25, %v2670_v49  ;;  %v11666_v25 = vld [vmem:[#allocation3_spill] sm:$0xff] }
  0xe3   : > { %720 = vrot.lane.b32.xlu0 %v675_v52, %s8472_s6  ;;  %7948 = vmatprep.mubr.msk.bf16.mxu0 %vm1646_vm5, %v2742_v53  ;;  %v2665_v43 = vsel %vm778_vm1, %v2663_v16, %v2664_v7 }
  0xe4   : > { %v695_v9 = vpop.permute.xlu1 %694  ;;  %7949 = vmatmul.mubr.msk.bf16.vlgmr.msra.gmra.mxu0 %vm1646_vm5, %v2744_v2 }
  0xe5   : > { %v693_v11 = vpop.permute.xlu0 %692  ;;  %v877_v57 = vsel %vm869_vm3, %v8876_v18, %v695_v9 }
  0xe6   : > { %867 = vrot.lane.b32.xlu1 %v832_v32, %s8471_s30  ;;  %v875_v38 = vsel %vm869_vm3, %v8892_v39, %v693_v11 }
  0xe7   : > { %865 = vrot.lane.b32.xlu0 %v829_v51, %s8471_s30 }
  0xe8   : > { %v840_v44 = vpop.permute.xlu1 %839 }
  0xe9   : > { %v914_v19 = vsel %vm906_vm4, %v877_v57, %v840_v44  ;;  %v838_v37 = vpop.permute.xlu0 %837 }
  0xea   : > { %2559 = vrot.lane.b32.xlu1 %v2524_v42, %s8472_s6  ;;  %v912_v58 = vsel %vm906_vm4, %v875_v38, %v838_v37  ;;  %v11669_v42 = vld [vmem:[#allocation6_spill] sm:$0xff]  ;;  %v11671_v37 = vld [vmem:[#allocation8_spill] sm:$0xff] }
  0xeb   : > { %2557 = vrot.lane.b32.xlu0 %v2512_v17, %s8472_s6  ;;  %7912 = vmatprep.mubr.msk.bf16.mxu1 %vm1646_vm5, %v912_v58 }
  0xec   : > { %v2532_v18 = vpop.permute.xlu1 %2531  ;;  %7913 = vmatmul.mubr.msk.bf16.gmra.mxu1 %vm1646_vm5, %v914_v19 }
  0xed   : > { %v2530_v60 = vpop.permute.xlu0 %2529  ;;  %v2712_v3 = vsel %vm869_vm3, %v8923_v5, %v2532_v18 }
  0xee   : > { %2703 = vrot.lane.b32.xlu1 %v2668_v26, %s8471_s30  ;;  %v2710_v52 = vsel %vm869_vm3, %v8930_v29, %v2530_v60  ;;  %v11672_v26 = vld [vmem:[#allocation9_spill] sm:$0xff] }
  0xef   : > { %2701 = vrot.lane.b32.xlu0 %v2665_v43, %s8471_s30 }
  0xf0   : > { %v2676_v39 = vpop.permute.xlu1 %2675 }
  0xf1   : > { %v2748_v61 = vsel %vm906_vm4, %v2712_v3, %v2676_v39  ;;  %v2674_v56 = vpop.permute.xlu0 %2673 }
  0xf2   : > { %v2746_v54 = vsel %vm906_vm4, %v2710_v52, %v2674_v56 }
  0xf3   : > { %7952 = vmatprep.mubr.msk.bf16.mxu0 %vm1646_vm5, %v2746_v54 }
  0xf4   : > { %v699_v36 = vpop.permute.xlu1 %698  ;;  %7953 = vmatmul.mubr.msk.bf16.gmra.mxu0 %vm1646_vm5, %v2748_v61 }
  0xf5   : > { %v697_v12 = vpop.permute.xlu0 %696  ;;  %v881_v24 = vsel %vm869_vm3, %v8956_v0, %v699_v36 }
  0xf6   : > { %v879_v5 = vsel %vm869_vm3, %v11666_v25, %v697_v12 }
  0xf8   : > { %v844_v15 = vpop.permute.xlu1 %843 }
  0xf9   : > { %v918_v29 = vsel %vm906_vm4, %v881_v24, %v844_v15  ;;  %v842_v2 = vpop.permute.xlu0 %841 }
  0xfa   : > { %v916_v49 = vsel %vm906_vm4, %v879_v5, %v842_v2 }
  0xfb   : > { %7916 = vmatprep.mubr.msk.bf16.mxu1 %vm1646_vm5, %v916_v49 }
  0xfc   : > { %v2536_v32 = vpop.permute.xlu1 %2535  ;;  %7917 = vmatmul.mubr.msk.bf16.gmra.mxu1 %vm1646_vm5, %v918_v29 }
  0xfd   : > { %v2534_v47 = vpop.permute.xlu0 %2533  ;;  %v2716_v45 = vsel %vm869_vm3, %v11667_v27, %v2536_v32 }
  0xfe   : > { %v2714_v0 = vsel %vm869_vm3, %v11668_v41, %v2534_v47 }
 0x100   : > { %v2680_v53 = vpop.permute.xlu1 %2679 }
 0x101   : > { %v2752_v9 = vsel %vm906_vm4, %v2716_v45, %v2680_v53  ;;  %v2678_v51 = vpop.permute.xlu0 %2677 }
 0x102   : > { %v2750_v23 = vsel %vm906_vm4, %v2714_v0, %v2678_v51 }
 0x103   : > { %7956 = vmatprep.mubr.msk.bf16.mxu0 %vm1646_vm5, %v2750_v23 }
 0x104   : > { %v703_v10 = vpop.permute.xlu1 %702  ;;  %7957 = vmatmul.mubr.msk.bf16.gmra.mxu0 %vm1646_vm5, %v2752_v9 }
 0x105   : > { %v701_v6 = vpop.permute.xlu0 %700  ;;  %v885_v13 = vsel %vm869_vm3, %v11669_v42, %v703_v10 }
 0x106   : > { %v883_v44 = vsel %vm869_vm3, %v11670_v35, %v701_v6 }
 0x108   : > { %v848_v11 = vpop.permute.xlu1 %847 }
 0x109   : > { %v922_v57 = vsel %vm906_vm4, %v885_v13, %v848_v11  ;;  %v846_v17 = vpop.permute.xlu0 %845 }
 0x10a   : > { %v920_v16 = vsel %vm906_vm4, %v883_v44, %v846_v17 }
 0x10b   : > { %7920 = vmatprep.mubr.msk.bf16.mxu1 %vm1646_vm5, %v920_v16 }
 0x10c   : > { %v2540_v7 = vpop.permute.xlu1 %2539  ;;  %7921 = vmatmul.mubr.msk.bf16.gmra.mxu1 %vm1646_vm5, %v922_v57 }
 0x10d   : > { %v2538_v38 = vpop.permute.xlu0 %2537  ;;  %v2720_v58 = vsel %vm869_vm3, %v11671_v37, %v2540_v7 }
 0x10e   : > { %v2718_v18 = vsel %vm869_vm3, %v11672_v26, %v2538_v38 }
 0x110   : > { %v2684_v19 = vpop.permute.xlu1 %2683 }
 0x111   : > { %v2756_v43 = vsel %vm906_vm4, %v2720_v58, %v2684_v19  ;;  %v2682_v60 = vpop.permute.xlu0 %2681 }
 0x112   : > { %v2754_v39 = vsel %vm906_vm4, %v2718_v18, %v2682_v60 }
 0x113   : > { %7960 = vmatprep.mubr.msk.bf16.mxu0 %vm1646_vm5, %v2754_v39 }
 0x114   : > { %v707_v3 = vpop.permute.xlu1 %706  ;;  %7961 = vmatmul.mubr.msk.bf16.gmra.mxu0 %vm1646_vm5, %v2756_v43 }
 0x115   : > { %v705_v52 = vpop.permute.xlu0 %704  ;;  %v889_v56 = vsel %vm869_vm3, %v9132_v4, %v707_v3 }
 0x116   : > { %v887_v54 = vsel %vm869_vm3, %v9138_v59, %v705_v52 }
 0x118   : > { %v852_v61 = vpop.permute.xlu1 %851 }
 0x119   : > { %v926_v36 = vsel %vm906_vm4, %v889_v56, %v852_v61  ;;  %v850_v12 = vpop.permute.xlu0 %849 }
 0x11a   : > { %v924_v15 = vsel %vm906_vm4, %v887_v54, %v850_v12 }
 0x11b   : > { %7924 = vmatprep.mubr.msk.bf16.mxu1 %vm1646_vm5, %v924_v15 }
 0x11c   : > { %v2544_v24 = vpop.permute.xlu1 %2543  ;;  %7925 = vmatmul.mubr.msk.bf16.gmra.mxu1 %vm1646_vm5, %v926_v36 }
 0x11d   : > { %v2542_v25 = vpop.permute.xlu0 %2541  ;;  %v2724_v29 = vsel %vm869_vm3, %v9176_v34, %v2544_v24 }
 0x11e   : > { %v2722_v4 = vsel %vm869_vm3, %v9192_v55, %v2542_v25 }
 0x120   : > { %v2688_v5 = vpop.permute.xlu1 %2687 }
 0x121   : > { %v2760_v59 = vsel %vm906_vm4, %v2724_v29, %v2688_v5  ;;  %v2686_v2 = vpop.permute.xlu0 %2685 }
 0x122   : > { %v2758_v49 = vsel %vm906_vm4, %v2722_v4, %v2686_v2 }
 0x123   : > { %7964 = vmatprep.mubr.msk.bf16.mxu0 %vm1646_vm5, %v2758_v49 }
 0x124   : > { %v711_v32 = vpop.permute.xlu1 %710  ;;  %7965 = vmatmul.mubr.msk.bf16.gmra.mxu0 %vm1646_vm5, %v2760_v59 }
 0x125   : > { %v709_v47 = vpop.permute.xlu0 %708  ;;  %v893_v27 = vsel %vm869_vm3, %v9232_v22, %v711_v32 }
 0x126   : > { %v891_v34 = vsel %vm869_vm3, %v9243_v8, %v709_v47 }
 0x128   : > { %v856_v53 = vpop.permute.xlu1 %855 }
 0x129   : > { %v930_v55 = vsel %vm906_vm4, %v893_v27, %v856_v53  ;;  %v854_v45 = vpop.permute.xlu0 %853 }
 0x12a   : > { %v928_v41 = vsel %vm906_vm4, %v891_v34, %v854_v45 }
 0x12b   : > { %7928 = vmatprep.mubr.msk.bf16.mxu1 %vm1646_vm5, %v928_v41 }
 0x12c   : > { %v2548_v0 = vpop.permute.xlu1 %2547  ;;  %7929 = vmatmul.mubr.msk.bf16.gmra.mxu1 %vm1646_vm5, %v930_v55 }
 0x12d   : > { %v2546_v9 = vpop.permute.xlu0 %2545  ;;  %v2728_v23 = vsel %vm869_vm3, %v9288_v46, %v2548_v0 }
 0x12e   : > { %v2726_v22 = vsel %vm869_vm3, %v9299_v31, %v2546_v9 }
 0x130   : > { %v2692_v51 = vpop.permute.xlu1 %2691 }
 0x131   : > { %v2764_v8 = vsel %vm906_vm4, %v2728_v23, %v2692_v51  ;;  %v2690_v10 = vpop.permute.xlu0 %2689 }
 0x132   : > { %v2762_v6 = vsel %vm906_vm4, %v2726_v22, %v2690_v10 }
 0x133   : > { %7968 = vmatprep.mubr.msk.bf16.mxu0 %vm1646_vm5, %v2762_v6 }
 0x134   : > { %v715_v11 = vpop.permute.xlu1 %714  ;;  %7969 = vmatmul.mubr.msk.bf16.gmra.mxu0 %vm1646_vm5, %v2764_v8 }
 0x135   : > { %v713_v42 = vpop.permute.xlu0 %712  ;;  %v897_v35 = vsel %vm869_vm3, %v9332_v33, %v715_v11 }
 0x136   : > { %v895_v46 = vsel %vm869_vm3, %v9354_v21, %v713_v42 }
 0x138   : > { %v860_v13 = vpop.permute.xlu1 %859 }
 0x139   : > { %v934_v31 = vsel %vm906_vm4, %v897_v35, %v860_v13  ;;  %v858_v44 = vpop.permute.xlu0 %857 }
 0x13a   : > { %v932_v57 = vsel %vm906_vm4, %v895_v46, %v858_v44 }
 0x13b   : > { %7932 = vmatprep.mubr.msk.bf16.mxu1 %vm1646_vm5, %v932_v57 }
 0x13c   : > { %v2552_v17 = vpop.permute.xlu1 %2551  ;;  %7933 = vmatmul.mubr.msk.bf16.gmra.mxu1 %vm1646_vm5, %v934_v31 }
 0x13d   : > { %v2550_v16 = vpop.permute.xlu0 %2549  ;;  %v2732_v38 = vsel %vm869_vm3, %v9398_v28, %v2552_v17 }
 0x13e   : > { %v2730_v33 = vsel %vm869_vm3, %v9404_v62, %v2550_v16 }
 0x140   : > { %v2696_v7 = vpop.permute.xlu1 %2695 }
 0x141   : > { %v2768_v21 = vsel %vm906_vm4, %v2732_v38, %v2696_v7  ;;  %v2694_v19 = vpop.permute.xlu0 %2693 }
 0x142   : > { %v2766_v37 = vsel %vm906_vm4, %v2730_v33, %v2694_v19 }
 0x143   : > { %7972 = vmatprep.mubr.msk.bf16.mxu0 %vm1646_vm5, %v2766_v37 }
 0x144   : > { %v719_v58 = vpop.permute.xlu1 %718  ;;  %7973 = vmatmul.mubr.msk.bf16.gmra.mxu0 %vm1646_vm5, %v2768_v21 }
 0x145   : > { %v717_v26 = vpop.permute.xlu0 %716  ;;  %v901_v43 = vsel %vm869_vm3, %v9450_v63, %v719_v58 }
 0x146   : > { %v899_v28 = vsel %vm869_vm3, %v9463_v1, %v717_v26 }
 0x148   : > { %v864_v18 = vpop.permute.xlu1 %863 }
 0x149   : > { %v938_v62 = vsel %vm906_vm4, %v901_v43, %v864_v18  ;;  %v862_v60 = vpop.permute.xlu0 %861 }
 0x14a   : > { %v936_v39 = vsel %vm906_vm4, %v899_v28, %v862_v60 }
 0x14b   : > { %7936 = vmatprep.mubr.msk.bf16.mxu1 %vm1646_vm5, %v936_v39 }
 0x14c   : > { %v2556_v3 = vpop.permute.xlu1 %2555  ;;  %7937 = vmatmul.mubr.msk.bf16.gmra.mxu1 %vm1646_vm5, %v938_v62 }
 0x14d   : > { %v2554_v52 = vpop.permute.xlu0 %2553  ;;  %v2736_v56 = vsel %vm869_vm3, %v9490_v14, %v2556_v3 }
 0x14e   : > { %v2734_v63 = vsel %vm869_vm3, %v9511_v48, %v2554_v52  ;;  %v9864_v52 = vld [vmem:[%s11634_s2] ss:$0 sm:$0xff] }
 0x150   : > { %v2700_v61 = vpop.permute.xlu1 %2699 }
 0x151   : > { %v2772_v1 = vsel %vm906_vm4, %v2736_v56, %v2700_v61  ;;  %v2698_v54 = vpop.permute.xlu0 %2697 }
 0x152   : > { %v2770_v36 = vsel %vm906_vm4, %v2734_v63, %v2698_v54 }
 0x153   : > { %7976 = vmatprep.mubr.msk.bf16.mxu0 %vm1646_vm5, %v2770_v36 }
 0x154   : > { %v723_v12 = vpop.permute.xlu1 %722  ;;  %7977 = vmatmul.mubr.msk.bf16.gmra.mxu0 %vm1646_vm5, %v2772_v1 }
 0x155   : > { %v721_v15 = vpop.permute.xlu0 %720  ;;  %v905_v25 = vsel %vm869_vm3, %v9551_v50, %v723_v12 }
 0x156   : > { %v903_v14 = vsel %vm869_vm3, %v9558_v30, %v721_v15 }
 0x158   : > { %v868_v24 = vpop.permute.xlu1 %867  ;;  %v7870_v5 = vpop.f32.mrf.mxu0 }
 0x159   : > { %v942_v48 = vsel %vm906_vm4, %v905_v25, %v868_v24  ;;  %v866_v29 = vpop.permute.xlu0 %865 }
 0x15a   : > { %v940_v4 = vsel %vm906_vm4, %v903_v14, %v866_v29  ;;  %v1721_v59 = vpop.f32.mrf.mxu0 }
 0x15b   : > { %7940 = vmatprep.mubr.msk.bf16.mxu1 %vm1646_vm5, %v940_v4 }
 0x15c   : > { %v2560_v2 = vpop.permute.xlu1 %2559  ;;  %v7871_v49 = vpop.f32.mrf.mxu0  ;;  %7941 = vmatmul.mubr.msk.bf16.gmra.mxu1 %vm1646_vm5, %v942_v48 }
 0x15d   : > { %v2558_v32 = vpop.permute.xlu0 %2557  ;;  %v2740_v50 = vsel %vm869_vm3, %v9601_v20, %v2560_v2 }
 0x15e   : > { %v1724_v47 = vpop.f32.mrf.mxu0  ;;  %v2738_v30 = vsel %vm869_vm3, %v9613_v40, %v2558_v32 }
 0x160   : > { %v2704_v53 = vpop.permute.xlu1 %2703  ;;  %v9791_v27 = vpop.f32.mrf.mxu0 }
 0x161   : > { %v2776_v34 = vsel %vm906_vm4, %v2740_v50, %v2704_v53  ;;  %v2702_v55 = vpop.permute.xlu0 %2701 }
 0x162   : > { %v2774_v45 = vsel %vm906_vm4, %v2738_v30, %v2702_v55  ;;  %v9797_v41 = vpop.f32.mrf.mxu0 }
 0x163   : > { %7980 = vmatprep.mubr.msk.bf16.mxu0 %vm1646_vm5, %v2774_v45 }
 0x164   : > { %v9800_v0 = vpop.f32.mrf.mxu0  ;;  %7981 = vmatmul.mubr.msk.bf16.gmra.mxu0 %vm1646_vm5, %v2776_v34 }
 0x166   : > { %v9803_v9 = vpop.f32.mrf.mxu0 }
 0x168   : > { %v9805_v20 = vpop.f32.mrf.mxu0 }
 0x16a   : > { %v9807_v51 = vpop.f32.mrf.mxu0 }
 0x16c   : > { %v9809_v40 = vpop.f32.mrf.mxu0 }
 0x16e   : > { %v9811_v23 = vpop.f32.mrf.mxu0 }
 0x170   : > { %v9813_v22 = vpop.f32.mrf.mxu0 }
 0x172   : > { %v9815_v8 = vpop.f32.mrf.mxu0 }
 0x174   : > { %v9817_v10 = vpop.f32.mrf.mxu0 }
 0x176   : > { %v9819_v6 = vpop.f32.mrf.mxu0 }
 0x178   : > { %v9821_v11 = vpop.f32.mrf.mxu0 }
 0x17a   : > { %v9823_v42 = vpop.f32.mrf.mxu0 }
 0x17c   : > { %v9825_v13 = vpop.f32.mrf.mxu0 }
 0x17e   : > { %v9827_v35 = vpop.f32.mrf.mxu0 }
 0x180   : > { %v9829_v46 = vpop.f32.mrf.mxu0 }
 0x182   : > { %v9831_v31 = vpop.f32.mrf.mxu0 }
 0x184   : > { %v9833_v44 = vpop.f32.mrf.mxu0 }
 0x186   : > { %v9835_v57 = vpop.f32.mrf.mxu0 }
 0x188   : > { %v9837_v17 = vpop.f32.mrf.mxu0 }
 0x18a   : > { %v9839_v16 = vpop.f32.mrf.mxu0 }
 0x18c   : > { %v9841_v7 = vpop.f32.mrf.mxu0 }
 0x18e   : > { %v9843_v38 = vpop.f32.mrf.mxu0 }
 0x190   : > { %v9845_v33 = vpop.f32.mrf.mxu0 }
 0x192   : > { %v9847_v21 = vpop.f32.mrf.mxu0 }
 0x194   : > { %v9849_v19 = vpop.f32.mrf.mxu0 }
 0x196   : > { %v9851_v37 = vpop.f32.mrf.mxu0 }
 0x198   : > { %v9853_v58 = vpop.f32.mrf.mxu0 }
 0x19a   : > { %v9855_v26 = vpop.f32.mrf.mxu0 }
 0x19c   : > { %v7910_v18 = vpop.f32.mrf.mxu1  ;;  %v9857_v43 = vpop.f32.mrf.mxu0 }
 0x19d   : > { %v1955_v39 = vadd.f32 %v7910_v18, %v7870_v5 }
 0x19e   : > { %v1946_v28 = vpop.f32.mrf.mxu1  ;;  %v9859_v62 = vpop.f32.mrf.mxu0 }
 0x19f   : > { %v1947_v61 = vadd.f32 %v1946_v28, %v1721_v59 }
 0x1a0   : > { %v7911_v60 = vpop.f32.mrf.mxu1 }
 0x1a1   : > { %v1958_v54 = vadd.f32 %v7911_v60, %v7871_v49  ;;  %v3604_v60 = vld [vmem:[#allocation2 + $0xc] sm:$0xf] }
 0x1a2   : > { %v1949_v63 = vpop.f32.mrf.mxu1 }
 0x1a3   : > { %v1950_v24 = vadd.f32 %v1949_v63, %v1724_v47 }
 0x1a4   : > { %v7950_v3 = vpop.f32.mrf.mxu0 }
 0x1a5   : > { %v3007_v56 = vadd.f32 %v7950_v3, %v1955_v39 }
 0x1a6   : > { %v2862_v1 = vpop.f32.mrf.mxu0 }
 0x1a7   : > { %v3050_v36 = vadd.f32 %v9864_v52, %v3007_v56  ;;  %v3005_v12 = vadd.f32 %v2862_v1, %v1947_v61  ;;  %v3594_v1 = vld [vmem:[#allocation2] sm:$0xf] }
 0x1a8   : > { %v7951_v15 = vpop.f32.mrf.mxu0 }
 0x1a9   : > { %v3086_v25 = vmax.f32 %v3050_v36, 0.0  ;;  %v3048_v14 = vadd.f32 %v9864_v52, %v3005_v12  ;;  %v3008_v5 = vadd.f32 %v7951_v15, %v1958_v54 }
 0x1aa   : > { %v2865_v48 = vpop.f32.mrf.mxu0 }
 0x1ab   : > { %v7644_v29 = vpack.c.bf16 %v3086_v25, %v3086_v25  ;;  %v3084_v4 = vmax.f32 %v3048_v14, 0.0  ;;  %v3051_v2 = vadd.f32 %v9864_v52, %v3008_v5  ;;  %v3006_v32 = vadd.f32 %v2865_v48, %v1950_v24 }
 0x1ac   : > { %v7914_v59 = vpop.f32.mrf.mxu1 }
 0x1ad   : > { %v3249_v53 = vshrl.u32 %v7644_v29, 16  ;;  %v7642_v49 = vpack.c.bf16 %v3084_v4, %v3084_v4  ;;  %v3087_v50 = vmax.f32 %v3051_v2, 0.0  ;;  %v3049_v30 = vadd.f32 %v9864_v52, %v3006_v32 }
 0x1ae   : > { %v1962_v47 = vpop.f32.mrf.mxu1  ;;  %v3252_v55 = vshll.u32 %v7644_v29, 16  ;;  %v1971_v36 = vadd.f32 %v7914_v59, %v9791_v27  ;;  %v3608_v27 = vld [vmem:[#allocation2 + $0x14] sm:$0x1] }
 0x1af   : > { %v3251_v34 = vrot.slane %v3249_v53, 7  ;;  %v3232_v45 = vshrl.u32 %v7642_v49, 16  ;;  %v7645_v18 = vpack.c.bf16 %v3087_v50, %v3087_v50  ;;  %v3085_v39 = vmax.f32 %v3049_v30, 0.0 }
 0x1b0   : > { %v3235_v56 = vshll.u32 %v7642_v49, 16  ;;  %v7915_v12 = vpop.f32.mrf.mxu1  ;;  %v1963_v2 = vadd.f32 %v1962_v47, %v9797_v41  ;;  %v3601_v47 = vld [vmem:[#allocation2 + $0x8] sm:$0x1] }
 0x1b1   : > { %v3254_v3 = vor.u32 %v3252_v55, %v3251_v34  ;;  %v3234_v61 = vrot.slane %v3232_v45, 7  ;;  %v3257_v63 = vshrl.u32 %v7645_v18, 16  ;;  %v7643_v54 = vpack.c.bf16 %v3085_v39, %v3085_v39 }
 0x1b2   : > { %v3260_v5 = vshll.u32 %v7645_v18, 16  ;;  %v3255_v48 = vrot.slane %v3251_v34, 4  ;;  %v1974_v55 = vadd.f32 %v7915_v12, %v9800_v0  ;;  %v1965_v45 = vpop.f32.mrf.mxu1 }
 0x1b3   : > { %v3605_v24 = vsel %vm9872_vm9, %v3254_v3, %v3604_v60  ;;  %v3237_v25 = vor.u32 %v3235_v56, %v3234_v61  ;;  %v3259_v14 = vrot.slane %v3257_v63, 7  ;;  %v3240_v4 = vshrl.u32 %v7643_v54, 16 }
 0x1b4   : > { %3606 = vst [vmem:[#allocation2 + $0xc] sm:$0xf] %v3605_v24  ;;  %v7954_v32 = vpop.f32.mrf.mxu0  ;;  %v3243_v34 = vshll.u32 %v7643_v54, 16  ;;  %v3238_v56 = vrot.slane %v3234_v61, 4  ;;  %v1966_v0 = vadd.f32 %v1965_v45, %v9803_v9 }
 0x1b5   : > { %v3595_v59 = vsel %vm9872_vm9, %v3237_v25, %v3594_v1  ;;  %v3262_v53 = vor.u32 %v3260_v5, %v3259_v14  ;;  %v3264_v49 = vrot.slane %v3259_v14, 4  ;;  %v3011_v50 = vadd.f32 %v7954_v32, %v1971_v36 }
 0x1b6   : > { %3596 = vst [vmem:[#allocation2] sm:$0xf] %v3595_v59  ;;  %v3242_v30 = vrot.slane %v3240_v4, 7  ;;  %v2878_v18 = vpop.f32.mrf.mxu0  ;;  %v11645_v32 = vmov 0  }
 0x1b7   : > { %v3263_v60 = vsel %vm9887_vm13, %v3255_v48, %v3262_v53  ;;  %v3609_v41 = vsel %vm9879_vm12, %v3264_v49, %v3608_v27  ;;  %v3054_v39 = vadd.f32 %v9864_v52, %v3011_v50  ;;  %v3009_v3 = vadd.f32 %v2878_v18, %v1963_v2 }
 0x1b8   : > { %3607 = vst.msk [vmem:[#allocation2 + $0x10] sm:$0xf] %vm3591_vm6, %v3263_v60  ;;  %3610 = vst [vmem:[#allocation2 + $0x14] sm:$0x1] %v3609_v41  ;;  %v3245_v63 = vor.u32 %v3243_v34, %v3242_v30  ;;  %v3247_v1 = vrot.slane %v3242_v30, 4  ;;  %v7955_v54 = vpop.f32.mrf.mxu0 }
 0x1b9   : > { %v3090_v36 = vmax.f32 %v3054_v39, 0.0  ;;  %v3052_v12 = vadd.f32 %v9864_v52, %v3009_v3  ;;  %v3012_v24 = vadd.f32 %v7955_v54, %v1974_v55  ;;  %v3618_v39 = vld [vmem:[#allocation2 + $0x24] sm:$0xf] }
 0x1ba   : > { %v3246_v25 = vsel %vm9887_vm13, %v3238_v56, %v3245_v63  ;;  %v3602_v14 = vsel %vm9879_vm12, %v3247_v1, %v3601_v47  ;;  %v2881_v5 = vpop.f32.mrf.mxu0 }
 0x1bb   : > { %v3726_v61 = vld [vmem:[#allocation2 + $0xc] sm:$0x1]  ;;  %3598 = vst.msk [vmem:[#allocation2 + $0x4] sm:$0xf] %vm3591_vm6, %v3246_v25  ;;  %3603 = vst [vmem:[#allocation2 + $0x8] sm:$0x1] %v3602_v14  ;;  %v7648_v48 = vpack.c.bf16 %v3090_v36, %v3090_v36  ;;  %v3055_v4 = vadd.f32 %v9864_v52, %v3012_v24  ;;  %v3010_v9 = vadd.f32 %v2881_v5, %v1966_v0 }
 0x1bc   : > { %v3088_v27 = vmax.f32 %v3052_v12, 0.0  ;;  %v3727_v2 = vsel %vm9879_vm12, 0, %v3726_v61  ;;  %3837 = vst.msk [vmem:[#allocation2 + $0x4] sm:$0xf] %vm3591_vm6, %v11645_v32  ;;  %v7918_v59 = vpop.f32.mrf.mxu1 }
 0x1bd   : > { %3728 = vst [vmem:[#allocation2 + $0xc] sm:$0x1] %v3727_v2  ;;  %v3723_v53 = vld [vmem:[#allocation2] sm:$0x1]  ;;  %v3283_v50 = vshrl.u32 %v7648_v48, 16  ;;  %v3091_v34 = vmax.f32 %v3055_v4, 0.0  ;;  %v3053_v18 = vadd.f32 %v9864_v52, %v3010_v9  ;;  %v1987_v63 = vadd.f32 %v7918_v59, %v9805_v20 }
 0x1be   : > { %v7646_v30 = vpack.c.bf16 %v3088_v27, %v3088_v27  ;;  %v3724_v55 = vsel %vm9879_vm12, 0, %v3723_v53  ;;  %v3286_v45 = vshll.u32 %v7648_v48, 16  ;;  %v1978_v60 = vpop.f32.mrf.mxu1  ;;  %v4510_v48 = vld [vmem:[#allocation2 + $0xc] sm:$0xe]  ;;  %v3611_v20 = vld [vmem:[#allocation2 + $0x18] sm:$0xf] }
 0x1bf   : > { %3725 = vst [vmem:[#allocation2] sm:$0x1] %v3724_v55  ;;  %v3781_v41 = vld [vmem:[#allocation2 + $0x14] sm:$0x1]  ;;  %v3285_v47 = vrot.slane %v3283_v50, 7  ;;  %v7649_v56 = vpack.c.bf16 %v3091_v34, %v3091_v34  ;;  %v3089_v0 = vmax.f32 %v3053_v18, 0.0  ;;  %v1979_v36 = vadd.f32 %v1978_v60, %v9807_v51 }
 0x1c0   : > { %v3266_v3 = vshrl.u32 %v7646_v30, 16  ;;  %3836 = vst.msk [vmem:[#allocation2] sm:$0xf] %vm3591_vm6, %v11645_v32  ;;  %v3782_v1 = vsel %vm9915_vm14, 0, %v3781_v41  ;;  %v3269_v54 = vshll.u32 %v7646_v30, 16  ;;  %v7919_v12 = vpop.f32.mrf.mxu1 }
 0x1c1   : > { %v4463_v24 = vld [vmem:[#allocation2 + $0x10] sm:$0xf]  ;;  %3783 = vst [vmem:[#allocation2 + $0x14] sm:$0x1] %v3782_v1  ;;  %v3288_v25 = vor.u32 %v3286_v45, %v3285_v47  ;;  %v3289_v14 = vrot.slane %v3285_v47, 4  ;;  %v3291_v61 = vshrl.u32 %v7649_v56, 16  ;;  %v7647_v9 = vpack.c.bf16 %v3089_v0, %v3089_v0 }
 0x1c2   : > { %v3268_v5 = vrot.slane %v3266_v3, 7  ;;  %v3778_v27 = vld [vmem:[#allocation2 + $0x8] sm:$0x1]  ;;  %v3294_v4 = vshll.u32 %v7649_v56, 16  ;;  %v1990_v2 = vadd.f32 %v7919_v12, %v9809_v40  ;;  %v1981_v59 = vpop.f32.mrf.mxu1  ;;  %v7440_v53 = vcombine.low %v4510_v48, %v4463_v24  ;;  %v3622_v55 = vld [vmem:[#allocation2 + $0x2c] sm:$0x1] }
 0x1c3   : > { %v3779_v50 = vsel %vm9915_vm14, 0, %v3778_v27  ;;  %v3619_v51 = vsel %vm9872_vm9, %v3288_v25, %v3618_v39  ;;  %v3853_v45 = vld [vmem:[#allocation2 + $0x10] sm:$0xf]  ;;  %v3293_v18 = vrot.slane %v3291_v61, 7  ;;  %v3274_v60 = vshrl.u32 %v7647_v9, 16 }
 0x1c4   : > { %v3271_v30 = vor.u32 %v3269_v54, %v3268_v5  ;;  %v3272_v34 = vrot.slane %v3268_v5, 4  ;;  %3780 = vst [vmem:[#allocation2 + $0x8] sm:$0x1] %v3779_v50  ;;  %3620 = vst [vmem:[#allocation2 + $0x24] sm:$0xf] %v3619_v51  ;;  %v3277_v41 = vshll.u32 %v7647_v9, 16  ;;  %v1982_v47 = vadd.f32 %v1981_v59, %v9811_v23  ;;  %v7958_v40 = vpop.f32.mrf.mxu0 }
 0x1c5   : > { %v4462_v3 = vld [vmem:[#allocation2 + $0xc] sm:$0xf]  ;;  %3839 = vst.msk [vmem:[#allocation2 + $0x8] sm:$0x1] %vm3599_vm10, %v11645_v32  ;;  %v3015_v39 = vadd.f32 %v7958_v40, %v1987_v63  ;;  %v4926_v1 = vrot.slane %v7440_v53, 1  ;;  %v3296_v25 = vor.u32 %v3294_v4, %v3293_v18  ;;  %v3298_v5 = vrot.slane %v3293_v18, 4 }
 0x1c6   : > { %v3612_v56 = vsel %vm9872_vm9, %v3271_v30, %v3611_v20  ;;  %v9938_v54 = vcombine.low %v4462_v3, %v4463_v24  ;;  %v3852_v0 = vld [vmem:[#allocation2 + $0xc] sm:$0xf]  ;;  %v3276_v61 = vrot.slane %v3274_v60, 7  ;;  %v2894_v48 = vpop.f32.mrf.mxu0  ;;  %v9940_v27 = vld [vmem:[#allocation2 + $0x4] sm:$0xf] }
 0x1c7   : > { %v3899_v12 = vld [vmem:[#allocation2 + $0xc] sm:$0xe]  ;;  %3613 = vst [vmem:[#allocation2 + $0x18] sm:$0xf] %v3612_v56  ;;  %v3615_v9 = vld [vmem:[#allocation2 + $0x20] sm:$0x1]  ;;  %v3058_v59 = vadd.f32 %v9864_v52, %v3015_v39  ;;  %v3013_v50 = vadd.f32 %v2894_v48, %v1979_v36  ;;  %v9943_v51 = vcombine.low %v3852_v0, %v3853_v45  ;;  %v3297_v20 = vsel %vm9887_vm13, %v3289_v14, %v3296_v25 }
 0x1c8   : > { %v7393_v23 = vcombine.low %v3899_v12, %v3853_v45  ;;  %v4655_v63 = vshrl.u32 %v9938_v54, 16  ;;  %v9946_v24 = vld [vmem:[#allocation2] sm:$0xe]  ;;  %v3623_v4 = vsel %vm9879_vm12, %v3298_v5, %v3622_v55  ;;  %v3279_v53 = vor.u32 %v3277_v41, %v3276_v61  ;;  %v7959_v18 = vpop.f32.mrf.mxu0  ;;  %v9952_v60 = vld [vmem:[#allocation2 + $0x14] ss:$0 sps:$4 sm:$0x11]  }
 0x1c9   : > { %v3281_v30 = vrot.slane %v3276_v61, 4  ;;  %3621 = vst.msk [vmem:[#allocation2 + $0x28] sm:$0xf] %vm3591_vm6, %v3297_v20  ;;  %3624 = vst [vmem:[#allocation2 + $0x2c] sm:$0x1] %v3623_v4  ;;  %v3094_v36 = vmax.f32 %v3058_v59, 0.0  ;;  %v3056_v45 = vadd.f32 %v9864_v52, %v3013_v50  ;;  %v3016_v40 = vadd.f32 %v7959_v18, %v1990_v2 }
 0x1ca   : > { %v9956_v3 = vld [vmem:[#allocation2 + $0x14] ss:$0 sps:$4 sm:$0x11]   ;;  %v7392_v14 = vcombine.low %v9946_v24, %v9940_v27  ;;  %v3280_v55 = vsel %vm9887_vm13, %v3272_v34, %v3279_v53  ;;  %v2897_v56 = vpop.f32.mrf.mxu0  ;;  %v4927_v39 = vrot.slane %v9952_v60, 1  ;;  %v4317_v0 = vrot.slane %v7393_v23, 1 }
 0x1cb   : > { %v3616_v41 = vsel %vm9879_vm12, %v3281_v30, %v3615_v9  ;;  %v3732_v12 = vld [vmem:[#allocation2 + $0x24] sm:$0x1]  ;;  %3614 = vst.msk [vmem:[#allocation2 + $0x1c] sm:$0xf] %vm3591_vm6, %v3280_v55  ;;  %v7652_v2 = vpack.c.bf16 %v3094_v36, %v3094_v36  ;;  %v3092_v25 = vmax.f32 %v3056_v45, 0.0  ;;  %v3059_v5 = vadd.f32 %v9864_v52, %v3016_v40 }
 0x1cc   : > { %3617 = vst [vmem:[#allocation2 + $0x20] sm:$0x1] %v3616_v41  ;;  %v3014_v61 = vadd.f32 %v2897_v56, %v1982_v47  ;;  %v3733_v48 = vsel %vm9879_vm12, 0, %v3732_v12  ;;  %v7922_v34 = vpop.f32.mrf.mxu1  ;;  %v4928_v59 = vsel %vm778_vm1, %v4926_v1, %v4927_v39  ;;  %v4318_v9 = vrot.slane %v9956_v3, 1  ;;  %v3632_v55 = vld [vmem:[#allocation2 + $0x3c] sm:$0xf] }
 0x1cd   : > { %v4657_v50 = vshll.u32 %v9938_v54, 16  ;;  %3734 = vst [vmem:[#allocation2 + $0x24] sm:$0x1] %v3733_v48  ;;  %v3317_v20 = vshrl.u32 %v7652_v2, 16  ;;  %v3320_v4 = vshll.u32 %v7652_v2, 16  ;;  %v7650_v53 = vpack.c.bf16 %v3092_v25, %v3092_v25  ;;  %4974 = vrot.lane.b32.xlu0 %v4928_v59, %s8471_s30 }
 0x1ce   : > { %v3729_v23 = vld [vmem:[#allocation2 + $0x18] sm:$0x1]  ;;  %v3095_v30 = vmax.f32 %v3059_v5, 0.0  ;;  %v3057_v18 = vadd.f32 %v9864_v52, %v3014_v61  ;;  %v2003_v36 = vadd.f32 %v7922_v34, %v9813_v22  ;;  %v4319_v1 = vsel %vm778_vm1, %v4317_v0, %v4318_v9  ;;  %v1994_v45 = vpop.f32.mrf.mxu1 }
 0x1cf   : > { %v3730_v47 = vsel %vm9879_vm12, 0, %v3729_v23  ;;  %v3319_v40 = vrot.slane %v3317_v20, 7  ;;  %v3300_v41 = vshrl.u32 %v7650_v53, 16  ;;  %v3303_v56 = vshll.u32 %v7650_v53, 16  ;;  %4364 = vrot.lane.b32.xlu1 %v4319_v1, %s8471_s30  ;;  %v3625_v23 = vld [vmem:[#allocation2 + $0x30] sm:$0xf] }
 0x1d0   : > { %3731 = vst [vmem:[#allocation2 + $0x18] sm:$0x1] %v3730_v47  ;;  %v7653_v39 = vpack.c.bf16 %v3095_v30, %v3095_v30  ;;  %v3787_v12 = vld [vmem:[#allocation2 + $0x2c] sm:$0x1]  ;;  %v3093_v2 = vmax.f32 %v3057_v18, 0.0  ;;  %v9980_v25 = vadd.f32 %v1994_v45, %v9815_v8  ;;  %v7923_v5 = vpop.f32.mrf.mxu1  ;;  %v4659_v61 = vrot.slane %v4657_v50, 1 }
 0x1d1   : > { %v4662_v22 = vshll.u32 %v9952_v60, 16  ;;  %v3788_v0 = vsel %vm9915_vm14, 0, %v3787_v12  ;;  %v3322_v48 = vor.u32 %v3320_v4, %v3319_v40  ;;  %v3323_v34 = vrot.slane %v3319_v40, 4  ;;  %v3636_v12 = vld [vmem:[#allocation2 + $0x44] sm:$0x1] }
 0x1d2   : > { %v3302_v59 = vrot.slane %v3300_v41, 7  ;;  %3789 = vst [vmem:[#allocation2 + $0x2c] sm:$0x1] %v3788_v0  ;;  %v3325_v20 = vshrl.u32 %v7653_v39, 16  ;;  %v3328_v53 = vshll.u32 %v7653_v39, 16  ;;  %v7651_v30 = vpack.c.bf16 %v3093_v2, %v3093_v2  ;;  %v1997_v41 = vpop.f32.mrf.mxu1 }
 0x1d3   : > { %v3784_v9 = vld [vmem:[#allocation2 + $0x20] sm:$0x1]  ;;  %v2006_v47 = vadd.f32 %v7923_v5, %v9817_v10  ;;  %v3633_v60 = vsel %vm9872_vm9, %v3322_v48, %v3632_v55  ;;  %v4660_v40 = vor.u32 %v4659_v61, %v4655_v63  ;;  %v4664_v2 = vrot.slane %v4662_v22, 1  ;;  %v3629_v63 = vld [vmem:[#allocation2 + $0x38] sm:$0x1] }
 0x1d4   : > { %v3785_v8 = vsel %vm9915_vm14, 0, %v3784_v9  ;;  %v3305_v50 = vor.u32 %v3303_v56, %v3302_v59  ;;  %v3306_v18 = vrot.slane %v3302_v59, 4  ;;  %3634 = vst [vmem:[#allocation2 + $0x3c] sm:$0xf] %v3633_v60  ;;  %v3327_v4 = vrot.slane %v3325_v20, 7  ;;  %v7962_v39 = vpop.f32.mrf.mxu0 }
 0x1d5   : > { %3786 = vst [vmem:[#allocation2 + $0x20] sm:$0x1] %v3785_v8  ;;  %v3308_v1 = vshrl.u32 %v7651_v30, 16  ;;  %v3311_v45 = vshll.u32 %v7651_v30, 16  ;;  %v4055_v5 = vshrl.u32 %v9943_v51, 16  ;;  %v4057_v55 = vshll.u32 %v9943_v51, 16 }
 0x1d6   : > { %v3626_v10 = vsel %vm9872_vm9, %v3305_v50, %v3625_v23  ;;  %v3330_v56 = vor.u32 %v3328_v53, %v3327_v4  ;;  %v3332_v0 = vrot.slane %v3327_v4, 4  ;;  %v4062_v59 = vshll.u32 %v9956_v3, 16  ;;  %v8300_v9 = vld [vmem:[#allocation2 + $0x8] ss:$0 sps:$4 sm:$0x11]   ;;  %v2910_v20 = vpop.f32.mrf.mxu0 }
 0x1d7   : > { %3627 = vst [vmem:[#allocation2 + $0x30] sm:$0xf] %v3626_v10  ;;  %v3310_v48 = vrot.slane %v3308_v1, 7  ;;  %v4665_v61 = vsel %vm471_vm2, %v4660_v40, %v4664_v2  ;;  %v4059_v30 = vrot.slane %v4057_v55, 1  ;;  %v1998_v23 = vadd.f32 %v1997_v41, %v9819_v6  ;;  %v3850_v22 = vld [vmem:[#allocation2] sm:$0xf] }
 0x1d8   : > { %v3019_v8 = vadd.f32 %v7962_v39, %v2003_v36  ;;  %v3331_v60 = vsel %vm9887_vm13, %v3323_v34, %v3330_v56  ;;  %v3637_v53 = vsel %vm9879_vm12, %v3332_v0, %v3636_v12  ;;  %4846 = vrot.lane.b32.xlu0 %v4665_v61, %s8472_s6  ;;  %v7963_v3 = vpop.f32.mrf.mxu0  ;;  %v4064_v40 = vrot.slane %v4062_v59, 1  ;;  %v5533_v61 = vld [vmem:[#allocation2 + $0x24] sm:$0xe] }
 0x1d9   : > { %v3313_v50 = vor.u32 %v3311_v45, %v3310_v48  ;;  %v3315_v4 = vrot.slane %v3310_v48, 4  ;;  %3635 = vst.msk [vmem:[#allocation2 + $0x40] sm:$0xf] %vm3591_vm6, %v3331_v60  ;;  %3638 = vst [vmem:[#allocation2 + $0x44] sm:$0x1] %v3637_v53  ;;  %v4060_v1 = vor.u32 %v4059_v30, %v4055_v5  ;;  %v4314_v36 = vrot.slane %v7392_v14, 1 }
 0x1da   : > { %v3062_v6 = vadd.f32 %v9864_v52, %v3019_v8  ;;  %v4315_v41 = vrot.slane %v8300_v9, 1  ;;  %v10014_v39 = vcombine.low %v3850_v22, %v9940_v27  ;;  %v3017_v24 = vadd.f32 %v2910_v20, %v9980_v25  ;;  %v2913_v5 = vpop.f32.mrf.mxu0  ;;  %v5487_v48 = vld [vmem:[#allocation2 + $0x28] sm:$0xf]  ;;  %v10033_v53 = vld [vmem:[#allocation2 + $0x2c] ss:$0 sps:$4 sm:$0x11]  }
 0x1db   : > { %v3314_v34 = vsel %vm9887_vm13, %v3306_v18, %v3313_v50  ;;  %v3630_v45 = vsel %vm9879_vm12, %v3315_v4, %v3629_v63  ;;  %v3738_v10 = vld [vmem:[#allocation2 + $0x3c] sm:$0x1]  ;;  %v4065_v12 = vsel %vm471_vm2, %v4060_v1, %v4064_v40  ;;  %v3020_v14 = vadd.f32 %v7963_v3, %v2006_v47 }
 0x1dc   : > { %11681 = vst [vmem:[#allocation3_spill] sm:$0xff] %v10014_v39  ;;  %3628 = vst.msk [vmem:[#allocation2 + $0x34] sm:$0xf] %vm3591_vm6, %v3314_v34  ;;  %v3098_v2 = vmax.f32 %v3062_v6, 0.0  ;;  %v3739_v18 = vsel %vm9879_vm12, 0, %v3738_v10  ;;  %4236 = vrot.lane.b32.xlu1 %v4065_v12, %s8472_s6  ;;  %v4316_v55 = vsel %vm778_vm1, %v4314_v36, %v4315_v41  ;;  %v4043_v27 = vshrl.u32 %v10014_v39, 16  ;;  %v7926_v0 = vpop.f32.mrf.mxu1 }
 0x1dd   : > { %3631 = vst [vmem:[#allocation2 + $0x38] sm:$0x1] %v3630_v45  ;;  %v4045_v56 = vshll.u32 %v10014_v39, 16  ;;  %3740 = vst [vmem:[#allocation2 + $0x3c] sm:$0x1] %v3739_v18  ;;  %4362 = vrot.lane.b32.xlu0 %v4316_v55, %s8471_s30  ;;  %v3060_v25 = vadd.f32 %v9864_v52, %v3017_v24  ;;  %v3063_v47 = vadd.f32 %v9864_v52, %v3020_v14  ;;  %v4050_v20 = vshll.u32 %v8300_v9, 16 }
 0x1de   : > { %v3735_v59 = vld [vmem:[#allocation2 + $0x30] sm:$0x1]  ;;  %v7656_v63 = vpack.c.bf16 %v3098_v2, %v3098_v2  ;;  %v3018_v22 = vadd.f32 %v2913_v5, %v1998_v23  ;;  %v10031_v60 = vadd.f32 %v7926_v0, %v9821_v11  ;;  %v3646_v6 = vld [vmem:[#allocation2 + $0x54] sm:$0xf]  ;;  %v7525_v45 = vcombine.low %v5533_v61, %v5487_v48  ;;  %v5486_v12 = vld [vmem:[#allocation2 + $0x24] sm:$0xf] }
 0x1df   : > { %v3736_v30 = vsel %vm9879_vm12, 0, %v3735_v59  ;;  %v4047_v8 = vrot.slane %v4045_v56, 1  ;;  %v3096_v3 = vmax.f32 %v3060_v25, 0.0  ;;  %v3099_v1 = vmax.f32 %v3063_v47, 0.0  ;;  %v4467_v2 = vld [vmem:[#allocation2 + $0x28] sm:$0xf] }
 0x1e0   : > { %3737 = vst [vmem:[#allocation2 + $0x30] sm:$0x1] %v3736_v30  ;;  %v3351_v50 = vshrl.u32 %v7656_v63, 16  ;;  %v3354_v4 = vshll.u32 %v7656_v63, 16  ;;  %v3793_v40 = vld [vmem:[#allocation2 + $0x44] sm:$0x1]  ;;  %v3061_v34 = vadd.f32 %v9864_v52, %v3018_v22 }
 0x1e1   : > { %v4048_v36 = vor.u32 %v4047_v8, %v4043_v27  ;;  %v4052_v9 = vrot.slane %v4050_v20, 1  ;;  %v3794_v23 = vsel %vm9915_vm14, 0, %v3793_v40  ;;  %v7654_v11 = vpack.c.bf16 %v3096_v3, %v3096_v3  ;;  %v2010_v27 = vpop.f32.mrf.mxu1  ;;  %v10043_v25 = vld [vmem:[#allocation2 + $0x2c] ss:$0 sps:$4 sm:$0x11]  }
 0x1e2   : > { %v3353_v41 = vrot.slane %v3351_v50, 7  ;;  %v7657_v10 = vpack.c.bf16 %v3099_v1, %v3099_v1  ;;  %3795 = vst [vmem:[#allocation2 + $0x44] sm:$0x1] %v3794_v23  ;;  %v3097_v5 = vmax.f32 %v3061_v34, 0.0  ;;  %v5951_v18 = vrot.slane %v7525_v45, 1 }
 0x1e3   : > { %v4053_v14 = vsel %vm471_vm2, %v4048_v36, %v4052_v9  ;;  %v5952_v55 = vrot.slane %v10033_v53, 1  ;;  %v3334_v63 = vshrl.u32 %v7654_v11, 16  ;;  %v3337_v47 = vshll.u32 %v7654_v11, 16  ;;  %v3639_v20 = vld [vmem:[#allocation2 + $0x48] sm:$0xf] }
 0x1e4   : > { %v3790_v24 = vld [vmem:[#allocation2 + $0x38] sm:$0x1]  ;;  %v3356_v0 = vor.u32 %v3354_v4, %v3353_v41  ;;  %v3357_v59 = vrot.slane %v3353_v41, 4  ;;  %4234 = vrot.lane.b32.xlu0 %v4053_v14, %s8472_s6  ;;  %v3359_v61 = vshrl.u32 %v7657_v10, 16  ;;  %v3362_v30 = vshll.u32 %v7657_v10, 16  ;;  %v7927_v41 = vpop.f32.mrf.mxu1  ;;  %v7966_v11 = vpop.f32.mrf.mxu0 }
 0x1e5   : > { %v3791_v56 = vsel %vm9915_vm14, 0, %v3790_v24  ;;  %v7655_v8 = vpack.c.bf16 %v3097_v5, %v3097_v5  ;;  %v4466_v22 = vld [vmem:[#allocation2 + $0x24] sm:$0xf]  ;;  %v3336_v3 = vrot.slane %v3334_v63, 7  ;;  %v5953_v1 = vsel %vm778_vm1, %v5951_v18, %v5952_v55  ;;  %v3650_v9 = vld [vmem:[#allocation2 + $0x5c] sm:$0x1] }
 0x1e6   : > { %3792 = vst [vmem:[#allocation2 + $0x38] sm:$0x1] %v3791_v56  ;;  %v3647_v50 = vsel %vm9872_vm9, %v3356_v0, %v3646_v6  ;;  %v10048_v4 = vcombine.low %v5486_v12, %v5487_v48  ;;  %v4512_v40 = vld [vmem:[#allocation2 + $0x24] sm:$0xe]  ;;  %v3361_v36 = vrot.slane %v3359_v61, 7  ;;  %5998 = vrot.lane.b32.xlu1 %v5953_v1, %s8471_s30  ;;  %v4933_v6 = vrot.slane %v10043_v25, 1 }
 0x1e7   : > { %3648 = vst [vmem:[#allocation2 + $0x54] sm:$0xf] %v3647_v50  ;;  %v3342_v34 = vshrl.u32 %v7655_v8, 16  ;;  %v3345_v45 = vshll.u32 %v7655_v8, 16  ;;  %v7442_v23 = vcombine.low %v4512_v40, %v4467_v2  ;;  %v3339_v10 = vor.u32 %v3337_v47, %v3336_v3  ;;  %v3643_v14 = vld [vmem:[#allocation2 + $0x50] sm:$0x1] }
 0x1e8   : > { %v3340_v24 = vrot.slane %v3336_v3, 4  ;;  %v10052_v5 = vcombine.low %v4466_v22, %v4467_v2  ;;  %v3857_v48 = vld [vmem:[#allocation2 + $0x28] sm:$0xf]  ;;  %v3364_v12 = vor.u32 %v3362_v30, %v3361_v36  ;;  %v3366_v18 = vrot.slane %v3361_v36, 4  ;;  %v3901_v0 = vld [vmem:[#allocation2 + $0x24] sm:$0xe]  ;;  %v2013_v36 = vpop.f32.mrf.mxu1 }
 0x1e9   : > { %v3344_v55 = vrot.slane %v3342_v34, 7  ;;  %v4932_v56 = vrot.slane %v7442_v23, 1  ;;  %v10054_v63 = vld [vmem:[#allocation2 + $0x2c] ss:$0 sps:$4 sm:$0x11]   ;;  %v3640_v61 = vsel %vm9872_vm9, %v3339_v10, %v3639_v20  ;;  %v2011_v8 = vadd.f32 %v2010_v27, %v9823_v42  ;;  %v2926_v42 = vpop.f32.mrf.mxu0 }
 0x1ea   : > { %v2022_v47 = vadd.f32 %v7927_v41, %v9825_v13  ;;  %v4679_v50 = vshrl.u32 %v10052_v5, 16  ;;  %v3856_v3 = vld [vmem:[#allocation2 + $0x24] sm:$0xf]  ;;  %v5485_v2 = vld [vmem:[#allocation2 + $0x1c] sm:$0xf]  ;;  %v3365_v30 = vsel %vm9887_vm13, %v3357_v59, %v3364_v12  ;;  %v3651_v22 = vsel %vm9879_vm12, %v3366_v18, %v3650_v9 }
 0x1eb   : > { %3641 = vst [vmem:[#allocation2 + $0x48] sm:$0xf] %v3640_v61  ;;  %v3347_v1 = vor.u32 %v3345_v45, %v3344_v55  ;;  %v3349_v40 = vrot.slane %v3344_v55, 4  ;;  %v5484_v34 = vld [vmem:[#allocation2 + $0x18] sm:$0xf]  ;;  %v4934_v13 = vsel %vm778_vm1, %v4932_v56, %v4933_v6  ;;  %v4681_v27 = vshll.u32 %v10052_v5, 16 }
 0x1ec   : > { %v10065_v20 = vld [vmem:[#allocation2 + $0x20] ss:$0 sps:$4 sm:$0x11]   ;;  %3649 = vst.msk [vmem:[#allocation2 + $0x58] sm:$0xf] %vm3591_vm6, %v3365_v30  ;;  %v4686_v23 = vshll.u32 %v10043_v25, 16  ;;  %v7395_v59 = vcombine.low %v3901_v0, %v3857_v48  ;;  %4978 = vrot.lane.b32.xlu0 %v4934_v13, %s8471_s30  ;;  %v10077_v18 = vcombine.low %v3856_v3, %v3857_v48  ;;  %v3023_v30 = vadd.f32 %v7966_v11, %v10031_v60 }
 0x1ed   : > { %3652 = vst [vmem:[#allocation2 + $0x5c] sm:$0x1] %v3651_v22  ;;  %v5532_v41 = vld [vmem:[#allocation2 + $0x18] sm:$0xe]  ;;  %v3348_v9 = vsel %vm9887_vm13, %v3340_v24, %v3347_v1  ;;  %v3644_v45 = vsel %vm9879_vm12, %v3349_v40, %v3643_v14  ;;  %v4324_v12 = vrot.slane %v10054_v63, 1  ;;  %v4683_v25 = vrot.slane %v4681_v27, 1  ;;  %v7967_v1 = vpop.f32.mrf.mxu0 }
 0x1ee   : > { %v4464_v10 = vld [vmem:[#allocation2 + $0x18] sm:$0xf]  ;;  %11682 = vst [vmem:[#allocation4_spill] sm:$0xff] %v10077_v18  ;;  %v4465_v6 = vld [vmem:[#allocation2 + $0x1c] sm:$0xf]  ;;  %v4688_v0 = vrot.slane %v4686_v23, 1  ;;  %v10083_v24 = vadd.f32 %v2013_v36, %v9827_v35  ;;  %v7524_v48 = vcombine.low %v5532_v41, %v5485_v2  ;;  %v10090_v27 = vcombine.low %v5484_v34, %v5485_v2 }
 0x1ef   : > { %v10079_v55 = vld [vmem:[#allocation2 + $0x20] ss:$0 sps:$4 sm:$0x11]   ;;  %v3744_v56 = vld [vmem:[#allocation2 + $0x54] sm:$0x1]  ;;  %v4323_v61 = vrot.slane %v7395_v59, 1  ;;  %v4684_v40 = vor.u32 %v4683_v25, %v4679_v50  ;;  %v3066_v35 = vadd.f32 %v9864_v52, %v3023_v30  ;;  %v10095_v11 = vcombine.low %v4464_v10, %v4465_v6 }
 0x1f0   : > { %3642 = vst.msk [vmem:[#allocation2 + $0x4c] sm:$0xf] %vm3591_vm6, %v3348_v9  ;;  %3645 = vst [vmem:[#allocation2 + $0x50] sm:$0x1] %v3644_v45  ;;  %v3745_v14 = vsel %vm9879_vm12, 0, %v3744_v56  ;;  %v5949_v3 = vrot.slane %v10065_v20, 1  ;;  %v3024_v2 = vadd.f32 %v7967_v1, %v2022_v47 }
 0x1f1   : > { %v4511_v22 = vld [vmem:[#allocation2 + $0x18] sm:$0xe]  ;;  %3746 = vst [vmem:[#allocation2 + $0x54] sm:$0x1] %v3745_v14  ;;  %v4325_v13 = vsel %vm778_vm1, %v4323_v61, %v4324_v12  ;;  %v3855_v59 = vld [vmem:[#allocation2 + $0x1c] sm:$0xf]  ;;  %v4689_v50 = vsel %vm471_vm2, %v4684_v40, %v4688_v0  ;;  %v3021_v12 = vadd.f32 %v2926_v42, %v2011_v8 }
 0x1f2   : > { %v7441_v23 = vcombine.low %v4511_v22, %v4465_v6  ;;  %4368 = vrot.lane.b32.xlu1 %v4325_v13, %s8471_s30  ;;  %v5948_v36 = vrot.slane %v7524_v48, 1  ;;  %v4930_v60 = vrot.slane %v10079_v55, 1  ;;  %v10097_v41 = vld [vmem:[#allocation2 + $0x20] ss:$0 sps:$4 sm:$0x11]   ;;  %4850 = vrot.lane.b32.xlu0 %v4689_v50, %s8472_s6  ;;  %v3102_v25 = vmax.f32 %v3066_v35, 0.0 }
 0x1f3   : > { %v3741_v9 = vld [vmem:[#allocation2 + $0x48] sm:$0x1]  ;;  %v5689_v10 = vshrl.u32 %v10048_v4, 16  ;;  %v3064_v8 = vadd.f32 %v9864_v52, %v3021_v12  ;;  %v3067_v47 = vadd.f32 %v9864_v52, %v3024_v2  ;;  %v3900_v42 = vld [vmem:[#allocation2 + $0x18] sm:$0xe]  ;;  %v5691_v48 = vshll.u32 %v10048_v4, 16 }
 0x1f4   : > { %v4929_v45 = vrot.slane %v7441_v23, 1  ;;  %v3742_v34 = vsel %vm9879_vm12, 0, %v3741_v9  ;;  %v3799_v56 = vld [vmem:[#allocation2 + $0x5c] sm:$0x1]  ;;  %v5950_v61 = vsel %vm778_vm1, %v5948_v36, %v5949_v3  ;;  %v7660_v30 = vpack.c.bf16 %v3102_v25, %v3102_v25  ;;  %v3854_v22 = vld [vmem:[#allocation2 + $0x18] sm:$0xf]  ;;  %v2929_v36 = vpop.f32.mrf.mxu0 }
 0x1f5   : > { %3743 = vst [vmem:[#allocation2 + $0x48] sm:$0x1] %v3742_v34  ;;  %v3800_v6 = vsel %vm9915_vm14, 0, %v3799_v56  ;;  %v5696_v3 = vshll.u32 %v10033_v53, 16  ;;  %v7394_v1 = vcombine.low %v3900_v42, %v3855_v59  ;;  %v3100_v13 = vmax.f32 %v3064_v8, 0.0 }
 0x1f6   : > { %v4931_v0 = vsel %vm778_vm1, %v4929_v45, %v4930_v60  ;;  %3801 = vst [vmem:[#allocation2 + $0x5c] sm:$0x1] %v3800_v6  ;;  %v3103_v23 = vmax.f32 %v3067_v47, 0.0  ;;  %v4321_v35 = vrot.slane %v10097_v41, 1  ;;  %v7930_v60 = vpop.f32.mrf.mxu1  ;;  %v3385_v9 = vshrl.u32 %v7660_v30, 16  ;;  %5996 = vrot.lane.b32.xlu0 %v5950_v61, %s8471_s30 }
 0x1f7   : > { %v3796_v14 = vld [vmem:[#allocation2 + $0x50] sm:$0x1]  ;;  %4976 = vrot.lane.b32.xlu1 %v4931_v0, %s8471_s30  ;;  %v3388_v50 = vshll.u32 %v7660_v30, 16  ;;  %v5693_v45 = vrot.slane %v5691_v48, 1  ;;  %v5698_v12 = vrot.slane %v5696_v3, 1  ;;  %v7658_v2 = vpack.c.bf16 %v3100_v13, %v3100_v13 }
 0x1f8   : > { %v3797_v40 = vsel %vm9915_vm14, 0, %v3796_v14  ;;  %v7661_v53 = vpack.c.bf16 %v3103_v23, %v3103_v23  ;;  %v4320_v34 = vrot.slane %v7394_v1, 1  ;;  %v10117_v56 = vcombine.low %v3854_v22, %v3855_v59  ;;  %v3660_v6 = vld [vmem:[#allocation2 + $0x6c] sm:$0xf]  ;;  %v2026_v61 = vpop.f32.mrf.mxu1  ;;  %v3653_v1 = vld [vmem:[#allocation2 + $0x60] sm:$0xf] }
 0x1f9   : > { %3798 = vst [vmem:[#allocation2 + $0x50] sm:$0x1] %v3797_v40  ;;  %v3387_v25 = vrot.slane %v3385_v9, 7  ;;  %v5694_v0 = vor.u32 %v5693_v45, %v5689_v10  ;;  %v3022_v8 = vadd.f32 %v2929_v36, %v10083_v24  ;;  %v10121_v47 = vadd.f32 %v7930_v60, %v9829_v46  ;;  %v3664_v36 = vld [vmem:[#allocation2 + $0x74] sm:$0x1] }
 0x1fa   : > { %v3368_v42 = vshrl.u32 %v7658_v2, 16  ;;  %v3371_v14 = vshll.u32 %v7658_v2, 16  ;;  %v3393_v30 = vshrl.u32 %v7661_v53, 16  ;;  %v3396_v40 = vshll.u32 %v7661_v53, 16 }
 0x1fb   : > { %v3390_v48 = vor.u32 %v3388_v50, %v3387_v25  ;;  %v3391_v3 = vrot.slane %v3387_v25, 4  ;;  %v5699_v13 = vsel %vm471_vm2, %v5694_v0, %v5698_v12  ;;  %v4322_v59 = vsel %vm778_vm1, %v4320_v34, %v4321_v35 }
 0x1fc   : > { %v10125_v22 = vrot.slane %v3368_v42, 7  ;;  %v3395_v10 = vrot.slane %v3393_v30, 7  ;;  %5870 = vrot.lane.b32.xlu1 %v5699_v13, %s8472_s6  ;;  %4366 = vrot.lane.b32.xlu0 %v4322_v59, %s8471_s30  ;;  %v3065_v46 = vadd.f32 %v9864_v52, %v3022_v8  ;;  %v4079_v24 = vshrl.u32 %v10077_v18, 16  ;;  %v7931_v52 = vpop.f32.mrf.mxu1  ;;  %v7970_v13 = vpop.f32.mrf.mxu0 }
 0x1fd   : > { %v3661_v23 = vsel %vm9872_vm9, %v3390_v48, %v3660_v6  ;;  %v4081_v60 = vshll.u32 %v10077_v18, 16  ;;  %v4086_v35 = vshll.u32 %v10054_v63, 16  ;;  %v5677_v9 = vshrl.u32 %v10090_v27, 16 }
 0x1fe   : > { %3662 = vst [vmem:[#allocation2 + $0x6c] sm:$0xf] %v3661_v23  ;;  %v3373_v50 = vor.u32 %v3371_v14, %v10125_v22  ;;  %v3374_v45 = vrot.slane %v10125_v22, 4  ;;  %v3398_v12 = vor.u32 %v3396_v40, %v3395_v10  ;;  %v3400_v2 = vrot.slane %v3395_v10, 4  ;;  %v10189_v22 = vld [vmem:[%s11634_s2] ss:$0 sm:$0xff] }
 0x1ff   : > { %v3101_v53 = vmax.f32 %v3065_v46, 0.0  ;;  %v4083_v34 = vrot.slane %v4081_v60, 1  ;;  %v4088_v25 = vrot.slane %v4086_v35, 1  ;;  %v5679_v6 = vshll.u32 %v10090_v27, 16 }
 0x200   : > { %v3654_v0 = vsel %vm9872_vm9, %v3373_v50, %v3653_v1  ;;  %v3399_v63 = vsel %vm9887_vm13, %v3391_v3, %v3398_v12  ;;  %v3665_v8 = vsel %vm9879_vm12, %v3400_v2, %v3664_v36  ;;  %v5684_v42 = vshll.u32 %v10065_v20, 16  ;;  %v2029_v20 = vpop.f32.mrf.mxu1  ;;  %v10156_v35 = vld [vmem:[#allocation2 + $0x44] ss:$0 sps:$4 sm:$0x11]  }
 0x201   : > { %3655 = vst [vmem:[#allocation2 + $0x60] sm:$0xf] %v3654_v0  ;;  %3663 = vst.msk [vmem:[#allocation2 + $0x70] sm:$0xf] %vm3591_vm6, %v3399_v63  ;;  %v7659_v14 = vpack.c.bf16 %v3101_v53, %v3101_v53  ;;  %v4084_v30 = vor.u32 %v4083_v34, %v4079_v24  ;;  %v5681_v40 = vrot.slane %v5679_v6, 1  ;;  %v10148_v48 = vadd.f32 %v2026_v61, %v9831_v31  ;;  %v2942_v0 = vpop.f32.mrf.mxu0 }
 0x202   : > { %3666 = vst [vmem:[#allocation2 + $0x74] sm:$0x1] %v3665_v8  ;;  %v5686_v59 = vrot.slane %v5684_v42, 1  ;;  %v10151_v1 = vadd.f32 %v7931_v52, %v9833_v44  ;;  %v4667_v3 = vshrl.u32 %v10095_v11, 16  ;;  %v4669_v10 = vshll.u32 %v10095_v11, 16 }
 0x203   : > { %v3376_v46 = vshrl.u32 %v7659_v14, 16  ;;  %v3379_v23 = vshll.u32 %v7659_v14, 16  ;;  %v4089_v36 = vsel %vm471_vm2, %v4084_v30, %v4088_v25  ;;  %v5682_v60 = vor.u32 %v5681_v40, %v5677_v9  ;;  %v5491_v24 = vld [vmem:[#allocation2 + $0x40] sm:$0xf]  ;;  %v3657_v31 = vld [vmem:[#allocation2 + $0x68] sm:$0x1] }
 0x204   : > { %4240 = vrot.lane.b32.xlu1 %v4089_v36, %s8472_s6  ;;  %v4671_v61 = vrot.slane %v4669_v10, 1  ;;  %v4674_v44 = vshll.u32 %v10079_v55, 16  ;;  %v4067_v50 = vshrl.u32 %v10117_v56, 16  ;;  %v4069_v12 = vshll.u32 %v10117_v56, 16  ;;  %v5490_v25 = vld [vmem:[#allocation2 + $0x3c] sm:$0xf] }
 0x205   : > { %v3750_v2 = vld [vmem:[#allocation2 + $0x6c] sm:$0x1]  ;;  %v3378_v52 = vrot.slane %v3376_v46, 7  ;;  %v5687_v53 = vsel %vm471_vm2, %v5682_v60, %v5686_v59  ;;  %v4074_v34 = vshll.u32 %v10097_v41, 16  ;;  %v10165_v9 = vadd.f32 %v2029_v20, %v9835_v57  ;;  %v5535_v6 = vld [vmem:[#allocation2 + $0x3c] sm:$0xe] }
 0x206   : > { %v3751_v63 = vsel %vm9879_vm12, 0, %v3750_v2  ;;  %5868 = vrot.lane.b32.xlu0 %v5687_v53, %s8472_s6  ;;  %v4672_v55 = vor.u32 %v4671_v61, %v4667_v3  ;;  %v4676_v8 = vrot.slane %v4674_v44, 1  ;;  %v4071_v42 = vrot.slane %v4069_v12, 1  ;;  %v4470_v14 = vld [vmem:[#allocation2 + $0x3c] sm:$0xf] }
 0x207   : > { %v4471_v30 = vld [vmem:[#allocation2 + $0x40] sm:$0xf]  ;;  %3752 = vst [vmem:[#allocation2 + $0x6c] sm:$0x1] %v3751_v63  ;;  %v3381_v40 = vor.u32 %v3379_v23, %v3378_v52  ;;  %v3383_v59 = vrot.slane %v3378_v52, 4  ;;  %v4076_v41 = vrot.slane %v4074_v34, 1  ;;  %v3027_v57 = vadd.f32 %v7970_v13, %v10121_v47  ;;  %v7971_v23 = vpop.f32.mrf.mxu0 }
 0x208   : > { %v8324_v10 = vld [vmem:[#allocation2 + $0x44] ss:$0 sps:$4 sm:$0x11]   ;;  %v3747_v20 = vld [vmem:[#allocation2 + $0x60] sm:$0x1]  ;;  %v4677_v36 = vsel %vm471_vm2, %v4672_v55, %v4676_v8  ;;  %v4072_v60 = vor.u32 %v4071_v42, %v4067_v50  ;;  %v7527_v2 = vcombine.low %v5535_v6, %v5491_v24  ;;  %v5958_v53 = vrot.slane %v10156_v35, 1 }
 0x209   : > { %v3805_v46 = vld [vmem:[#allocation2 + $0x74] sm:$0x1]  ;;  %v3748_v3 = vsel %vm9879_vm12, 0, %v3747_v20  ;;  %v3382_v47 = vsel %vm9887_vm13, %v3374_v45, %v3381_v40  ;;  %v3658_v13 = vsel %vm9879_vm12, %v3383_v59, %v3657_v31  ;;  %4848 = vrot.lane.b32.xlu1 %v4677_v36, %s8472_s6  ;;  %v3070_v45 = vadd.f32 %v10189_v22, %v3027_v57  ;;  %v4514_v31 = vld [vmem:[#allocation2 + $0x3c] sm:$0xe] }
 0x20a   : > { %v3806_v61 = vsel %vm9915_vm14, 0, %v3805_v46  ;;  %3749 = vst [vmem:[#allocation2 + $0x60] sm:$0x1] %v3748_v3  ;;  %3656 = vst.msk [vmem:[#allocation2 + $0x64] sm:$0xf] %vm3591_vm6, %v3382_v47  ;;  %v4077_v44 = vsel %vm471_vm2, %v4072_v60, %v4076_v41  ;;  %v5957_v50 = vrot.slane %v7527_v2, 1  ;;  %v10192_v12 = vcombine.low %v5490_v25, %v5491_v24  ;;  %v2945_v60 = vpop.f32.mrf.mxu0  ;;  %v7934_v3 = vpop.f32.mrf.mxu1 }
 0x20b   : > { %3807 = vst [vmem:[#allocation2 + $0x74] sm:$0x1] %v3806_v61  ;;  %3659 = vst [vmem:[#allocation2 + $0x68] sm:$0x1] %v3658_v13  ;;  %v3861_v52 = vld [vmem:[#allocation2 + $0x40] sm:$0xf]  ;;  %4238 = vrot.lane.b32.xlu0 %v4077_v44, %s8472_s6  ;;  %v7444_v34 = vcombine.low %v4514_v31, %v4471_v30  ;;  %v10195_v63 = vcombine.low %v4470_v14, %v4471_v30  ;;  %v3025_v55 = vadd.f32 %v2942_v0, %v10148_v48 }
 0x20c   : > { %v4939_v6 = vrot.slane %v8324_v10, 1  ;;  %v10198_v8 = vld [vmem:[#allocation2 + $0x44] ss:$0 sps:$4 sm:$0x11]   ;;  %v3106_v42 = vmax.f32 %v3070_v45, 0.0  ;;  %v5959_v40 = vsel %vm778_vm1, %v5957_v50, %v5958_v53  ;;  %v3028_v59 = vadd.f32 %v7971_v23, %v10151_v1 }
 0x20d   : > { %v4710_v41 = vshll.u32 %v8324_v10, 16  ;;  %6002 = vrot.lane.b32.xlu1 %v5959_v40, %s8471_s30  ;;  %v4938_v24 = vrot.slane %v7444_v34, 1  ;;  %v3068_v25 = vadd.f32 %v10189_v22, %v3025_v55  ;;  %v4703_v57 = vshrl.u32 %v10195_v63, 16  ;;  %v3903_v30 = vld [vmem:[#allocation2 + $0x3c] sm:$0xe] }
 0x20e   : > { %v4705_v14 = vshll.u32 %v10195_v63, 16  ;;  %v7664_v20 = vpack.c.bf16 %v3106_v42, %v3106_v42  ;;  %v3071_v48 = vadd.f32 %v10189_v22, %v3028_v59  ;;  %v3860_v46 = vld [vmem:[#allocation2 + $0x3c] sm:$0xf]  ;;  %v7397_v36 = vcombine.low %v3903_v30, %v3861_v52  ;;  %v3674_v45 = vld [vmem:[#allocation2 + $0x84] sm:$0xf] }
 0x20f   : > { %v4712_v0 = vrot.slane %v4710_v41, 1  ;;  %v4940_v1 = vsel %vm778_vm1, %v4938_v24, %v4939_v6  ;;  %v3104_v10 = vmax.f32 %v3068_v25, 0.0  ;;  %v4330_v53 = vrot.slane %v10198_v8, 1  ;;  %v5489_v6 = vld [vmem:[#allocation2 + $0x34] sm:$0xf] }
 0x210   : > { %v4707_v2 = vrot.slane %v4705_v14, 1  ;;  %v3419_v61 = vshrl.u32 %v7664_v20, 16  ;;  %v3422_v47 = vshll.u32 %v7664_v20, 16  ;;  %4982 = vrot.lane.b32.xlu0 %v4940_v1, %s8471_s30  ;;  %v3107_v13 = vmax.f32 %v3071_v48, 0.0  ;;  %v2042_v20 = vpop.f32.mrf.mxu1 }
 0x211   : > { %v4329_v23 = vrot.slane %v7397_v36, 1  ;;  %v7662_v50 = vpack.c.bf16 %v3104_v10, %v3104_v10  ;;  %v10210_v34 = vcombine.low %v3860_v46, %v3861_v52  ;;  %v3026_v55 = vadd.f32 %v2945_v60, %v10165_v9  ;;  %v10216_v24 = vld [vmem:[#allocation2 + $0x38] ss:$0 sps:$4 sm:$0x11]   ;;  %v5488_v9 = vld [vmem:[#allocation2 + $0x30] sm:$0xf] }
 0x212   : > { %v3802_v44 = vld [vmem:[#allocation2 + $0x68] sm:$0x1]  ;;  %v4708_v31 = vor.u32 %v4707_v2, %v4703_v57  ;;  %v3421_v40 = vrot.slane %v3419_v61, 7  ;;  %v7665_v59 = vpack.c.bf16 %v3107_v13, %v3107_v13  ;;  %v5534_v57 = vld [vmem:[#allocation2 + $0x30] sm:$0xe] }
 0x213   : > { %v3803_v42 = vsel %vm9915_vm14, 0, %v3802_v44  ;;  %v4331_v41 = vsel %vm778_vm1, %v4329_v23, %v4330_v53  ;;  %v3402_v25 = vshrl.u32 %v7662_v50, 16  ;;  %v3405_v14 = vshll.u32 %v7662_v50, 16  ;;  %v10222_v1 = vld [vmem:[#allocation2 + $0x38] ss:$0 sps:$4 sm:$0x11]  }
 0x214   : > { %3804 = vst [vmem:[#allocation2 + $0x68] sm:$0x1] %v3803_v42  ;;  %v4713_v30 = vsel %vm471_vm2, %v4708_v31, %v4712_v0  ;;  %4372 = vrot.lane.b32.xlu1 %v4331_v41, %s8471_s30  ;;  %v3069_v52 = vadd.f32 %v10189_v22, %v3026_v55  ;;  %v3424_v48 = vor.u32 %v3422_v47, %v3421_v40  ;;  %v3425_v46 = vrot.slane %v3421_v40, 4  ;;  %v4469_v61 = vld [vmem:[#allocation2 + $0x34] sm:$0xf]  ;;  %v7935_v41 = vpop.f32.mrf.mxu1 }
 0x215   : > { %v3427_v36 = vshrl.u32 %v7665_v59, 16  ;;  %v3430_v60 = vshll.u32 %v7665_v59, 16  ;;  %4854 = vrot.lane.b32.xlu0 %v4713_v30, %s8472_s6  ;;  %v10224_v10 = vrot.slane %v3402_v25, 7  ;;  %v10227_v0 = vadd.f32 %v7934_v3, %v9837_v17  ;;  %v3667_v23 = vld [vmem:[#allocation2 + $0x78] sm:$0xf] }
 0x216   : > { %v3105_v2 = vmax.f32 %v3069_v52, 0.0  ;;  %v7526_v53 = vcombine.low %v5534_v57, %v5489_v6  ;;  %v3675_v13 = vsel %vm9872_vm9, %v3424_v48, %v3674_v45  ;;  %v3678_v44 = vld [vmem:[#allocation2 + $0x8c] sm:$0x1]  ;;  %v5955_v50 = vrot.slane %v10216_v24, 1  ;;  %v4468_v3 = vld [vmem:[#allocation2 + $0x30] sm:$0xf] }
 0x217   : > { %v3429_v47 = vrot.slane %v3427_v36, 7  ;;  %v10232_v31 = vcombine.low %v5488_v9, %v5489_v6  ;;  %3676 = vst [vmem:[#allocation2 + $0x84] sm:$0xf] %v3675_v13  ;;  %v3407_v55 = vor.u32 %v3405_v14, %v10224_v10  ;;  %v3408_v42 = vrot.slane %v10224_v10, 4  ;;  %v4513_v59 = vld [vmem:[#allocation2 + $0x30] sm:$0xe]  ;;  %v7974_v10 = vpop.f32.mrf.mxu0 }
 0x218   : > { %v7663_v40 = vpack.c.bf16 %v3105_v2, %v3105_v2  ;;  %v5954_v17 = vrot.slane %v7526_v53, 1  ;;  %v7443_v45 = vcombine.low %v4513_v59, %v4469_v61  ;;  %v4936_v52 = vrot.slane %v10222_v1, 1  ;;  %v3859_v57 = vld [vmem:[#allocation2 + $0x34] sm:$0xf]  ;;  %v3671_v59 = vld [vmem:[#allocation2 + $0x80] sm:$0x1] }
 0x219   : > { %v3432_v25 = vor.u32 %v3430_v60, %v3429_v47  ;;  %v3434_v30 = vrot.slane %v3429_v47, 4  ;;  %v3668_v6 = vsel %vm9872_vm9, %v3407_v55, %v3667_v23  ;;  %v10240_v36 = vld [vmem:[#allocation2 + $0x38] ss:$0 sps:$4 sm:$0x11]   ;;  %v10247_v13 = vcombine.low %v4468_v3, %v4469_v61  ;;  %v3858_v23 = vld [vmem:[#allocation2 + $0x30] sm:$0xf] }
 0x21a   : > { %v3410_v9 = vshrl.u32 %v7663_v40, 16  ;;  %v3413_v48 = vshll.u32 %v7663_v40, 16  ;;  %v5956_v14 = vsel %vm778_vm1, %v5954_v17, %v5955_v50  ;;  %3669 = vst [vmem:[#allocation2 + $0x78] sm:$0xf] %v3668_v6  ;;  %v4935_v53 = vrot.slane %v7443_v45, 1  ;;  %v2045_v17 = vpop.f32.mrf.mxu1 }
 0x21b   : > { %v3433_v2 = vsel %vm9887_vm13, %v3425_v46, %v3432_v25  ;;  %v3679_v60 = vsel %vm9879_vm12, %v3434_v30, %v3678_v44  ;;  %6000 = vrot.lane.b32.xlu0 %v5956_v14, %s8471_s30  ;;  %v2043_v50 = vadd.f32 %v2042_v20, %v9839_v16  ;;  %v2054_v55 = vadd.f32 %v7935_v41, %v9841_v7  ;;  %v3902_v46 = vld [vmem:[#allocation2 + $0x30] sm:$0xe]  ;;  %v2958_v7 = vpop.f32.mrf.mxu0 }
 0x21c   : > { %3677 = vst.msk [vmem:[#allocation2 + $0x88] sm:$0xf] %vm3591_vm6, %v3433_v2  ;;  %3680 = vst [vmem:[#allocation2 + $0x8c] sm:$0x1] %v3679_v60  ;;  %v3412_v47 = vrot.slane %v3410_v9, 7  ;;  %v5713_v40 = vshrl.u32 %v10192_v12, 16  ;;  %v4937_v44 = vsel %vm778_vm1, %v4935_v53, %v4936_v52  ;;  %v7396_v3 = vcombine.low %v3902_v46, %v3859_v57 }
 0x21d   : > { %v5715_v25 = vshll.u32 %v10192_v12, 16  ;;  %v5720_v61 = vshll.u32 %v10156_v35, 16  ;;  %4980 = vrot.lane.b32.xlu1 %v4937_v44, %s8471_s30  ;;  %v4327_v16 = vrot.slane %v10240_v36, 1  ;;  %v10258_v20 = vcombine.low %v3858_v23, %v3859_v57 }
 0x21e   : > { %v3415_v30 = vor.u32 %v3413_v48, %v3412_v47  ;;  %v3417_v45 = vrot.slane %v3412_v47, 4  ;;  %v3756_v41 = vld [vmem:[#allocation2 + $0x84] sm:$0x1]  ;;  %v4326_v14 = vrot.slane %v7396_v3, 1  ;;  %v10261_v52 = vadd.f32 %v2045_v17, %v9843_v38  ;;  %v7975_v17 = vpop.f32.mrf.mxu0 }
 0x21f   : > { %v5717_v6 = vrot.slane %v5715_v25, 1  ;;  %v5722_v9 = vrot.slane %v5720_v61, 1  ;;  %v3757_v35 = vsel %vm9879_vm12, 0, %v3756_v41  ;;  %v3031_v57 = vadd.f32 %v7974_v10, %v10227_v0 }
 0x220   : > { %v3416_v48 = vsel %vm9887_vm13, %v3408_v42, %v3415_v30  ;;  %v3672_v2 = vsel %vm9879_vm12, %v3417_v45, %v3671_v59  ;;  %3758 = vst [vmem:[#allocation2 + $0x84] sm:$0x1] %v3757_v35  ;;  %v4328_v53 = vsel %vm778_vm1, %v4326_v14, %v4327_v16  ;;  %v4103_v38 = vshrl.u32 %v10210_v34, 16 }
 0x221   : > { %3670 = vst.msk [vmem:[#allocation2 + $0x7c] sm:$0xf] %vm3591_vm6, %v3416_v48  ;;  %3673 = vst [vmem:[#allocation2 + $0x80] sm:$0x1] %v3672_v2  ;;  %v5718_v60 = vor.u32 %v5717_v6, %v5713_v40  ;;  %v4105_v23 = vshll.u32 %v10210_v34, 16  ;;  %4370 = vrot.lane.b32.xlu0 %v4328_v53, %s8471_s30  ;;  %v3074_v42 = vadd.f32 %v10189_v22, %v3031_v57  ;;  %v4110_v46 = vshll.u32 %v10198_v8, 16 }
 0x222   : > { %v3753_v47 = vld [vmem:[#allocation2 + $0x78] sm:$0x1]  ;;  %v5701_v0 = vshrl.u32 %v10232_v31, 16  ;;  %v5703_v10 = vshll.u32 %v10232_v31, 16  ;;  %v5708_v61 = vshll.u32 %v10216_v24, 16  ;;  %v3029_v6 = vadd.f32 %v2958_v7, %v2043_v50 }
 0x223   : > { %v3754_v40 = vsel %vm9879_vm12, 0, %v3753_v47  ;;  %v3811_v59 = vld [vmem:[#allocation2 + $0x8c] sm:$0x1]  ;;  %v5723_v44 = vsel %vm471_vm2, %v5718_v60, %v5722_v9  ;;  %v4107_v25 = vrot.slane %v4105_v23, 1  ;;  %v3110_v8 = vmax.f32 %v3074_v42, 0.0  ;;  %v2961_v42 = vpop.f32.mrf.mxu0 }
 0x224   : > { %3755 = vst [vmem:[#allocation2 + $0x78] sm:$0x1] %v3754_v40  ;;  %v3812_v3 = vsel %vm9915_vm14, 0, %v3811_v59  ;;  %5874 = vrot.lane.b32.xlu1 %v5723_v44, %s8472_s6  ;;  %v4112_v30 = vrot.slane %v4110_v46, 1  ;;  %v5705_v45 = vrot.slane %v5703_v10, 1  ;;  %v5710_v41 = vrot.slane %v5708_v61, 1  ;;  %v7938_v61 = vpop.f32.mrf.mxu1 }
 0x225   : > { %3813 = vst [vmem:[#allocation2 + $0x8c] sm:$0x1] %v3812_v3  ;;  %v4108_v16 = vor.u32 %v4107_v25, %v4103_v38  ;;  %v3032_v14 = vadd.f32 %v7975_v17, %v2054_v55  ;;  %v7668_v35 = vpack.c.bf16 %v3110_v8, %v3110_v8  ;;  %v4691_v9 = vshrl.u32 %v10247_v13, 16  ;;  %v8385_v2 = vld [vmem:[%s11635_s3 + $0x14] ss:$0 sps:$4 sm:$0xff]  }
 0x226   : > { %v5706_v48 = vor.u32 %v5705_v45, %v5701_v0  ;;  %v4693_v24 = vshll.u32 %v10247_v13, 16  ;;  %v3072_v60 = vadd.f32 %v10189_v22, %v3029_v6  ;;  %v4698_v38 = vshll.u32 %v10222_v1, 16  ;;  %8095 = vmatprep.subr.msk.bf16.mxu1 %vm1683_vm0, %v8385_v2  ;;  %v3688_v40 = vld [vmem:[#allocation2 + $0x9c] sm:$0xf]  ;;  %v4483_v18 = vld [vmem:[#allocation2 + $0x88] sm:$0xf] }
 0x227   : > { %v4113_v57 = vsel %vm471_vm2, %v4108_v16, %v4112_v30  ;;  %v3075_v53 = vadd.f32 %v10189_v22, %v3032_v14  ;;  %v3453_v55 = vshrl.u32 %v7668_v35, 16  ;;  %v3456_v7 = vshll.u32 %v7668_v35, 16  ;;  %v10305_v16 = vld [vmem:[#allocation2 + $0x5c] ss:$0 sps:$4 sm:$0x11]  }
 0x228   : > { %v3808_v50 = vld [vmem:[#allocation2 + $0x80] sm:$0x1]  ;;  %4244 = vrot.lane.b32.xlu1 %v4113_v57, %s8472_s6  ;;  %v5711_v23 = vsel %vm471_vm2, %v5706_v48, %v5710_v41  ;;  %v4695_v47 = vrot.slane %v4693_v24, 1  ;;  %v3108_v0 = vmax.f32 %v3072_v60, 0.0  ;;  %v4700_v17 = vrot.slane %v4698_v38, 1 }
 0x229   : > { %v3809_v46 = vsel %vm9915_vm14, 0, %v3808_v50  ;;  %5872 = vrot.lane.b32.xlu0 %v5711_v23, %s8472_s6  ;;  %v3111_v10 = vmax.f32 %v3075_v53, 0.0  ;;  %v3455_v1 = vrot.slane %v3453_v55, 7  ;;  %v4091_v44 = vshrl.u32 %v10258_v20, 16  ;;  %v5495_v48 = vld [vmem:[#allocation2 + $0x58] sm:$0xf]  ;;  %v2058_v23 = vpop.f32.mrf.mxu1 }
 0x22a   : > { %3810 = vst [vmem:[#allocation2 + $0x80] sm:$0x1] %v3809_v46  ;;  %v4696_v59 = vor.u32 %v4695_v47, %v4691_v9  ;;  %v4093_v25 = vshll.u32 %v10258_v20, 16  ;;  %v7666_v3 = vpack.c.bf16 %v3108_v0, %v3108_v0  ;;  %v4098_v30 = vshll.u32 %v10240_v36, 16  ;;  %v5494_v60 = vld [vmem:[#allocation2 + $0x54] sm:$0xf] }
 0x22b   : > { %v7669_v8 = vpack.c.bf16 %v3111_v10, %v3111_v10  ;;  %v3030_v45 = vadd.f32 %v2961_v42, %v10261_v52  ;;  %v3458_v41 = vor.u32 %v3456_v7, %v3455_v1  ;;  %v3459_v6 = vrot.slane %v3455_v1, 4  ;;  %v3681_v53 = vld [vmem:[#allocation2 + $0x90] sm:$0xf]  ;;  %v5537_v55 = vld [vmem:[#allocation2 + $0x54] sm:$0xe] }
 0x22c   : > { %v4701_v14 = vsel %vm471_vm2, %v4696_v59, %v4700_v17  ;;  %v4095_v35 = vrot.slane %v4093_v25, 1  ;;  %v3436_v9 = vshrl.u32 %v7666_v3, 16  ;;  %v3439_v24 = vshll.u32 %v7666_v3, 16  ;;  %v10312_v7 = vld [vmem:[#allocation2 + $0x5c] ss:$0 sps:$4 sm:$0x11]  }
 0x22d   : > { %v3461_v2 = vshrl.u32 %v7669_v8, 16  ;;  %v3464_v57 = vshll.u32 %v7669_v8, 16  ;;  %4852 = vrot.lane.b32.xlu1 %v4701_v14, %s8472_s6  ;;  %v3689_v36 = vsel %vm9872_vm9, %v3458_v41, %v3688_v40  ;;  %v4100_v38 = vrot.slane %v4098_v30, 1  ;;  %v3692_v46 = vld [vmem:[#allocation2 + $0xa4] sm:$0x1] }
 0x22e   : > { %v4096_v52 = vor.u32 %v4095_v35, %v4091_v44  ;;  %v3073_v50 = vadd.f32 %v10189_v22, %v3030_v45  ;;  %3690 = vst [vmem:[#allocation2 + $0x9c] sm:$0xf] %v3689_v36  ;;  %v10314_v47 = vrot.slane %v3436_v9, 7  ;;  %v10317_v0 = vadd.f32 %v7938_v61, %v9845_v33  ;;  %v4475_v17 = vld [vmem:[#allocation2 + $0x58] sm:$0xf]  ;;  %v7939_v9 = vpop.f32.mrf.mxu1 }
 0x22f   : > { %v3463_v42 = vrot.slane %v3461_v2, 7  ;;  %v7529_v10 = vcombine.low %v5537_v55, %v5495_v48  ;;  %v5964_v59 = vrot.slane %v10305_v16, 1  ;;  %v10321_v44 = vcombine.low %v5494_v60, %v5495_v48  ;;  %v4474_v25 = vld [vmem:[#allocation2 + $0x54] sm:$0xf]  ;;  %v3865_v36 = vld [vmem:[#allocation2 + $0x58] sm:$0xf] }
 0x230   : > { %v4101_v1 = vsel %vm471_vm2, %v4096_v52, %v4100_v38  ;;  %v3109_v40 = vmax.f32 %v3073_v50, 0.0  ;;  %v4516_v3 = vld [vmem:[#allocation2 + $0x54] sm:$0xe]  ;;  %v3441_v8 = vor.u32 %v3439_v24, %v10314_v47  ;;  %v3442_v30 = vrot.slane %v10314_v47, 4  ;;  %v7978_v38 = vpop.f32.mrf.mxu0  ;;  %v8396_v50 = vld [vmem:[%s11635_s3 + $0x20] ss:$0 sps:$4 sm:$0xff]  }
 0x231   : > { %v3466_v45 = vor.u32 %v3464_v57, %v3463_v42  ;;  %v3468_v41 = vrot.slane %v3463_v42, 4  ;;  %4242 = vrot.lane.b32.xlu0 %v4101_v1, %s8472_s6  ;;  %v5963_v61 = vrot.slane %v7529_v10, 1  ;;  %v7446_v14 = vcombine.low %v4516_v3, %v4475_v17  ;;  %v3864_v2 = vld [vmem:[#allocation2 + $0x54] sm:$0xf]  ;;  %8097 = vmatprep.subr.msk.bf16.mxu0 %vm1683_vm0, %v8396_v50 }
 0x232   : > { %v7667_v33 = vpack.c.bf16 %v3109_v40, %v3109_v40  ;;  %v4945_v35 = vrot.slane %v10312_v7, 1  ;;  %v3682_v48 = vsel %vm9872_vm9, %v3441_v8, %v3681_v53  ;;  %v10333_v60 = vcombine.low %v4474_v25, %v4475_v17  ;;  %v10335_v52 = vld [vmem:[#allocation2 + $0x5c] ss:$0 sps:$4 sm:$0x11]   ;;  %v3905_v25 = vld [vmem:[#allocation2 + $0x54] sm:$0xe] }
 0x233   : > { %v3467_v24 = vsel %vm9887_vm13, %v3459_v6, %v3466_v45  ;;  %v3693_v57 = vsel %vm9879_vm12, %v3468_v41, %v3692_v46  ;;  %3683 = vst [vmem:[#allocation2 + $0x90] sm:$0xf] %v3682_v48  ;;  %v5965_v6 = vsel %vm778_vm1, %v5963_v61, %v5964_v59  ;;  %v4944_v47 = vrot.slane %v7446_v14, 1  ;;  %v10342_v42 = vld [vmem:[#allocation2 + $0x50] ss:$0 sps:$4 sm:$0x11]  }
 0x234   : > { %3691 = vst.msk [vmem:[#allocation2 + $0xa0] sm:$0xf] %vm3591_vm6, %v3467_v24  ;;  %3694 = vst [vmem:[#allocation2 + $0xa4] sm:$0x1] %v3693_v57  ;;  %v3444_v53 = vshrl.u32 %v7667_v33, 16  ;;  %v3447_v55 = vshll.u32 %v7667_v33, 16  ;;  %6006 = vrot.lane.b32.xlu1 %v5965_v6, %s8471_s30  ;;  %v2059_v10 = vadd.f32 %v2058_v23, %v9847_v21  ;;  %v2070_v17 = vadd.f32 %v7939_v9, %v9849_v19  ;;  %v2061_v33 = vpop.f32.mrf.mxu1  ;;  %v2974_v24 = vpop.f32.mrf.mxu0 }
 0x235   : > { %v3685_v46 = vld [vmem:[#allocation2 + $0x98] sm:$0x1]  ;;  %v4727_v1 = vshrl.u32 %v10333_v60, 16  ;;  %v4729_v40 = vshll.u32 %v10333_v60, 16  ;;  %v3762_v3 = vld [vmem:[#allocation2 + $0x9c] sm:$0x1]  ;;  %v4946_v59 = vsel %vm778_vm1, %v4944_v47, %v4945_v35  ;;  %v7399_v41 = vcombine.low %v3905_v25, %v3865_v36 }
 0x236   : > { %v3446_v8 = vrot.slane %v3444_v53, 7  ;;  %v4734_v45 = vshll.u32 %v10312_v7, 16  ;;  %v5492_v61 = vld [vmem:[#allocation2 + $0x48] sm:$0xf]  ;;  %v5493_v14 = vld [vmem:[#allocation2 + $0x4c] sm:$0xf]  ;;  %4986 = vrot.lane.b32.xlu0 %v4946_v59, %s8471_s30  ;;  %v10356_v9 = vcombine.low %v3864_v2, %v3865_v36  ;;  %v10361_v47 = vadd.f32 %v2061_v33, %v9851_v37 }
 0x237   : > { %v3763_v21 = vsel %vm9879_vm12, 0, %v3762_v3  ;;  %v4731_v19 = vrot.slane %v4729_v40, 1  ;;  %v4336_v23 = vrot.slane %v10335_v52, 1  ;;  %v5536_v48 = vld [vmem:[#allocation2 + $0x48] sm:$0xe]  ;;  %v4335_v50 = vrot.slane %v7399_v41, 1 }
 0x238   : > { %3764 = vst [vmem:[#allocation2 + $0x9c] sm:$0x1] %v3763_v21  ;;  %v3449_v35 = vor.u32 %v3447_v55, %v3446_v8  ;;  %v3451_v57 = vrot.slane %v3446_v8, 4  ;;  %v4736_v7 = vrot.slane %v4734_v45, 1  ;;  %v3035_v25 = vadd.f32 %v7978_v38, %v10317_v0  ;;  %v4472_v3 = vld [vmem:[#allocation2 + $0x48] sm:$0xf] }
 0x239   : > { %v10358_v53 = vld [vmem:[#allocation2 + $0x50] ss:$0 sps:$4 sm:$0x11]   ;;  %v4732_v6 = vor.u32 %v4731_v19, %v4727_v1  ;;  %v7528_v40 = vcombine.low %v5536_v48, %v5493_v14  ;;  %v4473_v59 = vld [vmem:[#allocation2 + $0x4c] sm:$0xf]  ;;  %v4337_v55 = vsel %vm778_vm1, %v4335_v50, %v4336_v23  ;;  %v5961_v8 = vrot.slane %v10342_v42, 1 }
 0x23a   : > { %v3450_v2 = vsel %vm9887_vm13, %v3442_v30, %v3449_v35  ;;  %v3686_v36 = vsel %vm9879_vm12, %v3451_v57, %v3685_v46  ;;  %v4515_v45 = vld [vmem:[#allocation2 + $0x48] sm:$0xe]  ;;  %v3863_v1 = vld [vmem:[#allocation2 + $0x4c] sm:$0xf]  ;;  %v3759_v41 = vld [vmem:[#allocation2 + $0x90] sm:$0x1]  ;;  %4376 = vrot.lane.b32.xlu1 %v4337_v55, %s8471_s30  ;;  %v3078_v30 = vadd.f32 %v10189_v22, %v3035_v25  ;;  %v10374_v33 = vcombine.low %v5492_v61, %v5493_v14  ;;  %v7979_v46 = vpop.f32.mrf.mxu0 }
 0x23b   : > { %v3817_v37 = vld [vmem:[#allocation2 + $0xa4] sm:$0x1]  ;;  %3684 = vst.msk [vmem:[#allocation2 + $0x94] sm:$0xf] %vm3591_vm6, %v3450_v2  ;;  %3687 = vst [vmem:[#allocation2 + $0x98] sm:$0x1] %v3686_v36  ;;  %v4737_v0 = vsel %vm471_vm2, %v4732_v6, %v4736_v7  ;;  %v7445_v23 = vcombine.low %v4515_v45, %v4473_v59  ;;  %v10385_v14 = vcombine.low %v4472_v3, %v4473_v59 }
 0x23c   : > { %v5960_v38 = vrot.slane %v7528_v40, 1  ;;  %v3760_v21 = vsel %vm9879_vm12, 0, %v3759_v41  ;;  %v3818_v19 = vsel %vm9915_vm14, 0, %v3817_v37  ;;  %4858 = vrot.lane.b32.xlu0 %v4737_v0, %s8472_s6  ;;  %v4942_v48 = vrot.slane %v10358_v53, 1  ;;  %v3904_v2 = vld [vmem:[#allocation2 + $0x48] sm:$0xe]  ;;  %v2977_v59 = vpop.f32.mrf.mxu0 }
 0x23d   : > { %v10382_v35 = vld [vmem:[#allocation2 + $0x50] ss:$0 sps:$4 sm:$0x11]   ;;  %3761 = vst [vmem:[#allocation2 + $0x90] sm:$0x1] %v3760_v21  ;;  %v3114_v57 = vmax.f32 %v3078_v30, 0.0  ;;  %v3033_v7 = vadd.f32 %v2974_v24, %v2059_v10  ;;  %v3036_v6 = vadd.f32 %v7979_v46, %v2070_v17  ;;  %v7398_v37 = vcombine.low %v3904_v2, %v3863_v1  ;;  %v7942_v46 = vpop.f32.mrf.mxu1 }
 0x23e   : > { %3819 = vst [vmem:[#allocation2 + $0xa4] sm:$0x1] %v3818_v19  ;;  %v5962_v61 = vsel %vm778_vm1, %v5960_v38, %v5961_v8  ;;  %v4941_v50 = vrot.slane %v7445_v23, 1  ;;  %v5737_v25 = vshrl.u32 %v10321_v44, 16  ;;  %v5739_v40 = vshll.u32 %v10321_v44, 16 }
 0x23f   : > { %v7672_v36 = vpack.c.bf16 %v3114_v57, %v3114_v57  ;;  %v3076_v55 = vadd.f32 %v10189_v22, %v3033_v7  ;;  %v5744_v45 = vshll.u32 %v10305_v16, 16  ;;  %v3862_v41 = vld [vmem:[#allocation2 + $0x48] sm:$0xf]  ;;  %v3079_v10 = vadd.f32 %v10189_v22, %v3036_v6  ;;  %v3702_v6 = vld [vmem:[#allocation2 + $0xb4] sm:$0xf] }
 0x240   : > { %6004 = vrot.lane.b32.xlu0 %v5962_v61, %s8471_s30  ;;  %v4943_v3 = vsel %vm778_vm1, %v4941_v50, %v4942_v48  ;;  %v5741_v24 = vrot.slane %v5739_v40, 1  ;;  %v4333_v17 = vrot.slane %v10382_v35, 1  ;;  %v4332_v23 = vrot.slane %v7398_v37, 1 }
 0x241   : > { %v3487_v8 = vshrl.u32 %v7672_v36, 16  ;;  %v3490_v0 = vshll.u32 %v7672_v36, 16  ;;  %4984 = vrot.lane.b32.xlu1 %v4943_v3, %s8471_s30  ;;  %v3112_v30 = vmax.f32 %v3076_v55, 0.0  ;;  %v5746_v38 = vrot.slane %v5744_v45, 1 }
 0x242   : > { %v3814_v16 = vld [vmem:[#allocation2 + $0x98] sm:$0x1]  ;;  %v3115_v21 = vmax.f32 %v3079_v10, 0.0  ;;  %v5742_v19 = vor.u32 %v5741_v24, %v5737_v25  ;;  %v10396_v57 = vcombine.low %v3862_v41, %v3863_v1  ;;  %v3034_v50 = vadd.f32 %v2977_v59, %v10361_v47  ;;  %v2074_v24 = vpop.f32.mrf.mxu1  ;;  %v3695_v59 = vld [vmem:[#allocation2 + $0xa8] sm:$0xf] }
 0x243   : > { %v3815_v48 = vsel %vm9915_vm14, 0, %v3814_v16  ;;  %v3489_v61 = vrot.slane %v3487_v8, 7  ;;  %v7670_v7 = vpack.c.bf16 %v3112_v30, %v3112_v30  ;;  %v4334_v36 = vsel %vm778_vm1, %v4332_v23, %v4333_v17 }
 0x244   : > { %3816 = vst [vmem:[#allocation2 + $0x98] sm:$0x1] %v3815_v48  ;;  %v7673_v40 = vpack.c.bf16 %v3115_v21, %v3115_v21  ;;  %v5747_v2 = vsel %vm471_vm2, %v5742_v19, %v5746_v38  ;;  %v10404_v55 = vadd.f32 %v7942_v46, %v9853_v58  ;;  %4374 = vrot.lane.b32.xlu0 %v4334_v36, %s8471_s30  ;;  %v4127_v10 = vshrl.u32 %v10356_v9, 16  ;;  %v3706_v38 = vld [vmem:[#allocation2 + $0xbc] sm:$0x1] }
 0x245   : > { %v3492_v25 = vor.u32 %v3490_v0, %v3489_v61  ;;  %v3493_v1 = vrot.slane %v3489_v61, 4  ;;  %v3470_v45 = vshrl.u32 %v7670_v7, 16  ;;  %v3473_v41 = vshll.u32 %v7670_v7, 16  ;;  %5878 = vrot.lane.b32.xlu1 %v5747_v2, %s8472_s6  ;;  %v7943_v2 = vpop.f32.mrf.mxu1 }
 0x246   : > { %v3495_v37 = vshrl.u32 %v7673_v40, 16  ;;  %v3498_v47 = vshll.u32 %v7673_v40, 16  ;;  %v3077_v3 = vadd.f32 %v10189_v22, %v3034_v50  ;;  %v4129_v8 = vshll.u32 %v10356_v9, 16 }
 0x247   : > { %v3703_v17 = vsel %vm9872_vm9, %v3492_v25, %v3702_v6  ;;  %v10412_v58 = vrot.slane %v3470_v45, 7  ;;  %v4134_v0 = vshll.u32 %v10335_v52, 16  ;;  %v5725_v16 = vshrl.u32 %v10374_v33, 16  ;;  %v10420_v52 = vpop.permute.xlu0 %4974 }
 0x248   : > { %3704 = vst [vmem:[#allocation2 + $0xb4] sm:$0xf] %v3703_v17  ;;  %v3497_v30 = vrot.slane %v3495_v37, 7  ;;  %v3113_v46 = vmax.f32 %v3077_v3, 0.0  ;;  %v5727_v21 = vshll.u32 %v10374_v33, 16  ;;  %v4131_v48 = vrot.slane %v4129_v8, 1 }
 0x249   : > { %v3475_v19 = vor.u32 %v3473_v41, %v10412_v58  ;;  %v3476_v23 = vrot.slane %v10412_v58, 4  ;;  %v4136_v61 = vrot.slane %v4134_v0, 1  ;;  %v5732_v45 = vshll.u32 %v10342_v42, 16  ;;  %v7982_v58 = vpop.f32.mrf.mxu0 }
 0x24a   : > { %v3500_v7 = vor.u32 %v3498_v47, %v3497_v30  ;;  %v3502_v50 = vrot.slane %v3497_v30, 4  ;;  %v7671_v6 = vpack.c.bf16 %v3113_v46, %v3113_v46  ;;  %v5729_v40 = vrot.slane %v5727_v21, 1  ;;  %v2077_v46 = vpop.f32.mrf.mxu1  ;;  %v4478_v21 = vld [vmem:[#allocation2 + $0x6c] sm:$0xf] }
 0x24b   : > { %v3696_v36 = vsel %vm9872_vm9, %v3475_v19, %v3695_v59  ;;  %v4132_v25 = vor.u32 %v4131_v48, %v4127_v10  ;;  %v10426_v37 = vadd.f32 %v2074_v24, %v9855_v26  ;;  %v3699_v59 = vld [vmem:[#allocation2 + $0xb0] sm:$0x1]  ;;  %v5734_v8 = vrot.slane %v5732_v45, 1  ;;  %v10437_v24 = vld [vmem:[#allocation2 + $0x74] ss:$0 sps:$4 sm:$0x11]  }
 0x24c   : > { %3697 = vst [vmem:[#allocation2 + $0xa8] sm:$0xf] %v3696_v36  ;;  %v3501_v41 = vsel %vm9887_vm13, %v3493_v1, %v3500_v7  ;;  %v3707_v47 = vsel %vm9879_vm12, %v3502_v50, %v3706_v38  ;;  %v3478_v3 = vshrl.u32 %v7671_v6, 16  ;;  %v3481_v17 = vshll.u32 %v7671_v6, 16  ;;  %v4479_v19 = vld [vmem:[#allocation2 + $0x70] sm:$0xf]  ;;  %v2990_v36 = vpop.f32.mrf.mxu0 }
 0x24d   : > { %3705 = vst.msk [vmem:[#allocation2 + $0xb8] sm:$0xf] %vm3591_vm6, %v3501_v41  ;;  %3708 = vst [vmem:[#allocation2 + $0xbc] sm:$0x1] %v3707_v47  ;;  %v4137_v10 = vsel %vm471_vm2, %v4132_v25, %v4136_v61  ;;  %v5730_v42 = vor.u32 %v5729_v40, %v5725_v16  ;;  %v10435_v26 = vadd.f32 %v7943_v2, %v9857_v43  ;;  %v4715_v0 = vshrl.u32 %v10385_v14, 16  ;;  %v10450_v25 = vpop.permute.xlu0 %4846 }
 0x24e   : > { %v3480_v1 = vrot.slane %v3478_v3, 7  ;;  %4248 = vrot.lane.b32.xlu1 %v4137_v10, %s8472_s6  ;;  %v4717_v30 = vshll.u32 %v10385_v14, 16  ;;  %v4722_v38 = vshll.u32 %v10358_v53, 16  ;;  %v4115_v43 = vshrl.u32 %v10396_v57, 16  ;;  %v4477_v2 = vld [vmem:[#allocation2 + $0x64] sm:$0xf] }
 0x24f   : > { %v3768_v48 = vld [vmem:[#allocation2 + $0xb4] sm:$0x1]  ;;  %v5735_v16 = vsel %vm471_vm2, %v5730_v42, %v5734_v8  ;;  %v4117_v61 = vshll.u32 %v10396_v57, 16  ;;  %v4122_v7 = vshll.u32 %v10382_v35, 16  ;;  %v10453_v3 = vadd.f32 %v2077_v46, %v9859_v62 }
 0x250   : > { %v3769_v50 = vsel %vm9879_vm12, 0, %v3768_v48  ;;  %v3483_v6 = vor.u32 %v3481_v17, %v3480_v1  ;;  %v3485_v40 = vrot.slane %v3480_v1, 4  ;;  %5876 = vrot.lane.b32.xlu0 %v5735_v16, %s8472_s6  ;;  %v4719_v53 = vrot.slane %v4717_v30, 1  ;;  %v10455_v35 = vld [vmem:[#allocation2 + $0x68] ss:$0 sps:$4 sm:$0x11]  }
 0x251   : > { %3770 = vst [vmem:[#allocation2 + $0xb4] sm:$0x1] %v3769_v50  ;;  %v4724_v45 = vrot.slane %v4722_v38, 1  ;;  %v4119_v41 = vrot.slane %v4117_v61, 1  ;;  %v4124_v47 = vrot.slane %v4122_v7, 1  ;;  %v3039_v8 = vadd.f32 %v7982_v58, %v10404_v55  ;;  %v7983_v7 = vpop.f32.mrf.mxu0 }
 0x252   : > { %v3484_v17 = vsel %vm9887_vm13, %v3476_v23, %v3483_v6  ;;  %v3700_v10 = vsel %vm9879_vm12, %v3485_v40, %v3699_v59  ;;  %v4720_v42 = vor.u32 %v4719_v53, %v4715_v0  ;;  %v4518_v1 = vld [vmem:[#allocation2 + $0x6c] sm:$0xe]  ;;  %v4476_v30 = vld [vmem:[#allocation2 + $0x60] sm:$0xf]  ;;  %v4951_v46 = vrot.slane %v10437_v24, 1 }
 0x253   : > { %v3765_v48 = vld [vmem:[#allocation2 + $0xa8] sm:$0x1]  ;;  %3698 = vst.msk [vmem:[#allocation2 + $0xac] sm:$0xf] %vm3591_vm6, %v3484_v17  ;;  %3701 = vst [vmem:[#allocation2 + $0xb0] sm:$0x1] %v3700_v10  ;;  %v4120_v38 = vor.u32 %v4119_v41, %v4115_v43  ;;  %v7448_v62 = vcombine.low %v4518_v1, %v4479_v19  ;;  %v10464_v16 = vcombine.low %v4478_v21, %v4479_v19  ;;  %v10481_v10 = vpop.permute.xlu1 %4364 }
 0x254   : > { %v4517_v61 = vld [vmem:[#allocation2 + $0x60] sm:$0xe]  ;;  %v3766_v23 = vsel %vm9879_vm12, 0, %v3765_v48  ;;  %v3823_v59 = vld [vmem:[#allocation2 + $0xbc] sm:$0x1]  ;;  %v4725_v0 = vsel %vm471_vm2, %v4720_v42, %v4724_v45  ;;  %v3082_v55 = vadd.f32 %v10189_v22, %v3039_v8  ;;  %v4948_v50 = vrot.slane %v10455_v35, 1  ;;  %v10483_v42 = vpop.permute.xlu0 %4362 }
 0x255   : > { %v7447_v58 = vcombine.low %v4517_v61, %v4477_v2  ;;  %3767 = vst [vmem:[#allocation2 + $0xa8] sm:$0x1] %v3766_v23  ;;  %v3824_v43 = vsel %vm9915_vm14, 0, %v3823_v59  ;;  %4856 = vrot.lane.b32.xlu1 %v4725_v0, %s8472_s6  ;;  %v4125_v21 = vsel %vm471_vm2, %v4120_v38, %v4124_v47  ;;  %v4950_v19 = vrot.slane %v7448_v62, 1  ;;  %v5498_v17 = vld [vmem:[#allocation2 + $0x6c] sm:$0xf] }
 0x256   : > { %v10475_v6 = vld [vmem:[#allocation2 + $0x74] ss:$0 sps:$4 sm:$0x11]   ;;  %3825 = vst [vmem:[#allocation2 + $0xbc] sm:$0x1] %v3824_v43  ;;  %4246 = vrot.lane.b32.xlu0 %v4125_v21, %s8472_s6  ;;  %v3118_v40 = vmax.f32 %v3082_v55, 0.0  ;;  %v10478_v45 = vcombine.low %v4476_v30, %v4477_v2  ;;  %v3037_v41 = vadd.f32 %v2990_v36, %v10426_v37  ;;  %v3040_v8 = vadd.f32 %v7983_v7, %v10435_v26  ;;  %v2993_v7 = vpop.f32.mrf.mxu0 }
 0x257   : > { %v4947_v53 = vrot.slane %v7447_v58, 1  ;;  %11684 = vst [vmem:[#allocation6_spill] sm:$0xff] %v10483_v42  ;;  %v4952_v47 = vsel %vm778_vm1, %v4950_v19, %v4951_v46  ;;  %v4751_v1 = vshrl.u32 %v10464_v16, 16  ;;  %v4753_v48 = vshll.u32 %v10464_v16, 16  ;;  %v10492_v36 = vld [vmem:[#allocation2 + $0x70] sm:$0xf] }
 0x258   : > { %11683 = vst [vmem:[#allocation5_spill] sm:$0xff] %v10478_v45  ;;  %v7676_v38 = vpack.c.bf16 %v3118_v40, %v3118_v40  ;;  %v3080_v2 = vadd.f32 %v10189_v22, %v3037_v41  ;;  %v4758_v37 = vshll.u32 %v10437_v24, 16  ;;  %v3083_v30 = vadd.f32 %v10189_v22, %v3040_v8  ;;  %v5496_v23 = vld [vmem:[#allocation2 + $0x60] sm:$0xf]  ;;  %v3716_v21 = vld [vmem:[#allocation2 + $0xcc] sm:$0xf] }
 0x259   : > { %v4949_v62 = vsel %vm778_vm1, %v4947_v53, %v4948_v50  ;;  %v4755_v46 = vrot.slane %v4753_v48, 1  ;;  %v10497_v26 = vcombine.low %v5498_v17, %v10492_v36  ;;  %v5768_v61 = vshll.u32 %v10475_v6, 16  ;;  %v10505_v8 = vld [vmem:[#allocation2 + $0x64] sm:$0xf]  ;;  %v10509_v48 = vpop.permute.xlu0 %4234  ;;  %v4523_v49 = vld [vmem:[#allocation2 + $0xa8] sm:$0xe] }
 0x25a   : > { %4988 = vrot.lane.b32.xlu1 %v4949_v62, %s8471_s30  ;;  %v3820_v59 = vld [vmem:[#allocation2 + $0xb0] sm:$0x1]  ;;  %v3521_v0 = vshrl.u32 %v7676_v38, 16  ;;  %v3524_v55 = vshll.u32 %v7676_v38, 16  ;;  %4990 = vrot.lane.b32.xlu0 %v4952_v47, %s8471_s30  ;;  %v3116_v58 = vmax.f32 %v3080_v2, 0.0  ;;  %v4760_v24 = vrot.slane %v4758_v37, 1  ;;  %v10507_v47 = vpop.permute.xlu1 %4236 }
 0x25b   : > { %11685 = vst [vmem:[#allocation7_spill] sm:$0xff] %v10497_v26  ;;  %v3821_v43 = vsel %vm9915_vm14, 0, %v3820_v59  ;;  %v3119_v22 = vmax.f32 %v3083_v30, 0.0  ;;  %v4756_v19 = vor.u32 %v4755_v46, %v4751_v1  ;;  %v5761_v50 = vshrl.u32 %v10497_v26, 16  ;;  %11686 = vst [vmem:[#allocation8_spill] sm:$0xff] %v10509_v48 }
 0x25c   : > { %3822 = vst [vmem:[#allocation2 + $0xb0] sm:$0x1] %v3821_v43  ;;  %v3523_v40 = vrot.slane %v3521_v0, 7  ;;  %v7674_v53 = vpack.c.bf16 %v3116_v58, %v3116_v58  ;;  %v5763_v41 = vshll.u32 %v10497_v26, 16  ;;  %v5770_v17 = vrot.slane %v5768_v61, 1 }
 0x25d   : > { %v7677_v38 = vpack.c.bf16 %v3119_v22, %v3119_v22  ;;  %v4761_v62 = vsel %vm471_vm2, %v4756_v19, %v4760_v24  ;;  %v3038_v2 = vadd.f32 %v2993_v7, %v10453_v3  ;;  %v10514_v1 = vcombine.low %v5496_v23, %v10505_v8  ;;  %v10516_v37 = vld [vmem:[#allocation2 + $0x68] ss:$0 sps:$4 sm:$0x11]   ;;  %v3709_v0 = vld [vmem:[#allocation2 + $0xc0] sm:$0xf] }
 0x25e   : > { %v3526_v30 = vor.u32 %v3524_v55, %v3523_v40  ;;  %v3527_v46 = vrot.slane %v3523_v40, 4  ;;  %v3504_v59 = vshrl.u32 %v7674_v53, 16  ;;  %v3507_v61 = vshll.u32 %v7674_v53, 16  ;;  %4862 = vrot.lane.b32.xlu0 %v4761_v62, %s8472_s6  ;;  %v8444_v24 = vld [vmem:[%s11634_s2] ss:$0 sm:$0xff]  ;;  %v10528_v40 = vpop.permute.xlu1 %5998  ;;  %v10536_v42 = vpop.permute.xlu0 %4978 }
 0x25f   : > { %11687 = vst [vmem:[#allocation9_spill] sm:$0xff] %v10514_v1  ;;  %v3529_v58 = vshrl.u32 %v7677_v38, 16  ;;  %v3532_v43 = vshll.u32 %v7677_v38, 16  ;;  %v5765_v32 = vrot.slane %v5763_v41, 1  ;;  %v3081_v3 = vadd.f32 %v8444_v24, %v3038_v2  ;;  %v3720_v55 = vld [vmem:[#allocation2 + $0xd4] sm:$0x1] }
 0x260   : > { %v3717_v23 = vsel %vm9872_vm9, %v3526_v30, %v3716_v21  ;;  %v10524_v7 = vrot.slane %v3504_v59, 7  ;;  %v5749_v22 = vshrl.u32 %v10514_v1, 16  ;;  %v5751_v19 = vshll.u32 %v10514_v1, 16  ;;  %v4482_v24 = vld [vmem:[#allocation2 + $0x84] sm:$0xf] }
 0x261   : > { %3718 = vst [vmem:[#allocation2 + $0xcc] sm:$0xf] %v3717_v23  ;;  %v3531_v53 = vrot.slane %v3529_v58, 7  ;;  %v5766_v41 = vor.u32 %v5765_v32, %v5761_v50  ;;  %v3117_v38 = vmax.f32 %v3081_v3, 0.0  ;;  %v5756_v62 = vshll.u32 %v10516_v37, 16 }
 0x262   : > { %v3509_v2 = vor.u32 %v3507_v61, %v10524_v7  ;;  %v3510_v21 = vrot.slane %v10524_v7, 4  ;;  %v5753_v30 = vrot.slane %v5751_v19, 1  ;;  %v4739_v59 = vshrl.u32 %v10478_v45, 16  ;;  %v10534_v26 = vld [vmem:[#allocation2 + $0x8c] ss:$0 sps:$4 sm:$0x11]  }
 0x263   : > { %v3534_v39 = vor.u32 %v3532_v43, %v3531_v53  ;;  %v3536_v23 = vrot.slane %v3531_v53, 4  ;;  %v5771_v32 = vsel %vm471_vm2, %v5766_v41, %v5770_v17  ;;  %v7675_v50 = vpack.c.bf16 %v3117_v38, %v3117_v38  ;;  %v10539_v58 = vld [vmem:[#allocation2 + $0x80] ss:$0 sps:$4 sm:$0x11]   ;;  %v4481_v48 = vld [vmem:[#allocation2 + $0x7c] sm:$0xf] }
 0x264   : > { %v3710_v61 = vsel %vm9872_vm9, %v3509_v2, %v3709_v0  ;;  %5882 = vrot.lane.b32.xlu1 %v5771_v32, %s8472_s6  ;;  %v5754_v3 = vor.u32 %v5753_v30, %v5749_v22  ;;  %v5758_v7 = vrot.slane %v5756_v62, 1  ;;  %v4741_v19 = vshll.u32 %v10478_v45, 16  ;;  %v4520_v38 = vld [vmem:[#allocation2 + $0x84] sm:$0xe]  ;;  %v4519_v2 = vld [vmem:[#allocation2 + $0x78] sm:$0xe]  ;;  %v10552_v30 = vpop.permute.xlu1 %4368 }
 0x265   : > { %3711 = vst [vmem:[#allocation2 + $0xc0] sm:$0xf] %v3710_v61  ;;  %v3535_v43 = vsel %vm9887_vm13, %v3527_v46, %v3534_v39  ;;  %v3721_v17 = vsel %vm9879_vm12, %v3536_v23, %v3720_v55  ;;  %v3512_v53 = vshrl.u32 %v7675_v50, 16  ;;  %v3515_v41 = vshll.u32 %v7675_v50, 16  ;;  %11688 = vst [vmem:[#allocation10_spill] sm:$0xff] %v10552_v30 }
 0x266   : > { %3719 = vst.msk [vmem:[#allocation2 + $0xd0] sm:$0xf] %vm3591_vm6, %v3535_v43  ;;  %3722 = vst [vmem:[#allocation2 + $0xd4] sm:$0x1] %v3721_v17  ;;  %v5759_v28 = vsel %vm471_vm2, %v5754_v3, %v5758_v7  ;;  %v4743_v0 = vrot.slane %v4741_v19, 1  ;;  %v4746_v22 = vshll.u32 %v10455_v35, 16  ;;  %v7450_v62 = vcombine.low %v4520_v38, %v4483_v18  ;;  %v10561_v38 = vpop.permute.xlu0 %4850 }
 0x267   : > { %v11689_v32 = vmov 0   ;;  %v3514_v39 = vrot.slane %v3512_v53, 7  ;;  %v3713_v46 = vld [vmem:[#allocation2 + $0xc8] sm:$0x1]  ;;  %5880 = vrot.lane.b32.xlu0 %v5759_v28, %s8472_s6  ;;  %v4957_v55 = vrot.slane %v10534_v26, 1  ;;  %v10558_v23 = vcombine.low %v4482_v24, %v4483_v18 }
 0x268   : > { %3847 = vst.msk [vmem:[#allocation2 + $0xd0] sm:$0xf] %vm3591_vm6, %v11689_v32  ;;  %v4480_v50 = vld [vmem:[#allocation2 + $0x78] sm:$0xf]  ;;  %v7449_v61 = vcombine.low %v4519_v2, %v4481_v48  ;;  %v3774_v3 = vld [vmem:[#allocation2 + $0xcc] sm:$0x1]  ;;  %v4744_v7 = vor.u32 %v4743_v0, %v4739_v59 }
 0x269   : > { %v4748_v35 = vrot.slane %v4746_v22, 1  ;;  %v4956_v19 = vrot.slane %v7450_v62, 1  ;;  %v4954_v43 = vrot.slane %v10539_v58, 1  ;;  %v4487_v17 = vld [vmem:[#allocation2 + $0xa0] sm:$0xf]  ;;  %v3775_v53 = vsel %vm9879_vm12, 0, %v3774_v3 }
 0x26a   : > { %v3517_v30 = vor.u32 %v3515_v41, %v3514_v39  ;;  %v3519_v28 = vrot.slane %v3514_v39, 4  ;;  %v4953_v1 = vrot.slane %v7449_v61, 1  ;;  %v10565_v45 = vld [vmem:[#allocation2 + $0xa4] ss:$0 sps:$4 sm:$0x11]   ;;  %v10569_v24 = vcombine.low %v4480_v50, %v4481_v48 }
 0x26b   : > { %3776 = vst [vmem:[#allocation2 + $0xcc] sm:$0x1] %v3775_v53  ;;  %v4749_v18 = vsel %vm471_vm2, %v4744_v7, %v4748_v35  ;;  %v4958_v59 = vsel %vm778_vm1, %v4956_v19, %v4957_v55  ;;  %v4775_v0 = vshrl.u32 %v10558_v23, 16  ;;  %v4486_v22 = vld [vmem:[#allocation2 + $0x9c] sm:$0xf]  ;;  %v4777_v55 = vshll.u32 %v10558_v23, 16  ;;  %v10587_v7 = vpop.permute.xlu1 %4976 }
 0x26c   : > { %11690 = vst [vmem:[#allocation11_spill] sm:$0xff] %v10569_v24  ;;  %v4522_v62 = vld [vmem:[#allocation2 + $0x9c] sm:$0xe]  ;;  %v4485_v2 = vld [vmem:[#allocation2 + $0x94] sm:$0xf]  ;;  %v3518_v41 = vsel %vm9887_vm13, %v3510_v21, %v3517_v30  ;;  %v3714_v39 = vsel %vm9879_vm12, %v3519_v28, %v3713_v46  ;;  %4860 = vrot.lane.b32.xlu1 %v4749_v18, %s8472_s6  ;;  %4994 = vrot.lane.b32.xlu0 %v4958_v59, %s8471_s30  ;;  %v4782_v3 = vshll.u32 %v10534_v26, 16 }
 0x26d   : > { %3846 = vst.msk [vmem:[#allocation2 + $0xcc] sm:$0xf] %vm3591_vm6, %v11689_v32  ;;  %v4955_v48 = vsel %vm778_vm1, %v4953_v1, %v4954_v43  ;;  %v4484_v50 = vld [vmem:[#allocation2 + $0x90] sm:$0xf]  ;;  %v3771_v61 = vld [vmem:[#allocation2 + $0xc0] sm:$0x1]  ;;  %v7452_v43 = vcombine.low %v4522_v62, %v4487_v17 }
 0x26e   : > { %3712 = vst.msk [vmem:[#allocation2 + $0xc4] sm:$0xf] %vm3591_vm6, %v3518_v41  ;;  %3715 = vst [vmem:[#allocation2 + $0xc8] sm:$0x1] %v3714_v39  ;;  %v4763_v29 = vshrl.u32 %v10569_v24, 16  ;;  %v4765_v21 = vshll.u32 %v10569_v24, 16  ;;  %v10597_v39 = vcombine.low %v4486_v22, %v4487_v17 }
 0x26f   : > { %v4770_v30 = vshll.u32 %v10539_v58, 16  ;;  %v8376_v46 = vld [vmem:[#allocation2 + $0x98] ss:$0 sps:$4 sm:$0x11]   ;;  %v3772_v1 = vsel %vm9879_vm12, 0, %v3771_v61  ;;  %v4779_v19 = vrot.slane %v4777_v55, 1  ;;  %v10594_v58 = vpop.permute.xlu0 %5996 }
 0x270   : > { %v3829_v35 = vld [vmem:[#allocation2 + $0xd4] sm:$0x1]  ;;  %v4963_v53 = vrot.slane %v10565_v45, 1  ;;  %3773 = vst [vmem:[#allocation2 + $0xc0] sm:$0x1] %v3772_v1  ;;  %v4784_v28 = vrot.slane %v4782_v3, 1  ;;  %4992 = vrot.lane.b32.xlu1 %v4955_v48, %s8471_s30  ;;  %v10601_v1 = vcombine.low %v4484_v50, %v4485_v2  ;;  %v10611_v50 = vpop.permute.xlu1 %5870 }
 0x271   : > { %v3830_v26 = vsel %vm9915_vm14, 0, %v3829_v35  ;;  %v4767_v18 = vrot.slane %v4765_v21, 1  ;;  %v4772_v59 = vrot.slane %v4770_v30, 1  ;;  %v4521_v41 = vld [vmem:[#allocation2 + $0x90] sm:$0xe]  ;;  %v4780_v15 = vor.u32 %v4779_v19, %v4775_v0  ;;  %11691 = vst [vmem:[#allocation12_spill] sm:$0xff] %v10597_v39 }
 0x272   : > { %3831 = vst [vmem:[#allocation2 + $0xd4] sm:$0x1] %v3830_v26  ;;  %v7451_v55 = vcombine.low %v4521_v41, %v4485_v2  ;;  %v4962_v61 = vrot.slane %v7452_v43, 1  ;;  %v4490_v3 = vld [vmem:[#allocation2 + $0xb4] sm:$0xf]  ;;  %v4806_v35 = vshll.u32 %v10565_v45, 16 }
 0x273   : > { %3849 = vst.msk [vmem:[#allocation2 + $0xd4] sm:$0x1] %vm3599_vm10, %v11689_v32  ;;  %v4768_v62 = vor.u32 %v4767_v18, %v4763_v29  ;;  %v4491_v21 = vld [vmem:[#allocation2 + $0xb8] sm:$0xf]  ;;  %v4785_v30 = vsel %vm471_vm2, %v4780_v15, %v4784_v28  ;;  %v4524_v26 = vld [vmem:[#allocation2 + $0xb4] sm:$0xe] }
 0x274   : > { %v4488_v24 = vld [vmem:[#allocation2 + $0xa8] sm:$0xf]  ;;  %4866 = vrot.lane.b32.xlu0 %v4785_v30, %s8472_s6  ;;  %v4964_v0 = vsel %vm778_vm1, %v4962_v61, %v4963_v53  ;;  %v4960_v22 = vrot.slane %v8376_v46, 1  ;;  %v4801_v32 = vshll.u32 %v10597_v39, 16  ;;  %v4489_v2 = vld [vmem:[#allocation2 + $0xac] sm:$0xf]  ;;  %v10618_v41 = vcombine.low %v4490_v3, %v4491_v21 }
 0x275   : > { %v4773_v17 = vsel %vm471_vm2, %v4768_v62, %v4772_v59  ;;  %v10609_v48 = vld [vmem:[#allocation2 + $0xbc] ss:$0 sps:$4 sm:$0x11]   ;;  %v3826_v29 = vld [vmem:[#allocation2 + $0xc8] sm:$0x1]  ;;  %v4959_v45 = vrot.slane %v7451_v55, 1  ;;  %v7454_v59 = vcombine.low %v4524_v26, %v4491_v21  ;;  %v10620_v62 = vpop.permute.xlu0 %4366  ;;  %v4397_v3 = vsel %vm869_vm3, %v9943_v51, %v10507_v47 }
 0x276   : > { %4864 = vrot.lane.b32.xlu1 %v4773_v17, %s8472_s6  ;;  %v4799_v19 = vshrl.u32 %v10597_v39, 16  ;;  %v4789_v43 = vshll.u32 %v10601_v1, 16  ;;  %v4794_v28 = vshll.u32 %v8376_v46, 16  ;;  %v3827_v53 = vsel %vm9915_vm14, 0, %v3826_v29 }
 0x277   : > { %v4803_v18 = vrot.slane %v4801_v32, 1  ;;  %v8382_v15 = vld [vmem:[#allocation2 + $0xb0] ss:$0 sps:$4 sm:$0x11]   ;;  %3828 = vst [vmem:[#allocation2 + $0xc8] sm:$0x1] %v3827_v53  ;;  %v4961_v46 = vsel %vm778_vm1, %v4959_v45, %v4960_v22  ;;  %v10625_v29 = vcombine.low %v4488_v24, %v4489_v2  ;;  %v10633_v26 = vsel %vm906_vm4, %v4397_v3, %v10481_v10  ;;  %v10640_v45 = vpop.permute.xlu1 %4240 }
 0x278   : > { %v4808_v61 = vrot.slane %v4806_v35, 1  ;;  %v4787_v30 = vshrl.u32 %v10601_v1, 16  ;;  %v4791_v55 = vrot.slane %v4789_v43, 1  ;;  %v4796_v17 = vrot.slane %v4794_v28, 1  ;;  %4998 = vrot.lane.b32.xlu0 %v4964_v0, %s8471_s30  ;;  %11692 = vst [vmem:[#allocation13_spill] sm:$0xff] %v10633_v26  ;;  %11693 = vst [vmem:[#allocation14_spill] sm:$0xff] %v10640_v45 }
 0x279   : > { %v4804_v39 = vor.u32 %v4803_v18, %v4799_v19  ;;  %v7453_v35 = vcombine.low %v4523_v49, %v4489_v2  ;;  %v4968_v32 = vrot.slane %v7454_v59, 1  ;;  %v4969_v0 = vrot.slane %v10609_v48, 1  ;;  %v3866_v10 = vld [vmem:[#allocation2 + $0x60] sm:$0xf]  ;;  %v8404_v43 = vld [vmem:[%s11635_s3 + $0xc] sm:$0xff]  }
 0x27a   : > { %4996 = vrot.lane.b32.xlu1 %v4961_v46, %s8471_s30  ;;  %v4792_v21 = vor.u32 %v4791_v55, %v4787_v30  ;;  %v5007_v24 = vsel %vm869_vm3, %v9938_v54, %v10450_v25  ;;  %v4825_v22 = vshll.u32 %v10618_v41, 16  ;;  %v4966_v2 = vrot.slane %v8382_v15, 1  ;;  %v10654_v18 = vld [vmem:[#allocation2 + $0x68] ss:$0 sps:$4 sm:$0x11]  }
 0x27b   : > { %v4809_v51 = vsel %vm471_vm2, %v4804_v39, %v4808_v61  ;;  %v4830_v19 = vshll.u32 %v10609_v48, 16  ;;  %v4813_v54 = vshll.u32 %v10625_v29, 16  ;;  %v4818_v25 = vshll.u32 %v8382_v15, 16  ;;  %v10652_v39 = vld [vmem:[#allocation2 + $0x64] sm:$0xf]  ;;  %v10656_v48 = vpop.permute.xlu0 %5868 }
 0x27c   : > { %v4797_v47 = vsel %vm471_vm2, %v4792_v21, %v4796_v17  ;;  %4870 = vrot.lane.b32.xlu0 %v4809_v51, %s8472_s6  ;;  %v4827_v28 = vrot.slane %v4825_v22, 1  ;;  %v5039_v53 = vsel %vm906_vm4, %v5007_v24, %v10420_v52  ;;  %v4493_v59 = vld [vmem:[#allocation2 + $0xc4] sm:$0xf]  ;;  %v4965_v61 = vrot.slane %v7453_v35, 1  ;;  %v8445_v15 = vld [vmem:[%s11635_s3 + $0x14] ss:$0 sps:$4 sm:$0xff]  }
 0x27d   : > { %v4823_v30 = vshrl.u32 %v10618_v41, 16  ;;  %7988 = vmatprep.mubr.msk.bf16.mxu1 %vm1646_vm5, %v5039_v53  ;;  %v5115_v52 = vsel %vm1683_vm0, %v8445_v15, 0  ;;  %v4492_v55 = vld [vmem:[#allocation2 + $0xc0] sm:$0xf]  ;;  %v4970_v46 = vsel %vm778_vm1, %v4968_v32, %v4969_v0  ;;  %v4811_v49 = vshrl.u32 %v10625_v29, 16 }
 0x27e   : > { %4868 = vrot.lane.b32.xlu1 %v4797_v47, %s8472_s6  ;;  %v4525_v17 = vld [vmem:[#allocation2 + $0xc0] sm:$0xe]  ;;  %v4815_v3 = vrot.slane %v4813_v54, 1  ;;  %7985 = vmatpush3.bf16.msra.mxu1 %v5115_v52  ;;  %v4967_v21 = vsel %vm778_vm1, %v4965_v61, %v4966_v2  ;;  %v4832_v24 = vrot.slane %v4830_v19, 1  ;;  %v10669_v22 = vcombine.low %v3866_v10, %v10652_v39  ;;  %v10674_v47 = vld [vmem:[%s11635_s3 + $0x8] ss:$0 sps:$4 sm:$0xff]   ;;  %v10679_v2 = vpop.permute.xlu1 %4848 }
 0x27f   : > { %v4828_v35 = vor.u32 %v4827_v28, %v4823_v30  ;;  %v8389_v51 = vld [vmem:[#allocation2 + $0xc8] ss:$0 sps:$4 sm:$0x11]   ;;  %7986 = vmatprep.subr.bf16.mxu1 %v8404_v43  ;;  %v4820_v0 = vrot.slane %v4818_v25, 1  ;;  %v5538_v54 = vld [vmem:[#allocation2 + $0x60] sm:$0xe]  ;;  %v7455_v53 = vcombine.low %v4525_v17, %v4493_v59  ;;  %v10677_v15 = vcombine.low %v4492_v55, %v4493_v59  ;;  %v10686_v25 = vpop.permute.xlu0 %4238 }
 0x280   : > { %11694 = vst [vmem:[#allocation15_spill] sm:$0xff] %v10669_v22  ;;  %5002 = vrot.lane.b32.xlu0 %v4970_v46, %s8471_s30  ;;  %v4816_v32 = vor.u32 %v4815_v3, %v4811_v49  ;;  %v7530_v19 = vcombine.low %v5538_v54, %v10505_v8  ;;  %v4141_v10 = vshll.u32 %v10669_v22, 16  ;;  %v5500_v28 = vld [vmem:[#allocation2 + $0x78] sm:$0xf]  ;;  %v5967_v61 = vrot.slane %v10516_v37, 1 }
 0x281   : > { %11695 = vst [vmem:[#allocation16_spill] sm:$0xff] %v10677_v15  ;;  %v4146_v30 = vshll.u32 %v10654_v18, 16  ;;  %v4972_v52 = vrot.slane %v8389_v51, 1  ;;  %v4833_v59 = vsel %vm471_vm2, %v4828_v35, %v4832_v24  ;;  %v4139_v55 = vshrl.u32 %v10669_v22, 16  ;;  %v10691_v49 = vld [vmem:[#allocation2 + $0x7c] sm:$0xf] }
 0x282   : > { %5000 = vrot.lane.b32.xlu1 %v4967_v21, %s8471_s30  ;;  %7987 = vmatpush3.bf16.msra.mxu1 %v8404_v43  ;;  %v4143_v17 = vrot.slane %v4141_v10, 1  ;;  %v4837_v46 = vshll.u32 %v10677_v15, 16  ;;  %v4821_v8 = vsel %vm471_vm2, %v4816_v32, %v4820_v0  ;;  %v4971_v37 = vrot.slane %v7455_v53, 1  ;;  %v10701_v24 = vld [vmem:[#allocation2 + $0x80] ss:$0 sps:$4 sm:$0x11]   ;;  %v10705_v26 = vpop.permute.xlu1 %6002 }
 0x283   : > { %8096 = vmatprep.subr.msk.bf16.mxu1 %vm1683_vm0, %v10674_v47  ;;  %v4842_v43 = vshll.u32 %v8389_v51, 16  ;;  %v10698_v3 = vcombine.low %v5500_v28, %v10691_v49  ;;  %v5966_v21 = vrot.slane %v7530_v19, 1  ;;  %v4148_v10 = vrot.slane %v4146_v30, 1  ;;  %v3906_v32 = vld [vmem:[#allocation2 + $0x60] sm:$0xe] }
 0x284   : > { %4874 = vrot.lane.b32.xlu0 %v4833_v59, %s8472_s6  ;;  %v4839_v35 = vrot.slane %v4837_v46, 1  ;;  %v4144_v54 = vor.u32 %v4143_v17, %v4139_v55  ;;  %v4973_v22 = vsel %vm778_vm1, %v4971_v37, %v4972_v52  ;;  %v4835_v45 = vshrl.u32 %v10677_v15, 16  ;;  %v3868_v59 = vld [vmem:[#allocation2 + $0x6c] sm:$0xf]  ;;  %v10711_v30 = vld [vmem:[#allocation2 + $0x70] sm:$0xf]  ;;  %v10715_v17 = vpop.permute.xlu0 %4982 }
 0x285   : > { %11696 = vst [vmem:[#allocation17_spill] sm:$0xff] %v10698_v3  ;;  %v5968_v51 = vsel %vm778_vm1, %v5966_v21, %v5967_v61  ;;  %v5775_v0 = vshll.u32 %v10698_v3, 16  ;;  %v5539_v53 = vld [vmem:[#allocation2 + $0x6c] sm:$0xe]  ;;  %v7400_v19 = vcombine.low %v3906_v32, %v10652_v39  ;;  %v4844_v55 = vrot.slane %v4842_v43, 1  ;;  %v8401_v39 = vld [vmem:[%s11635_s3 + $0x18] sm:$0xff]  }
 0x286   : > { %4872 = vrot.lane.b32.xlu1 %v4821_v8, %s8472_s6  ;;  %v4840_v28 = vor.u32 %v4839_v35, %v4835_v45  ;;  %v10713_v52 = vld [vmem:[#allocation2 + $0x74] ss:$0 sps:$4 sm:$0x11]   ;;  %v7531_v61 = vcombine.low %v5539_v53, %v10492_v36  ;;  %v10720_v46 = vcombine.low %v3868_v59, %v10711_v30  ;;  %v3870_v8 = vld [vmem:[#allocation2 + $0x78] sm:$0xf]  ;;  %v4149_v45 = vsel %vm471_vm2, %v4144_v54, %v4148_v10  ;;  %v10742_v32 = vpop.permute.xlu1 %4372 }
 0x287   : > { %v4339_v37 = vrot.slane %v10654_v18, 1  ;;  %v5780_v43 = vshll.u32 %v10701_v24, 16  ;;  %v5777_v21 = vrot.slane %v5775_v0, 1  ;;  %v5970_v35 = vrot.slane %v10475_v6, 1  ;;  %v8446_v36 = vld [vmem:[%s11635_s3 + $0x20] ss:$0 sps:$4 sm:$0xff]  }
 0x288   : > { %6008 = vrot.lane.b32.xlu0 %v5968_v51, %s8471_s30  ;;  %11697 = vst [vmem:[#allocation18_spill] sm:$0xff] %v10720_v46  ;;  %v6137_v59 = vsel %vm1683_vm0, %v8446_v36, 0  ;;  %v10734_v51 = vld [vmem:[#allocation2 + $0x7c] sm:$0xf]  ;;  %v4338_v54 = vrot.slane %v7400_v19, 1  ;;  %v4845_v18 = vsel %vm471_vm2, %v4840_v28, %v4844_v55  ;;  %v4158_v10 = vshll.u32 %v10713_v52, 16 }
 0x289   : > { %8057 = vmatpush3.bf16.msra.mxu0 %v6137_v59  ;;  %v10740_v6 = vcombine.low %v3870_v8, %v10734_v51  ;;  %v5773_v0 = vshrl.u32 %v10698_v3, 16  ;;  %v5969_v53 = vrot.slane %v7531_v61, 1  ;;  %v4151_v36 = vshrl.u32 %v10720_v46, 16  ;;  %v5502_v19 = vld [vmem:[#allocation2 + $0x84] sm:$0xf] }
 0x28a   : > { %5004 = vrot.lane.b32.xlu1 %v4973_v22, %s8471_s30  ;;  %v4153_v22 = vshll.u32 %v10720_v46, 16  ;;  %8058 = vmatprep.subr.bf16.mxu0 %v8401_v39  ;;  %v4340_v28 = vsel %vm778_vm1, %v4338_v54, %v4339_v37  ;;  %v5782_v55 = vrot.slane %v5780_v43, 1  ;;  %v6031_v8 = vsel %vm869_vm3, %v10048_v4, %v10611_v50  ;;  %v10757_v3 = vld [vmem:[#allocation2 + $0x80] ss:$0 sps:$4 sm:$0x11]  }
 0x28b   : > { %v6029_v59 = vsel %vm869_vm3, %v10090_v27, %v10656_v48  ;;  %v5778_v61 = vor.u32 %v5777_v21, %v5773_v0  ;;  %v5971_v46 = vsel %vm778_vm1, %v5969_v53, %v5970_v35  ;;  %v4165_v37 = vshll.u32 %v10740_v6, 16  ;;  %v10760_v43 = vld [vmem:[#allocation2 + $0x88] sm:$0xf]  ;;  %v10771_v48 = vld [vmem:[#allocation2 + $0x8c] ss:$0 sps:$4 sm:$0x11]  }
 0x28c   : > { %4250 = vrot.lane.b32.xlu0 %v4149_v45, %s8472_s6  ;;  %v4155_v15 = vrot.slane %v4153_v22, 1  ;;  %v5540_v45 = vld [vmem:[#allocation2 + $0x78] sm:$0xe]  ;;  %v4160_v54 = vrot.slane %v4158_v10, 1  ;;  %v6061_v4 = vsel %vm906_vm4, %v6029_v59, %v10594_v58  ;;  %v5009_v27 = vsel %vm869_vm3, %v10095_v11, %v10679_v2  ;;  %v3907_v35 = vld [vmem:[#allocation2 + $0x6c] sm:$0xe] }
 0x28d   : > { %8059 = vmatpush3.bf16.msra.mxu0 %v8401_v39  ;;  %v10769_v50 = vcombine.low %v5502_v19, %v10760_v43  ;;  %v5011_v21 = vsel %vm869_vm3, %v10052_v5, %v10561_v38  ;;  %v7532_v39 = vcombine.low %v5540_v45, %v10691_v49  ;;  %8060 = vmatprep.mubr.msk.bf16.mxu0 %vm1646_vm5, %v6061_v4  ;;  %v5973_v58 = vrot.slane %v10701_v24, 1  ;;  %v10786_v5 = vld [vmem:[#allocation2 + $0x94] sm:$0xf]  ;;  %v3872_v19 = vld [vmem:[#allocation2 + $0x84] sm:$0xf] }
 0x28e   : > { %4876 = vrot.lane.b32.xlu1 %v4845_v18, %s8472_s6  ;;  %v10754_v18 = vpop.permute.xlu0 %4854  ;;  %v4156_v22 = vor.u32 %v4155_v15, %v4151_v36  ;;  %v5504_v15 = vld [vmem:[#allocation2 + $0x90] sm:$0xf]  ;;  %v5041_v11 = vsel %vm906_vm4, %v5009_v27, %v10587_v7  ;;  %v6063_v2 = vsel %vm906_vm4, %v6031_v8, %v10528_v40  ;;  %v7401_v10 = vcombine.low %v3907_v35, %v10711_v30  ;;  %v10805_v8 = vld [vmem:[#allocation2 + $0x98] ss:$0 sps:$4 sm:$0x11]  }
 0x28f   : > { %v5787_v0 = vshll.u32 %v10769_v50, 16  ;;  %7989 = vmatmul.mubr.msk.bf16.vlgmr.msra.gmra.mxu1 %vm1646_vm5, %v5041_v11  ;;  %v10789_v38 = vpop.permute.xlu1 %4980  ;;  %v5783_v49 = vsel %vm471_vm2, %v5778_v61, %v5782_v55  ;;  %v4170_v7 = vshll.u32 %v10757_v3, 16  ;;  %v10795_v24 = vcombine.low %v5504_v15, %v10786_v5  ;;  %v3908_v15 = vld [vmem:[#allocation2 + $0x78] sm:$0xe] }
 0x290   : > { %4378 = vrot.lane.b32.xlu0 %v4340_v28, %s8471_s30  ;;  %8061 = vmatmul.mubr.msk.bf16.vlgmr.msra.gmra.mxu0 %vm1646_vm5, %v6063_v2  ;;  %v4161_v40 = vsel %vm471_vm2, %v4156_v22, %v4160_v54  ;;  %v4342_v30 = vrot.slane %v10713_v52, 1  ;;  %v5792_v36 = vshll.u32 %v10771_v48, 16  ;;  %v5972_v55 = vrot.slane %v7532_v39, 1  ;;  %v5541_v39 = vld [vmem:[#allocation2 + $0x84] sm:$0xe] }
 0x291   : > { %v5789_v53 = vrot.slane %v5787_v0, 1  ;;  %v4163_v45 = vshrl.u32 %v10740_v6, 16  ;;  %v4341_v59 = vrot.slane %v7401_v10, 1  ;;  %v5785_v61 = vshrl.u32 %v10769_v50, 16 }
 0x292   : > { %6010 = vrot.lane.b32.xlu1 %v5971_v46, %s8471_s30  ;;  %v4167_v46 = vrot.slane %v4165_v37, 1  ;;  %v10801_v28 = vpop.permute.xlu0 %6000  ;;  %v5799_v22 = vshll.u32 %v10795_v24, 16  ;;  %v5043_v52 = vsel %vm906_vm4, %v5011_v21, %v10536_v42  ;;  %v10811_v37 = vld [vmem:[#allocation2 + $0x88] sm:$0xf]  ;;  %v5974_v54 = vsel %vm778_vm1, %v5972_v55, %v5973_v58  ;;  %v3874_v21 = vld [vmem:[#allocation2 + $0x90] sm:$0xf] }
 0x293   : > { %v4172_v27 = vrot.slane %v4170_v7, 1  ;;  %7992 = vmatprep.mubr.msk.bf16.mxu1 %vm1646_vm5, %v5043_v52  ;;  %v10816_v35 = vcombine.low %v3872_v19, %v10811_v37  ;;  %v4343_v11 = vsel %vm778_vm1, %v4341_v59, %v4342_v30  ;;  %v5790_v2 = vor.u32 %v5789_v53, %v5785_v61  ;;  %v10820_v42 = vld [vmem:[#allocation2 + $0x8c] ss:$0 sps:$4 sm:$0x11]   ;;  %v10827_v19 = vld [vmem:[#allocation2 + $0x94] sm:$0xf] }
 0x294   : > { %5884 = vrot.lane.b32.xlu0 %v5783_v49, %s8472_s6  ;;  %v4168_v4 = vor.u32 %v4167_v46, %v4163_v45  ;;  %v5794_v10 = vrot.slane %v5792_v36, 1  ;;  %v7402_v58 = vcombine.low %v3908_v15, %v10734_v51  ;;  %v5804_v49 = vshll.u32 %v10805_v8, 16  ;;  %v5506_v51 = vld [vmem:[#allocation2 + $0x9c] sm:$0xf]  ;;  %v5542_v61 = vld [vmem:[#allocation2 + $0x90] sm:$0xe] }
 0x295   : > { %11698 = vst [vmem:[#allocation19_spill] sm:$0xff] %v10816_v35  ;;  %v7533_v46 = vcombine.low %v5541_v39, %v10760_v43  ;;  %v4177_v7 = vshll.u32 %v10816_v35, 16  ;;  %v4345_v36 = vrot.slane %v10757_v3, 1  ;;  %v5797_v55 = vshrl.u32 %v10795_v24, 16  ;;  %v10844_v15 = vld [vmem:[#allocation2 + $0xa0] sm:$0xf] }
 0x296   : > { %4252 = vrot.lane.b32.xlu1 %v4161_v40, %s8472_s6  ;;  %v5875_v0 = vpop.permute.xlu1 %5874  ;;  %v5801_v40 = vrot.slane %v5799_v22, 1  ;;  %v10829_v30 = vpop.permute.xlu0 %4370  ;;  %v4173_v53 = vsel %vm471_vm2, %v4168_v4, %v4172_v27  ;;  %v10835_v45 = vcombine.low %v3874_v21, %v10827_v19  ;;  %v5795_v43 = vsel %vm471_vm2, %v5790_v2, %v5794_v10  ;;  %v10848_v10 = vld [vmem:[#allocation2 + $0x98] ss:$0 sps:$4 sm:$0x11]  }
 0x297   : > { %v5976_v59 = vrot.slane %v10771_v48, 1  ;;  %v4179_v22 = vrot.slane %v4177_v7, 1  ;;  %v4182_v52 = vshll.u32 %v10820_v42, 16  ;;  %v4344_v4 = vrot.slane %v7402_v58, 1  ;;  %v3909_v7 = vld [vmem:[#allocation2 + $0x84] sm:$0xe] }
 0x298   : > { %6012 = vrot.lane.b32.xlu0 %v5974_v54, %s8471_s30  ;;  %v5806_v3 = vrot.slane %v5804_v49, 1  ;;  %v5975_v27 = vrot.slane %v7533_v46, 1  ;;  %v5802_v39 = vor.u32 %v5801_v40, %v5797_v55  ;;  %v4175_v2 = vshrl.u32 %v10816_v35, 16 }
 0x299   : > { %v10851_v48 = vcombine.low %v5506_v51, %v10844_v15  ;;  %v4346_v21 = vsel %vm778_vm1, %v4344_v4, %v4345_v36  ;;  %v4189_v58 = vshll.u32 %v10835_v45, 16  ;;  %v4184_v40 = vrot.slane %v4182_v52, 1 }
 0x29a   : > { %4380 = vrot.lane.b32.xlu1 %v4343_v11, %s8471_s30  ;;  %v10841_v54 = vpop.permute.xlu1 %4244  ;;  %v7534_v11 = vcombine.low %v5542_v61, %v10786_v5  ;;  %v5977_v49 = vsel %vm778_vm1, %v5975_v27, %v5976_v59  ;;  %v4180_v46 = vor.u32 %v4179_v22, %v4175_v2  ;;  %v10857_v5 = vld [vmem:[#allocation2 + $0xa4] ss:$0 sps:$4 sm:$0x11]   ;;  %v5979_v51 = vrot.slane %v10805_v8, 1  ;;  %v10863_v61 = vld [vmem:[#allocation2 + $0xac] sm:$0xf] }
 0x29b   : > { %v5811_v55 = vshll.u32 %v10851_v48, 16  ;;  %v7403_v36 = vcombine.low %v3909_v7, %v10811_v37  ;;  %v5807_v4 = vsel %vm471_vm2, %v5802_v39, %v5806_v3  ;;  %v4194_v59 = vshll.u32 %v10848_v10, 16  ;;  %v3876_v27 = vld [vmem:[#allocation2 + $0x9c] sm:$0xf] }
 0x29c   : > { %4254 = vrot.lane.b32.xlu0 %v4173_v53, %s8472_s6  ;;  %v5508_v53 = vld [vmem:[#allocation2 + $0xa8] sm:$0xf]  ;;  %v4191_v2 = vrot.slane %v4189_v58, 1  ;;  %v4348_v35 = vrot.slane %v10820_v42, 1  ;;  %v6035_v8 = vsel %vm869_vm3, %v10192_v12, %v5875_v0  ;;  %v4185_v3 = vsel %vm471_vm2, %v4180_v46, %v4184_v40 }
 0x29d   : > { %v10868_v22 = vcombine.low %v5508_v53, %v10863_v61  ;;  %v5813_v39 = vrot.slane %v5811_v55, 1  ;;  %v10880_v53 = vld [vmem:[#allocation2 + $0xa0] sm:$0xf]  ;;  %v4187_v42 = vshrl.u32 %v10835_v45, 16  ;;  %v4347_v12 = vrot.slane %v7403_v36, 1 }
 0x29e   : > { %5886 = vrot.lane.b32.xlu1 %v5795_v43, %s8472_s6  ;;  %v5873_v43 = vpop.permute.xlu0 %5872  ;;  %v10888_v0 = vcombine.low %v3876_v27, %v10880_v53  ;;  %v5015_v58 = vsel %vm869_vm3, %v10195_v63, %v10754_v18  ;;  %v6067_v40 = vsel %vm906_vm4, %v6035_v8, %v10705_v26  ;;  %v4196_v36 = vrot.slane %v4194_v59, 1  ;;  %v3910_v63 = vld [vmem:[#allocation2 + $0x90] sm:$0xe]  ;;  %v3878_v26 = vld [vmem:[#allocation2 + $0xa8] sm:$0xf] }
 0x29f   : > { %v4853_v52 = vpop.permute.xlu1 %4852  ;;  %v6033_v37 = vsel %vm869_vm3, %v10232_v31, %v5873_v43  ;;  %v5823_v46 = vshll.u32 %v10868_v22, 16  ;;  %v4192_v43 = vor.u32 %v4191_v2, %v4187_v42  ;;  %v5510_v59 = vld [vmem:[#allocation2 + $0xb4] sm:$0xf]  ;;  %v4351_v2 = vrot.slane %v10848_v10, 1  ;;  %v10929_v10 = vld [vmem:[#allocation2 + $0xb8] sm:$0xf] }
 0x2a0   : > { %4382 = vrot.lane.b32.xlu0 %v4346_v21, %s8471_s30  ;;  %v5978_v21 = vrot.slane %v7534_v11, 1  ;;  %v5816_v11 = vshll.u32 %v10857_v5, 16  ;;  %v6065_v7 = vsel %vm906_vm4, %v6033_v37, %v10801_v28  ;;  %v5013_v31 = vsel %vm869_vm3, %v10247_v13, %v4853_v52  ;;  %v10903_v52 = vld [vmem:[#allocation2 + $0xa4] ss:$0 sps:$4 sm:$0x11]  }
 0x2a1   : > { %8064 = vmatprep.mubr.msk.bf16.mxu0 %vm1646_vm5, %v6065_v7  ;;  %v5809_v28 = vshrl.u32 %v10851_v48, 16  ;;  %v4201_v37 = vshll.u32 %v10888_v0, 16  ;;  %v5045_v8 = vsel %vm906_vm4, %v5013_v31, %v10789_v38  ;;  %v10918_v7 = vld [vmem:[#allocation2 + $0xac] sm:$0xf]  ;;  %v5821_v42 = vshrl.u32 %v10868_v22, 16 }
 0x2a2   : > { %6014 = vrot.lane.b32.xlu1 %v5977_v49, %s8471_s30  ;;  %v10894_v49 = vld [vmem:[#allocation2 + $0xb0] ss:$0 sps:$4 sm:$0x11]   ;;  %v5980_v13 = vsel %vm778_vm1, %v5978_v21, %v5979_v51  ;;  %8065 = vmatmul.mubr.msk.bf16.gmra.mxu0 %vm1646_vm5, %v6067_v40  ;;  %v5818_v27 = vrot.slane %v5816_v11, 1  ;;  %v7404_v51 = vcombine.low %v3910_v63, %v10827_v19  ;;  %v5047_v21 = vsel %vm906_vm4, %v5015_v58, %v10715_v17 }
 0x2a3   : > { %v10899_v55 = vpop.permute.xlu0 %4242  ;;  %v5814_v18 = vor.u32 %v5813_v39, %v5809_v28  ;;  %7993 = vmatmul.mubr.msk.bf16.gmra.mxu1 %vm1646_vm5, %v5045_v8  ;;  %v5828_v39 = vshll.u32 %v10894_v49, 16  ;;  %v4197_v19 = vsel %vm471_vm2, %v4192_v43, %v4196_v36  ;;  %v5982_v17 = vrot.slane %v10857_v5, 1 }
 0x2a4   : > { %5888 = vrot.lane.b32.xlu0 %v5807_v4, %s8472_s6  ;;  %v4349_v4 = vsel %vm778_vm1, %v4347_v12, %v4348_v35  ;;  %v5543_v35 = vld [vmem:[#allocation2 + $0x9c] sm:$0xe]  ;;  %7996 = vmatprep.mubr.msk.bf16.mxu1 %vm1646_vm5, %v5047_v21  ;;  %v10927_v12 = vcombine.low %v3878_v26, %v10918_v7  ;;  %v4203_v31 = vrot.slane %v4201_v37, 1  ;;  %v4206_v58 = vshll.u32 %v10903_v52, 16  ;;  %v5544_v26 = vld [vmem:[#allocation2 + $0xa8] sm:$0xe] }
 0x2a5   : > { %v7535_v11 = vcombine.low %v5543_v35, %v10844_v15  ;;  %v5819_v15 = vsel %vm471_vm2, %v5814_v18, %v5818_v27  ;;  %v4350_v40 = vrot.slane %v7404_v51, 1  ;;  %v4199_v36 = vshrl.u32 %v10888_v0, 16  ;;  %v10945_v27 = vld [vmem:[#allocation2 + $0xbc] ss:$0 sps:$4 sm:$0x11]  }
 0x2a6   : > { %4256 = vrot.lane.b32.xlu1 %v4185_v3, %s8472_s6  ;;  %v5825_v3 = vrot.slane %v5823_v46, 1  ;;  %v10920_v38 = vpop.permute.xlu1 %6006  ;;  %v10937_v46 = vcombine.low %v5510_v59, %v10929_v10  ;;  %v4213_v18 = vshll.u32 %v10927_v12, 16  ;;  %v4208_v51 = vrot.slane %v4206_v58, 1  ;;  %v5512_v59 = vld [vmem:[#allocation2 + $0xc0] sm:$0xf] }
 0x2a7   : > { %v5981_v43 = vrot.slane %v7535_v11, 1  ;;  %v4352_v63 = vsel %vm778_vm1, %v4350_v40, %v4351_v2  ;;  %v4204_v8 = vor.u32 %v4203_v31, %v4199_v36  ;;  %v7536_v2 = vcombine.low %v5544_v26, %v10863_v61  ;;  %v10966_v61 = vld [vmem:[#allocation2 + $0xb8] sm:$0xf] }
 0x2a8   : > { %6016 = vrot.lane.b32.xlu0 %v5980_v13, %s8471_s30  ;;  %v10934_v28 = vpop.permute.xlu0 %4986  ;;  %v5826_v5 = vor.u32 %v5825_v3, %v5821_v42  ;;  %v5830_v13 = vrot.slane %v5828_v39, 1  ;;  %v5835_v21 = vshll.u32 %v10937_v46, 16  ;;  %v3911_v3 = vld [vmem:[#allocation2 + $0x9c] sm:$0xe]  ;;  %v3880_v39 = vld [vmem:[#allocation2 + $0xb4] sm:$0xf]  ;;  %v4405_v26 = vsel %vm869_vm3, %v10210_v34, %v10841_v54 }
 0x2a9   : > { %v5983_v37 = vsel %vm778_vm1, %v5981_v43, %v5982_v17  ;;  %v7405_v42 = vcombine.low %v3911_v3, %v10880_v53  ;;  %v4215_v31 = vrot.slane %v4213_v18, 1  ;;  %v4354_v40 = vrot.slane %v10903_v52, 1 }
 0x2aa   : > { %4384 = vrot.lane.b32.xlu1 %v4349_v4, %s8471_s30  ;;  %v10941_v4 = vld [vmem:[#allocation2 + $0xb0] ss:$0 sps:$4 sm:$0x11]   ;;  %v5831_v11 = vsel %vm471_vm2, %v5826_v5, %v5830_v13  ;;  %v4209_v53 = vsel %vm471_vm2, %v4204_v8, %v4208_v51  ;;  %v5837_v5 = vrot.slane %v5835_v21, 1  ;;  %v5840_v13 = vshll.u32 %v10945_v27, 16 }
 0x2ab   : > { %v4218_v58 = vshll.u32 %v10941_v4, 16  ;;  %v10975_v36 = vcombine.low %v3880_v39, %v10966_v61  ;;  %v4399_v52 = vsel %vm869_vm3, %v10117_v56, %v10686_v25  ;;  %v4211_v18 = vshrl.u32 %v10927_v12, 16  ;;  %v3912_v21 = vld [vmem:[#allocation2 + $0xa8] sm:$0xe] }
 0x2ac   : > { %4258 = vrot.lane.b32.xlu0 %v4197_v19, %s8472_s6  ;;  %v10949_v35 = vpop.permute.xlu1 %4376  ;;  %v5985_v19 = vrot.slane %v10894_v49, 1  ;;  %v8442_v49 = vld [vmem:[%s11635_s3] sm:$0xff]   ;;  %v4403_v8 = vsel %vm869_vm3, %v10258_v20, %v10899_v55  ;;  %v4353_v51 = vrot.slane %v7405_v42, 1  ;;  %v5833_v56 = vshrl.u32 %v10937_v46, 16 }
 0x2ad   : > { %v4216_v3 = vor.u32 %v4215_v31, %v4211_v18  ;;  %v4220_v39 = vrot.slane %v4218_v58, 1  ;;  %v5842_v55 = vrot.slane %v5840_v13, 1  ;;  %v5545_v31 = vld [vmem:[#allocation2 + $0xb4] sm:$0xe]  ;;  %v11008_v58 = vsel %vm906_vm4, %v4399_v52, %v10620_v62 }
 0x2ae   : > { %5890 = vrot.lane.b32.xlu1 %v5819_v15, %s8472_s6  ;;  %v10957_v17 = vpop.permute.xlu0 %4858  ;;  %v10959_v15 = vld [vmem:[#allocation2 + $0xc4] sm:$0xf]  ;;  %v4355_v20 = vsel %vm778_vm1, %v4353_v51, %v4354_v40  ;;  %v5838_v54 = vor.u32 %v5837_v5, %v5833_v56  ;;  %v7537_v40 = vcombine.low %v5545_v31, %v10929_v10  ;;  %v11020_v13 = vsel %vm906_vm4, %v4405_v26, %v10742_v32 }
 0x2af   : > { %v10964_v43 = vcombine.low %v5512_v59, %v10959_v15  ;;  %v5514_v59 = vld [vmem:[#allocation2 + $0xcc] sm:$0xf]  ;;  %v4357_v18 = vrot.slane %v10941_v4, 1  ;;  %v5988_v10 = vrot.slane %v10945_v27, 1  ;;  %v4223_v4 = vshrl.u32 %v10975_v36, 16 }
 0x2b0   : > { %4386 = vrot.lane.b32.xlu0 %v4352_v63, %s8471_s30  ;;  %v5984_v63 = vrot.slane %v7536_v2, 1  ;;  %v10993_v2 = vld [vmem:[#allocation2 + $0xd0] sm:$0xf]  ;;  %v5987_v26 = vrot.slane %v7537_v40, 1 }
 0x2b1   : > { %v5847_v34 = vshll.u32 %v10964_v43, 16  ;;  %v11016_v5 = vcombine.low %v5514_v59, %v10993_v2  ;;  %v5845_v32 = vshrl.u32 %v10964_v43, 16  ;;  %v8440_v59 = vld [vmem:[#allocation2 + $0xd4] ss:$0 sps:$4 sm:$0x11]  }
 0x2b2   : > { %6018 = vrot.lane.b32.xlu1 %v5983_v37, %s8471_s30  ;;  %v5320_v37 = vsel %vm1683_vm0, %v10674_v47, 0  ;;  %v5986_v47 = vsel %vm778_vm1, %v5984_v63, %v5985_v19  ;;  %v6005_v42 = vpop.permute.xlu0 %6004  ;;  %v7406_v19 = vcombine.low %v3912_v21, %v10918_v7  ;;  %v11012_v63 = vsel %vm906_vm4, %v4403_v8, %v10829_v30 }
 0x2b3   : > { %v10991_v25 = vpop.permute.xlu1 %4984  ;;  %8021 = vmatpush3.bf16.msra.mxu1 %v5320_v37  ;;  %v4225_v37 = vshll.u32 %v10975_v36, 16  ;;  %v4221_v7 = vsel %vm471_vm2, %v4216_v3, %v4220_v39  ;;  %v5849_v62 = vrot.slane %v5847_v34, 1  ;;  %v5843_v30 = vsel %vm471_vm2, %v5838_v54, %v5842_v55 }
 0x2b4   : > { %5892 = vrot.lane.b32.xlu0 %v5831_v11, %s8472_s6  ;;  %v10996_v11 = vld [vmem:[#allocation2 + $0xc8] ss:$0 sps:$4 sm:$0x11]   ;;  %8022 = vmatprep.subr.bf16.mxu1 %v8442_v49  ;;  %v4356_v21 = vrot.slane %v7406_v19, 1  ;;  %v5989_v34 = vsel %vm778_vm1, %v5987_v26, %v5988_v10 }
 0x2b5   : > { %v5852_v52 = vshll.u32 %v10996_v11, 16  ;;  %v4227_v51 = vrot.slane %v4225_v37, 1  ;;  %v5850_v39 = vor.u32 %v5849_v62, %v5845_v32  ;;  %v3913_v37 = vld [vmem:[#allocation2 + $0xb4] sm:$0xe]  ;;  %v5864_v62 = vshll.u32 %v8440_v59, 16 }
 0x2b6   : > { %4260 = vrot.lane.b32.xlu1 %v4209_v53, %s8472_s6  ;;  %v11001_v53 = vld [vmem:[#allocation2 + $0xbc] ss:$0 sps:$4 sm:$0x11]   ;;  %v4375_v56 = vpop.permute.xlu0 %4374  ;;  %v4358_v3 = vsel %vm778_vm1, %v4356_v21, %v4357_v18  ;;  %v7407_v31 = vcombine.low %v3913_v37, %v10966_v61 }
 0x2b7   : > { %8023 = vmatpush3.bf16.msra.mxu1 %v8442_v49  ;;  %v5879_v8 = vpop.permute.xlu1 %5878  ;;  %v4230_v49 = vshll.u32 %v11001_v53, 16  ;;  %v5854_v27 = vrot.slane %v5852_v52, 1  ;;  %v4228_v54 = vor.u32 %v4227_v51, %v4223_v4  ;;  %v5547_v51 = vld [vmem:[#allocation2 + $0xcc] sm:$0xe] }
 0x2b8   : > { %6020 = vrot.lane.b32.xlu0 %v5986_v47, %s8471_s30  ;;  %v5859_v47 = vshll.u32 %v11016_v5, 16 }
 0x2b9   : > { %v4232_v55 = vrot.slane %v4230_v49, 1  ;;  %v5855_v52 = vsel %vm471_vm2, %v5850_v39, %v5854_v27  ;;  %v4360_v49 = vrot.slane %v11001_v53, 1 }
 0x2ba   : > { %4388 = vrot.lane.b32.xlu1 %v4355_v20, %s8471_s30  ;;  %v5546_v20 = vld [vmem:[#allocation2 + $0xc0] sm:$0xe]  ;;  %v5861_v18 = vrot.slane %v5859_v47, 1 }
 0x2bb   : > { %v7538_v19 = vcombine.low %v5546_v20, %v10959_v15  ;;  %v6039_v15 = vsel %vm869_vm3, %v10321_v44, %v5879_v8  ;;  %v4233_v61 = vsel %vm471_vm2, %v4228_v54, %v4232_v55  ;;  %v5866_v44 = vrot.slane %v5864_v62, 1 }
 0x2bc   : > { %4262 = vrot.lane.b32.xlu0 %v4221_v7, %s8472_s6  ;;  %v5857_v7 = vshrl.u32 %v11016_v5, 16  ;;  %v7539_v8 = vcombine.low %v5547_v51, %v10993_v2 }
 0x2bd   : > { %v5990_v26 = vrot.slane %v7538_v19, 1 }
 0x2be   : > { %5894 = vrot.lane.b32.xlu1 %v5843_v30, %s8472_s6  ;;  %v5991_v30 = vrot.slane %v10996_v11, 1  ;;  %v4359_v11 = vrot.slane %v7407_v31, 1  ;;  %v5862_v47 = vor.u32 %v5861_v18, %v5857_v7  ;;  %v11699_v31 = vld [vmem:[#allocation5_spill] sm:$0xff] }
 0x2c0   : > { %4390 = vrot.lane.b32.xlu0 %v4358_v3, %s8471_s30  ;;  %v4249_v40 = vpop.permute.xlu1 %4248  ;;  %v5992_v53 = vsel %vm778_vm1, %v5990_v26, %v5991_v30  ;;  %v4361_v3 = vsel %vm778_vm1, %v4359_v11, %v4360_v49  ;;  %v5867_v39 = vsel %vm471_vm2, %v5862_v47, %v5866_v44 }
 0x2c1   : > { %v4409_v10 = vsel %vm869_vm3, %v10356_v9, %v4249_v40 }
 0x2c2   : > { %6022 = vrot.lane.b32.xlu1 %v5989_v34, %s8471_s30  ;;  %v5877_v21 = vpop.permute.xlu0 %5876  ;;  %v11051_v32 = vsel %vm906_vm4, %v4409_v10, %v10949_v35  ;;  %v6071_v35 = vsel %vm906_vm4, %v6039_v15, %v10920_v38  ;;  %v5993_v38 = vrot.slane %v7539_v8, 1  ;;  %v5994_v34 = vrot.slane %v8440_v59, 1 }
 0x2c3   : > { %v6037_v9 = vsel %vm869_vm3, %v10374_v33, %v5877_v21  ;;  %v5019_v33 = vsel %vm869_vm3, %v10333_v60, %v10957_v17 }
 0x2c4   : > { %5896 = vrot.lane.b32.xlu0 %v5855_v52, %s8472_s6  ;;  %v6069_v4 = vsel %vm906_vm4, %v6037_v9, %v6005_v42  ;;  %v5051_v60 = vsel %vm906_vm4, %v5019_v33, %v10934_v28  ;;  %v11701_v9 = vld [vmem:[#allocation12_spill] sm:$0xff] }
 0x2c5   : > { %8068 = vmatprep.mubr.msk.bf16.mxu0 %vm1646_vm5, %v6069_v4 }
 0x2c6   : > { %4264 = vrot.lane.b32.xlu1 %v4233_v61, %s8472_s6  ;;  %8069 = vmatmul.mubr.msk.bf16.gmra.mxu0 %vm1646_vm5, %v6071_v35 }
 0x2c7   : > { %v4857_v2 = vpop.permute.xlu1 %4856 }
 0x2c8   : > { %6024 = vrot.lane.b32.xlu0 %v5992_v53, %s8471_s30  ;;  %v5017_v42 = vsel %vm869_vm3, %v10385_v14, %v4857_v2  ;;  %v4247_v27 = vpop.permute.xlu0 %4246  ;;  %v5995_v14 = vsel %vm778_vm1, %v5993_v38, %v5994_v34 }
 0x2c9   : > { %v4407_v20 = vsel %vm869_vm3, %v10396_v57, %v4247_v27  ;;  %v5049_v54 = vsel %vm906_vm4, %v5017_v42, %v10991_v25 }
 0x2ca   : > { %4392 = vrot.lane.b32.xlu1 %v4361_v3, %s8471_s30  ;;  %7997 = vmatmul.mubr.msk.bf16.gmra.mxu1 %vm1646_vm5, %v5049_v54  ;;  %v11080_v17 = vsel %vm906_vm4, %v4407_v20, %v4375_v56  ;;  %v11703_v54 = vld [vmem:[#allocation8_spill] sm:$0xff] }
 0x2cb   : > { %8000 = vmatprep.mubr.msk.bf16.mxu1 %vm1646_vm5, %v5051_v60 }
 0x2cc   : > { %v4991_v59 = vpop.permute.xlu0 %4990  ;;  %v4989_v57 = vpop.permute.xlu1 %4988 }
 0x2ce   : > { %5898 = vrot.lane.b32.xlu1 %v5867_v39, %s8472_s6  ;;  %v11702_v39 = vld [vmem:[#allocation9_spill] sm:$0xff] }
 0x2d0   : > { %v4863_v55 = vpop.permute.xlu0 %4862 }
 0x2d1   : > { %v5023_v19 = vsel %vm869_vm3, %v10464_v16, %v4863_v55  ;;  %v11700_v16 = vld [vmem:[#allocation11_spill] sm:$0xff] }
 0x2d2   : > { %6026 = vrot.lane.b32.xlu1 %v5995_v14, %s8471_s30  ;;  %v5055_v18 = vsel %vm906_vm4, %v5023_v19, %v4991_v59  ;;  %v11705_v59 = vld [vmem:[#allocation16_spill] sm:$0xff]  ;;  %v11706_v19 = vld [vmem:[#allocation6_spill] sm:$0xff] }
 0x2d6   : > { %v5883_v25 = vpop.permute.xlu1 %5882 }
 0x2d9   : > { %v5881_v37 = vpop.permute.xlu0 %5880 }
 0x2da   : > { %v6041_v27 = vsel %vm869_vm3, %v11702_v39, %v5881_v37 }
 0x2de   : > { %v4861_v28 = vpop.permute.xlu1 %4860  ;;  %v4995_v40 = vpop.permute.xlu0 %4994 }
 0x2df   : > { %v5021_v56 = vsel %vm869_vm3, %v11699_v31, %v4861_v28  ;;  %v11707_v31 = vld [vmem:[#allocation7_spill] sm:$0xff] }
 0x2e0   : > { %v5053_v7 = vsel %vm906_vm4, %v5021_v56, %v4989_v57  ;;  %v6043_v56 = vsel %vm869_vm3, %v11707_v31, %v5883_v25  ;;  %v11710_v25 = vld [vmem:[#allocation14_spill] sm:$0xff] }
 0x2e1   : > { %8001 = vmatmul.mubr.msk.bf16.gmra.mxu1 %vm1646_vm5, %v5053_v7 }
 0x2e2   : > { %v4993_v62 = vpop.permute.xlu1 %4992  ;;  %8004 = vmatprep.mubr.msk.bf16.mxu1 %vm1646_vm5, %v5055_v18 }
 0x2e6   : > { %v4867_v52 = vpop.permute.xlu0 %4866 }
 0x2e7   : > { %v5027_v10 = vsel %vm869_vm3, %v10558_v23, %v4867_v52  ;;  %v11708_v52 = vld [vmem:[#allocation17_spill] sm:$0xff] }
 0x2e8   : > { %v4865_v30 = vpop.permute.xlu1 %4864  ;;  %v5059_v15 = vsel %vm906_vm4, %v5027_v10, %v4995_v40 }
 0x2e9   : > { %v5025_v51 = vsel %vm869_vm3, %v11700_v16, %v4865_v30  ;;  %v11709_v16 = vld [vmem:[#allocation13_spill] sm:$0xff] }
 0x2ea   : > { %v5057_v61 = vsel %vm906_vm4, %v5025_v51, %v4993_v62  ;;  %v4999_v49 = vpop.permute.xlu0 %4998 }
 0x2eb   : > { %8005 = vmatmul.mubr.msk.bf16.gmra.mxu1 %vm1646_vm5, %v5057_v61  ;;  %v11711_v61 = vld [vmem:[#allocation4_spill] sm:$0xff] }
 0x2ec   : > { %v4997_v21 = vpop.permute.xlu1 %4996  ;;  %8008 = vmatprep.mubr.msk.bf16.mxu1 %vm1646_vm5, %v5059_v15 }
 0x2ee   : > { %v4871_v26 = vpop.permute.xlu0 %4870 }
 0x2ef   : > { %v5031_v4 = vsel %vm869_vm3, %v11701_v9, %v4871_v26 }
 0x2f0   : > { %v4869_v11 = vpop.permute.xlu1 %4868  ;;  %v5063_v47 = vsel %vm906_vm4, %v5031_v4, %v4999_v49  ;;  %v4401_v49 = vsel %vm869_vm3, %v11711_v61, %v11710_v25 }
 0x2f1   : > { %v5029_v23 = vsel %vm869_vm3, %v10601_v1, %v4869_v11  ;;  %v11712_v11 = vld [vmem:[#allocation10_spill] sm:$0xff] }
 0x2f2   : > { %v5061_v44 = vsel %vm906_vm4, %v5029_v23, %v4997_v21  ;;  %v5003_v8 = vpop.permute.xlu0 %5002  ;;  %v4433_v9 = vsel %vm906_vm4, %v4401_v49, %v11712_v11 }
 0x2f3   : > { %8009 = vmatmul.mubr.msk.bf16.gmra.mxu1 %vm1646_vm5, %v5061_v44 }
 0x2f4   : > { %v5001_v53 = vpop.permute.xlu1 %5000  ;;  %8012 = vmatprep.mubr.msk.bf16.mxu1 %vm1646_vm5, %v5063_v47 }
 0x2f6   : > { %v4875_v35 = vpop.permute.xlu0 %4874 }
 0x2f7   : > { %v5035_v33 = vsel %vm869_vm3, %v10618_v41, %v4875_v35 }
 0x2f8   : > { %v4873_v3 = vpop.permute.xlu1 %4872  ;;  %v5067_v1 = vsel %vm906_vm4, %v5035_v33, %v5003_v8 }
 0x2f9   : > { %v5033_v2 = vsel %vm869_vm3, %v10625_v29, %v4873_v3  ;;  %v11704_v29 = vld [vmem:[#allocation3_spill] sm:$0xff] }
 0x2fa   : > { %v5065_v42 = vsel %vm906_vm4, %v5033_v2, %v5001_v53  ;;  %v6009_v38 = vpop.permute.xlu0 %6008  ;;  %v4395_v60 = vsel %vm869_vm3, %v11704_v29, %v11703_v54  ;;  %v11713_v2 = vld [vmem:[#allocation15_spill] sm:$0xff] }
 0x2fb   : > { %8013 = vmatmul.mubr.msk.bf16.gmra.mxu1 %vm1646_vm5, %v5065_v42  ;;  %v6073_v34 = vsel %vm906_vm4, %v6041_v27, %v6009_v38  ;;  %v4427_v28 = vsel %vm906_vm4, %v4395_v60, %v11706_v19 }
 0x2fc   : > { %8016 = vmatprep.mubr.msk.bf16.mxu1 %vm1646_vm5, %v5067_v1  ;;  %v5005_v20 = vpop.permute.xlu1 %5004  ;;  %8072 = vmatprep.mubr.msk.bf16.mxu0 %vm1646_vm5, %v6073_v34  ;;  %v11714_v34 = vld [vmem:[#allocation18_spill] sm:$0xff] }
 0x2fe   : > { %v4251_v41 = vpop.permute.xlu0 %4250 }
 0x2ff   : > { %v4411_v1 = vsel %vm869_vm3, %v11713_v2, %v4251_v41 }
 0x300   : > { %v4877_v14 = vpop.permute.xlu1 %4876 }
 0x301   : > { %v5037_v57 = vsel %vm869_vm3, %v11705_v59, %v4877_v14 }
 0x302   : > { %v5069_v55 = vsel %vm906_vm4, %v5037_v57, %v5005_v20  ;;  %v4379_v37 = vpop.permute.xlu0 %4378 }
 0x303   : > { %8017 = vmatmul.mubr.msk.bf16.gmra.mxu1 %vm1646_vm5, %v5069_v55  ;;  %v4443_v42 = vsel %vm906_vm4, %v4411_v1, %v4379_v37 }
 0x304   : > { %v6011_v40 = vpop.permute.xlu1 %6010  ;;  %8024 = vmatprep.mubr.msk.bf16.mxu1 %vm1646_vm5, %v4427_v28 }
 0x305   : > { %v6075_v7 = vsel %vm906_vm4, %v6043_v56, %v6011_v40 }
 0x306   : > { %8073 = vmatmul.mubr.msk.bf16.gmra.mxu0 %vm1646_vm5, %v6075_v7  ;;  %v5885_v18 = vpop.permute.xlu0 %5884 }
 0x307   : > { %v6045_v30 = vsel %vm869_vm3, %v11708_v52, %v5885_v18 }
 0x308   : > { %v4253_v62 = vpop.permute.xlu1 %4252 }
 0x309   : > { %v4413_v20 = vsel %vm869_vm3, %v11714_v34, %v4253_v62 }
 0x30a   : > { %v6013_v10 = vpop.permute.xlu0 %6012 }
 0x30b   : > { %8025 = vmatmul.mubr.msk.bf16.vlgmr.msra.gmra.mxu1 %vm1646_vm5, %v11709_v16  ;;  %v6077_v51 = vsel %vm906_vm4, %v6045_v30, %v6013_v10 }
 0x30c   : > { %v4381_v15 = vpop.permute.xlu1 %4380  ;;  %8028 = vmatprep.mubr.msk.bf16.mxu1 %vm1646_vm5, %v11008_v58  ;;  %8076 = vmatprep.mubr.msk.bf16.mxu0 %vm1646_vm5, %v6077_v51 }
 0x30e   : > { %v4255_v21 = vpop.permute.xlu0 %4254 }
 0x30f   : > { %v4415_v41 = vsel %vm869_vm3, %v10740_v6, %v4255_v21  ;;  %v11715_v6 = vld [vmem:[#allocation19_spill] sm:$0xff] }
 0x310   : > { %v5887_v26 = vpop.permute.xlu1 %5886 }
 0x311   : > { %v6047_v23 = vsel %vm869_vm3, %v10769_v50, %v5887_v26 }
 0x312   : > { %v4383_v4 = vpop.permute.xlu0 %4382 }
 0x313   : > { %8029 = vmatmul.mubr.msk.bf16.gmra.mxu1 %vm1646_vm5, %v4433_v9  ;;  %v4447_v54 = vsel %vm906_vm4, %v4415_v41, %v4383_v4 }
 0x314   : > { %v6015_v47 = vpop.permute.xlu1 %6014  ;;  %8032 = vmatprep.mubr.msk.bf16.mxu1 %vm1646_vm5, %v11012_v63 }
 0x315   : > { %v6079_v58 = vsel %vm906_vm4, %v6047_v23, %v6015_v47 }
 0x316   : > { %8077 = vmatmul.mubr.msk.bf16.gmra.mxu0 %vm1646_vm5, %v6079_v58  ;;  %v5889_v44 = vpop.permute.xlu0 %5888 }
 0x317   : > { %v6049_v53 = vsel %vm869_vm3, %v10795_v24, %v5889_v44 }
 0x318   : > { %v4257_v8 = vpop.permute.xlu1 %4256 }
 0x319   : > { %v4417_v55 = vsel %vm869_vm3, %v11715_v6, %v4257_v8 }
 0x31a   : > { %v6017_v35 = vpop.permute.xlu0 %6016 }
 0x31b   : > { %8033 = vmatmul.mubr.msk.bf16.gmra.mxu1 %vm1646_vm5, %v11020_v13  ;;  %v6081_v3 = vsel %vm906_vm4, %v6049_v53, %v6017_v35 }
 0x31c   : > { %v4385_v50 = vpop.permute.xlu1 %4384  ;;  %8036 = vmatprep.mubr.msk.bf16.mxu1 %vm1646_vm5, %v11080_v17  ;;  %8080 = vmatprep.mubr.msk.bf16.mxu0 %vm1646_vm5, %v6081_v3 }
 0x31e   : > { %v4259_v63 = vpop.permute.xlu0 %4258 }
 0x31f   : > { %v4419_v37 = vsel %vm869_vm3, %v10835_v45, %v4259_v63 }
 0x320   : > { %v5891_v33 = vpop.permute.xlu1 %5890 }
 0x321   : > { %v6051_v13 = vsel %vm869_vm3, %v10851_v48, %v5891_v33 }
 0x322   : > { %v4387_v24 = vpop.permute.xlu0 %4386 }
 0x323   : > { %8037 = vmatmul.mubr.msk.bf16.gmra.mxu1 %vm1646_vm5, %v11051_v32  ;;  %v4445_v32 = vsel %vm906_vm4, %v4413_v20, %v4381_v15  ;;  %v4451_v19 = vsel %vm906_vm4, %v4419_v37, %v4387_v24  ;;  %v7561_v20 = vld [vmem:[%s8531_s27 + $0x24] sm:$0xff]   ;;  %v7560_v37 = vld [vmem:[%s8531_s27 + $0x20] sm:$0x1] }
 0x324   : > { %v6019_v39 = vpop.permute.xlu1 %6018  ;;  %8040 = vmatprep.mubr.msk.bf16.mxu1 %vm1646_vm5, %v4443_v42 }
 0x325   : > { %v6083_v17 = vsel %vm906_vm4, %v6051_v13, %v6019_v39 }
 0x326   : > { %8081 = vmatmul.mubr.msk.bf16.gmra.mxu0 %vm1646_vm5, %v6083_v17  ;;  %v5893_v27 = vpop.permute.xlu0 %5892 }
 0x327   : > { %v6053_v48 = vsel %vm869_vm3, %v10868_v22, %v5893_v27  ;;  %v4449_v22 = vsel %vm906_vm4, %v4417_v55, %v4385_v50  ;;  %v7563_v55 = vld [vmem:[%s8531_s27 + $0x2c] sm:$0x1] }
 0x328   : > { %v4261_v38 = vpop.permute.xlu1 %4260 }
 0x329   : > { %v4421_v45 = vsel %vm869_vm3, %v10888_v0, %v4261_v38 }
 0x32a   : > { %v6021_v29 = vpop.permute.xlu0 %6020 }
 0x32b   : > { %8041 = vmatmul.mubr.msk.bf16.gmra.mxu1 %vm1646_vm5, %v4445_v32  ;;  %v6085_v60 = vsel %vm906_vm4, %v6053_v48, %v6021_v29  ;;  %v6383_v29 = vunpack.c.l.bf16 %v7561_v20 }
 0x32c   : > { %v4389_v14 = vpop.permute.xlu1 %4388  ;;  %8044 = vmatprep.mubr.msk.bf16.mxu1 %vm1646_vm5, %v4447_v54  ;;  %8084 = vmatprep.mubr.msk.bf16.mxu0 %vm1646_vm5, %v6085_v60  ;;  %v7742_v54 = vld [vmem:[%s8531_s27 + $0x18] sm:$0xff]   ;;  %v6384_v60 = vunpack.c.h.bf16 %v7561_v20 }
 0x32d   : > { %v4453_v52 = vsel %vm906_vm4, %v4421_v45, %v4389_v14  ;;  %v7712_v14 = vunpack.c.l.bf16 %v7742_v54  ;;  %v7713_v6 = vunpack.c.h.bf16 %v7742_v54  ;;  %v6382_v45 = vunpack.c.l.bf16 %v7560_v37 }
 0x32e   : > { %v4263_v59 = vpop.permute.xlu0 %4262 }
 0x32f   : > { %v4423_v62 = vsel %vm869_vm3, %v10927_v12, %v4263_v59 }
 0x330   : > { %v5895_v57 = vpop.permute.xlu1 %5894 }
 0x331   : > { %v6055_v31 = vsel %vm869_vm3, %v10937_v46, %v5895_v57 }
 0x332   : > { %v4391_v28 = vpop.permute.xlu0 %4390 }
 0x333   : > { %8045 = vmatmul.mubr.msk.bf16.gmra.mxu1 %vm1646_vm5, %v4449_v22  ;;  %v4455_v30 = vsel %vm906_vm4, %v4423_v62, %v4391_v28  ;;  %v7567_v22 = vld [vmem:[%s8531_s27 + $0x3c] sm:$0xff]   ;;  %v7569_v62 = vld [vmem:[%s8531_s27 + $0x44] sm:$0x1] }
 0x334   : > { %v6023_v56 = vpop.permute.xlu1 %6022  ;;  %8048 = vmatprep.mubr.msk.bf16.mxu1 %vm1646_vm5, %v4451_v19  ;;  %v7743_v19 = vld [vmem:[%s8531_s27 + $0x30] sm:$0xff]  }
 0x335   : > { %v6087_v40 = vsel %vm906_vm4, %v6055_v31, %v6023_v56  ;;  %v6521_v56 = vrot.slane %v6383_v29, 1  ;;  %v7744_v29 = vld [vmem:[%s8531_s27 + $0x48] sm:$0xff]  }
 0x336   : > { %8085 = vmatmul.mubr.msk.bf16.gmra.mxu0 %vm1646_vm5, %v6087_v40  ;;  %v5897_v7 = vpop.permute.xlu0 %5896  ;;  %v6522_v40 = vrot.slane %v6384_v60, 1  ;;  %v7575_v60 = vld [vmem:[%s8531_s27 + $0x5c] sm:$0x1] }
 0x337   : > { %v6057_v46 = vsel %vm869_vm3, %v10964_v43, %v5897_v7  ;;  %v6516_v7 = vrot.slane %v7712_v14, 1 }
 0x338   : > { %v4265_v18 = vpop.permute.xlu1 %4264  ;;  %v11308_v14 = vsel %vm778_vm1, %v6521_v56, %v6522_v40 }
 0x339   : > { %v4425_v12 = vsel %vm869_vm3, %v10975_v36, %v4265_v18  ;;  %v6385_v18 = vunpack.c.l.bf16 %v7563_v55  ;;  %v6519_v55 = vrot.slane %v6382_v45, 1 }
 0x33a   : > { %v6025_v10 = vpop.permute.xlu0 %6024 }
 0x33b   : > { %8049 = vmatmul.mubr.msk.bf16.gmra.mxu1 %vm1646_vm5, %v4453_v52  ;;  %v6089_v16 = vsel %vm906_vm4, %v6057_v46, %v6025_v10  ;;  %v7566_v52 = vld [vmem:[%s8531_s27 + $0x38] sm:$0x1]  ;;  %v6517_v10 = vrot.slane %v7713_v6, 1  ;;  %v6524_v6 = vrot.slane %v6385_v18, 1 }
 0x33c   : > { %v4393_v51 = vpop.permute.xlu1 %4392  ;;  %8052 = vmatprep.mubr.msk.bf16.mxu1 %vm1646_vm5, %v4455_v30  ;;  %8088 = vmatprep.mubr.msk.bf16.mxu0 %vm1646_vm5, %v6089_v16  ;;  %v7573_v30 = vld [vmem:[%s8531_s27 + $0x54] sm:$0xff]   ;;  %v6389_v16 = vunpack.c.l.bf16 %v7567_v22 }
 0x33d   : > { %v4457_v15 = vsel %vm906_vm4, %v4425_v12, %v4393_v51  ;;  %v6390_v51 = vunpack.c.h.bf16 %v7567_v22  ;;  %v7717_v12 = vunpack.c.h.bf16 %v7743_v19  ;;  %v6395_v20 = vunpack.c.l.bf16 %v7573_v30 }
 0x33e   : > { %v6396_v54 = vunpack.c.h.bf16 %v7573_v30  ;;  %v11313_v22 = vsel %vm778_vm1, %v6516_v7, %v6517_v10 }
 0x33f   : > { %v6527_v30 = vrot.slane %v7717_v12, 1  ;;  %v6541_v7 = vrot.slane %v6395_v20, 1 }
 0x340   : > { %v5899_v0 = vpop.permute.xlu1 %5898 }
 0x341   : > { %v6059_v43 = vsel %vm869_vm3, %v11016_v5, %v5899_v0  ;;  %v7716_v0 = vunpack.c.l.bf16 %v7743_v19  ;;  %v6531_v19 = vrot.slane %v6389_v16, 1  ;;  %v11324_v16 = vsel %vm778_vm1, %v6522_v40, %v6524_v6 }
 0x343   : > { %8053 = vmatmul.mubr.msk.bf16.gmra.mxu1 %vm1646_vm5, %v4457_v15 }
 0x344   : > { %v6027_v25 = vpop.permute.xlu1 %6026 }
 0x345   : > { %v6091_v61 = vsel %vm906_vm4, %v6059_v43, %v6027_v25  ;;  %v6391_v25 = vunpack.c.l.bf16 %v7569_v62  ;;  %v6526_v62 = vrot.slane %v7716_v0, 1 }
 0x346   : > { %8089 = vmatmul.mubr.msk.bf16.gmra.mxu0 %vm1646_vm5, %v6091_v61  ;;  %v6388_v61 = vunpack.c.l.bf16 %v7566_v52  ;;  %v7572_v52 = vld [vmem:[%s8531_s27 + $0x50] sm:$0x1] }
 0x347   : > { %v6534_v45 = vrot.slane %v6391_v25, 1 }
 0x34f   : > { %v11218_v49 = vpop.f32.mrf.mxu1 }
 0x350   : > { %v11242_v8 = vpop.f32.mrf.mxu0 }
 0x351   : > { %v11220_v21 = vpop.f32.mrf.mxu1 }
 0x352   : > { %v11248_v3 = vpop.f32.mrf.mxu0 }
 0x353   : > { %v11222_v26 = vpop.f32.mrf.mxu1 }
 0x354   : > { %v11254_v33 = vpop.f32.mrf.mxu0 }
 0x355   : > { %v11224_v11 = vpop.f32.mrf.mxu1 }
 0x356   : > { %v11260_v42 = vpop.f32.mrf.mxu0 }
 0x362   : > { %v11264_v13 = vpop.f32.mrf.mxu0 }
 0x363   : > { %v11226_v36 = vpop.f32.mrf.mxu1 }
 0x364   : > { %v11270_v27 = vpop.f32.mrf.mxu0 }
 0x365   : > { %v11228_v9 = vpop.f32.mrf.mxu1 }
 0x366   : > { %v11277_v41 = vpop.f32.mrf.mxu0 }
 0x367   : > { %v11230_v4 = vpop.f32.mrf.mxu1 }
 0x368   : > { %v11284_v59 = vpop.f32.mrf.mxu0 }
 0x369   : > { %v11232_v5 = vpop.f32.mrf.mxu1 }
 0x386   : > { %v11292_v28 = vpop.f32.mrf.mxu0 }
 0x388   : > { %v11301_v15 = vpop.f32.mrf.mxu0 }
 0x38a   : > { %v11234_v23 = vpop.f32.mrf.mxu1  ;;  %v11319_v56 = vpop.f32.mrf.mxu0 }
 0x38c   : > { %v11236_v47 = vpop.f32.mrf.mxu1  ;;  %v11335_v6 = vpop.f32.mrf.mxu0 }
 0x38e   : > { %v11238_v58 = vpop.f32.mrf.mxu1 }
 0x390   : > { %v11240_v44 = vpop.f32.mrf.mxu1 }
 0x3a1   : > { %v11244_v53 = vpop.f32.mrf.mxu1 }
 0x3a3   : > { %v11246_v35 = vpop.f32.mrf.mxu1 }
 0x3a5   : > { %v11250_v50 = vpop.f32.mrf.mxu1 }
 0x3a6   : > { %11716 = vst [vmem:[#allocation5_spill] sm:$0xff] %v11250_v50 }
 0x3a7   : > { %v11252_v63 = vpop.f32.mrf.mxu1 }
 0x3a8   : > { %11717 = vst [vmem:[#allocation11_spill] sm:$0xff] %v11252_v63 }
 0x3ab   : > { %v11256_v2 = vpop.f32.mrf.mxu1 }
 0x3ac   : > { %11718 = vst [vmem:[#allocation12_spill] sm:$0xff] %v11256_v2 }
 0x3ad   : > { %v11258_v1 = vpop.f32.mrf.mxu1 }
 0x3ae   : > { %11719 = vst [vmem:[#allocation9_spill] sm:$0xff] %v11258_v1 }
 0x3af   : > { %v11262_v24 = vpop.f32.mrf.mxu1 }
 0x3b0   : > { %11720 = vst [vmem:[#allocation8_spill] sm:$0xff] %v11262_v24 }
 0x3b1   : > { %v11266_v39 = vpop.f32.mrf.mxu1 }
 0x3b2   : > { %11721 = vst [vmem:[#allocation3_spill] sm:$0xff] %v11266_v39 }
 0x3b3   : > { %v11268_v17 = vpop.f32.mrf.mxu1 }
 0x3b4   : > { %11722 = vst [vmem:[#allocation16_spill] sm:$0xff] %v11268_v17 }
 0x3b5   : > { %v11272_v38 = vpop.f32.mrf.mxu1 }
 0x3b6   : > { %11723 = vst [vmem:[#allocation6_spill] sm:$0xff] %v11272_v38  ;;  %v6542_v38 = vrot.slane %v6396_v54, 1  ;;  %v7578_v54 = vld [vmem:[%s8531_s27 + $0x68] sm:$0x1] }
 0x3b7   : > { %v11274_v34 = vpop.f32.mrf.mxu1 }
 0x3b8   : > { %11724 = vst [vmem:[#allocation7_spill] sm:$0xff] %v11274_v34  ;;  %v7581_v34 = vld [vmem:[%s8531_s27 + $0x74] sm:$0x1] }
 0x3b9   : > { %v11279_v32 = vpop.f32.mrf.mxu1  ;;  %v6403_v24 = vunpack.c.l.bf16 %v7581_v34 }
 0x3ba   : > { %11725 = vst [vmem:[#allocation17_spill] sm:$0xff] %v11279_v32  ;;  %v7745_v32 = vld [vmem:[%s8531_s27 + $0x60] sm:$0xff]  }
 0x3bb   : > { %v11282_v48 = vpop.f32.mrf.mxu1  ;;  %v7725_v39 = vunpack.c.h.bf16 %v7745_v32 }
 0x3bc   : > { %11726 = vst [vmem:[#allocation13_spill] sm:$0xff] %v11282_v48  ;;  %v6397_v48 = vunpack.c.l.bf16 %v7575_v60  ;;  %v7724_v60 = vunpack.c.l.bf16 %v7745_v32  ;;  %v11347_v32 = vsel %vm778_vm1, %v6541_v7, %v6542_v38  ;;  %v6400_v7 = vunpack.c.l.bf16 %v7578_v54 }
 0x3bd   : > { %v11286_v57 = vpop.f32.mrf.mxu1 }
 0x3be   : > { %11727 = vst [vmem:[#allocation14_spill] sm:$0xff] %v11286_v57  ;;  %v7721_v57 = vunpack.c.h.bf16 %v7744_v29  ;;  %v6544_v40 = vrot.slane %v6397_v48, 1 }
 0x3bf   : > { %v11294_v31 = vpop.f32.mrf.mxu1 }
 0x3c0   : > { %11728 = vst [vmem:[#allocation4_spill] sm:$0xff] %v11294_v31  ;;  %v7720_v31 = vunpack.c.l.bf16 %v7744_v29  ;;  %v11329_v29 = vsel %vm778_vm1, %v6517_v10, %v6519_v55  ;;  %v6537_v20 = vrot.slane %v7721_v57, 1 }
 0x3c1   : > { %v11299_v46 = vpop.f32.mrf.mxu1 }
 0x3c2   : > { %11729 = vst [vmem:[#allocation10_spill] sm:$0xff] %v11299_v46  ;;  %v7579_v46 = vld [vmem:[%s8531_s27 + $0x6c] sm:$0xff]  }
 0x3c3   : > { %v11303_v43 = vpop.f32.mrf.mxu1  ;;  %v6401_v0 = vunpack.c.l.bf16 %v7579_v46  ;;  %v6402_v12 = vunpack.c.h.bf16 %v7579_v46 }
 0x3c4   : > { %11730 = vst [vmem:[#allocation15_spill] sm:$0xff] %v11303_v43  ;;  %v6532_v43 = vrot.slane %v6390_v51, 1  ;;  %v6394_v51 = vunpack.c.l.bf16 %v7572_v52  ;;  %v11338_v52 = vsel %vm778_vm1, %v6526_v62, %v6527_v30 }
 0x3c5   : > { %v11310_v37 = vpop.f32.mrf.mxu1  ;;  %v6551_v48 = vrot.slane %v6401_v0, 1  ;;  %v6552_v55 = vrot.slane %v6402_v12, 1  ;;  %v11365_v0 = vsel %vm778_vm1, %v6542_v38, %v6544_v40 }
 0x3c6   : > { %11731 = vst [vmem:[#allocation18_spill] sm:$0xff] %v11310_v37  ;;  %v6529_v37 = vrot.slane %v6388_v61, 1  ;;  %v11332_v25 = vsel %vm778_vm1, %v6531_v19, %v6532_v43  ;;  %v6536_v61 = vrot.slane %v7720_v31, 1  ;;  %v11341_v10 = vsel %vm778_vm1, %v6532_v43, %v6534_v45  ;;  %v7585_v19 = vld [vmem:[%s8531_s27 + $0x84] sm:$0xff]   ;;  %v11357_v43 = vld [vmem:[%s11636_s4] ss:$0 sm:$0xff] }
 0x3c7   : > { %v11321_v18 = vpop.f32.mrf.mxu1  ;;  %v6539_v57 = vrot.slane %v6394_v51, 1  ;;  %v6554_v45 = vrot.slane %v6403_v24, 1  ;;  %v6408_v2 = vunpack.c.h.bf16 %v7585_v19 }
 0x3c8   : > { %11732 = vst [vmem:[#allocation19_spill] sm:$0xff] %v11321_v18  ;;  %v11344_v34 = vsel %vm778_vm1, %v6527_v30, %v6529_v37  ;;  %v11352_v18 = vpop.f32.mrf.mxu0  ;;  %v6546_v37 = vrot.slane %v7724_v60, 1  ;;  %v6547_v30 = vrot.slane %v7725_v39, 1  ;;  %v11362_v51 = vsel %vm778_vm1, %v6536_v61, %v6537_v20 }
 0x3c9   : > { %v11326_v17 = vpop.f32.mrf.mxu1  ;;  %v11371_v39 = vsel %vm778_vm1, %v6537_v20, %v6539_v57  ;;  %v11376_v61 = vsel %vm778_vm1, %v6551_v48, %v6552_v55  ;;  %v7584_v57 = vld [vmem:[%s8531_s27 + $0x80] sm:$0x1] }
 0x3ca   : > { %11733 = vst [vmem:[#allocation20_spill] sm:$0xff] %v11326_v17  ;;  %v7746_v17 = vld [vmem:[%s8531_s27 + $0x78] sm:$0xff]   ;;  %v11373_v60 = vpop.f32.mrf.mxu0  ;;  %v11379_v40 = vsel %vm778_vm1, %v6546_v37, %v6547_v30 }
 0x3cb   : > { %v8026_v46 = vpop.f32.mrf.mxu1  ;;  %v7728_v63 = vunpack.c.l.bf16 %v7746_v17  ;;  %v7729_v50 = vunpack.c.h.bf16 %v7746_v17  ;;  %v11382_v17 = vsel %vm778_vm1, %v6552_v55, %v6554_v45 }
 0x3cc   : > { %v5365_v31 = vadd.f32 %v8026_v46, %v11218_v49  ;;  %v6407_v46 = vunpack.c.l.bf16 %v7585_v19 }
 0x3cd   : > { %v5356_v62 = vpop.f32.mrf.mxu1  ;;  %v6556_v37 = vrot.slane %v7728_v63, 1 }
 0x3ce   : > { %v6302_v1 = vadd.f32 %v11242_v8, %v5365_v31  ;;  %v5357_v49 = vadd.f32 %v5356_v62, %v11220_v21  ;;  %v7587_v31 = vld [vmem:[%s8531_s27 + $0x8c] sm:$0x1]  ;;  %v6561_v19 = vrot.slane %v6407_v46, 1  ;;  %v6562_v62 = vrot.slane %v6408_v2, 1 }
 0x3cf   : > { %v8027_v12 = vpop.f32.mrf.mxu1  ;;  %v6409_v63 = vunpack.c.l.bf16 %v7587_v31  ;;  %v6406_v2 = vunpack.c.l.bf16 %v7584_v57 }
 0x3d0   : > { %v6437_v24 = vadd.f32 %v11357_v43, %v6302_v1  ;;  %v6300_v8 = vadd.f32 %v11248_v3, %v5357_v49  ;;  %v5368_v21 = vadd.f32 %v8027_v12, %v11222_v26  ;;  %v6549_v1 = vrot.slane %v6400_v7, 1  ;;  %v11394_v7 = vpop.f32.mrf.mxu0 }
 0x3d1   : > { %v5359_v38 = vpop.f32.mrf.mxu1  ;;  %v6557_v49 = vrot.slane %v7729_v50, 1  ;;  %v6564_v57 = vrot.slane %v6409_v63, 1 }
 0x3d2   : > { %v6630_v3 = vadd.f32 %v11308_v14, %v6437_v24  ;;  %v6435_v26 = vadd.f32 %v11357_v43, %v6300_v8  ;;  %v6303_v20 = vadd.f32 %v11254_v33, %v5368_v21  ;;  %v5360_v54 = vadd.f32 %v5359_v38, %v11224_v11 }
 0x3d3   : > { %v8030_v48 = vpop.f32.mrf.mxu1  ;;  %v11403_v50 = vsel %vm778_vm1, %v6547_v30, %v6549_v1  ;;  %v11413_v30 = vsel %vm778_vm1, %v6556_v37, %v6557_v49 }
 0x3d4   : > { %v6662_v12 = vmax.f32 %v6630_v3, 0.0  ;;  %v6628_v55 = vadd.f32 %v11313_v22, %v6435_v26  ;;  %v6438_v45 = vadd.f32 %v11357_v43, %v6303_v20  ;;  %v6301_v14 = vadd.f32 %v11260_v42, %v5360_v54  ;;  %v7591_v20 = vld [vmem:[%s8531_s27 + $0x9c] sm:$0xff]  }
 0x3d5   : > { %v5381_v11 = vadd.f32 %v8030_v48, %v11226_v36  ;;  %v5372_v33 = vpop.f32.mrf.mxu1  ;;  %v11410_v36 = vsel %vm778_vm1, %v6561_v19, %v6562_v62  ;;  %v6559_v48 = vrot.slane %v6406_v2, 1  ;;  %v7747_v2 = vld [vmem:[%s8531_s27 + $0x90] sm:$0xff]  }
 0x3d6   : > { %v7680_v22 = vpack.c.bf16 %v6662_v12, %v6662_v12  ;;  %v6660_v46 = vmax.f32 %v6628_v55, 0.0  ;;  %v6631_v42 = vadd.f32 %v11324_v16, %v6438_v45  ;;  %v6436_v24 = vadd.f32 %v11357_v43, %v6301_v14 }
 0x3d7   : > { %v6306_v8 = vadd.f32 %v11264_v13, %v5381_v11  ;;  %v5373_v21 = vadd.f32 %v5372_v33, %v11228_v9  ;;  %v8031_v38 = vpop.f32.mrf.mxu1  ;;  %v11420_v13 = vpop.f32.mrf.mxu0  ;;  %v6413_v14 = vunpack.c.l.bf16 %v7591_v20  ;;  %v6414_v11 = vunpack.c.h.bf16 %v7591_v20 }
 0x3d8   : > { %6822 = vst.msk [vmem:[%s11399_s25 + $0x8] sm:$0xf] %vm3591_vm6, %v7680_v22  ;;  %v7678_v1 = vpack.c.bf16 %v6660_v46, %v6660_v46  ;;  %v6663_v3 = vmax.f32 %v6631_v42, 0.0  ;;  %v6629_v16 = vadd.f32 %v11329_v29, %v6436_v24  ;;  %v5384_v26 = vadd.f32 %v8031_v38, %v11230_v4  ;;  %v7593_v38 = vld [vmem:[%s8531_s27 + $0xa4] sm:$0x1] }
 0x3d9   : > { %v6441_v9 = vadd.f32 %v11357_v43, %v6306_v8  ;;  %v6304_v54 = vadd.f32 %v11270_v27, %v5373_v21  ;;  %v5375_v31 = vpop.f32.mrf.mxu1  ;;  %v11430_v45 = vpop.f32.mrf.mxu0  ;;  %v11440_v42 = vsel %vm778_vm1, %v6562_v62, %v6564_v57  ;;  %v11443_v24 = vsel %vm778_vm1, %v6557_v49, %v6559_v48 }
 0x3da   : > { %6820 = vst.msk [vmem:[%s11399_s25] sm:$0xf] %vm3591_vm6, %v7678_v1  ;;  %v7681_v19 = vpack.c.bf16 %v6663_v3, %v6663_v3  ;;  %v6661_v37 = vmax.f32 %v6629_v16, 0.0  ;;  %v6307_v29 = vadd.f32 %v11277_v41, %v5384_v26  ;;  %v5376_v4 = vadd.f32 %v5375_v31, %v11232_v5 }
 0x3db   : > { %v6634_v12 = vadd.f32 %v11332_v25, %v6441_v9  ;;  %v6439_v55 = vadd.f32 %v11357_v43, %v6304_v54  ;;  %v8034_v27 = vpop.f32.mrf.mxu1  ;;  %v11452_v3 = vpop.f32.mrf.mxu0  ;;  %v6571_v16 = vrot.slane %v6413_v14, 1  ;;  %v7732_v49 = vunpack.c.l.bf16 %v7747_v2 }
 0x3dc   : > { %6823 = vst.msk [vmem:[%s11399_s25 + $0xc] sm:$0xf] %vm3591_vm6, %v7681_v19  ;;  %v7679_v33 = vpack.c.bf16 %v6661_v37, %v6661_v37  ;;  %v6442_v63 = vadd.f32 %v11357_v43, %v6307_v29  ;;  %v6305_v41 = vadd.f32 %v11284_v59, %v5376_v4  ;;  %v5397_v5 = vadd.f32 %v8034_v27, %v11234_v23 }
 0x3dd   : > { %v6666_v25 = vmax.f32 %v6634_v12, 0.0  ;;  %v6632_v22 = vadd.f32 %v11338_v52, %v6439_v55  ;;  %v5388_v46 = vpop.f32.mrf.mxu1  ;;  %v7733_v31 = vunpack.c.h.bf16 %v7747_v2  ;;  %v6415_v57 = vunpack.c.l.bf16 %v7593_v38  ;;  %v11464_v29 = vpop.f32.mrf.mxu0  ;;  %v11734_v38 = vld [vmem:[#allocation5_spill] sm:$0xff] }
 0x3de   : > { %6821 = vst.msk [vmem:[%s11399_s25 + $0x4] sm:$0xf] %vm3591_vm6, %v7679_v33  ;;  %v6635_v8 = vadd.f32 %v11341_v10, %v6442_v63  ;;  %v6440_v59 = vadd.f32 %v11357_v43, %v6305_v41  ;;  %v6310_v23 = vadd.f32 %v11292_v28, %v5397_v5  ;;  %v5389_v21 = vadd.f32 %v5388_v46, %v11236_v47  ;;  %v7590_v63 = vld [vmem:[%s8531_s27 + $0x98] sm:$0x1] }
 0x3df   : > { %v7684_v52 = vpack.c.bf16 %v6666_v25, %v6666_v25  ;;  %v6664_v1 = vmax.f32 %v6632_v22, 0.0  ;;  %v8035_v62 = vpop.f32.mrf.mxu1  ;;  %v6572_v12 = vrot.slane %v6414_v11, 1  ;;  %v6566_v55 = vrot.slane %v7732_v49, 1  ;;  %v11479_v46 = vpop.f32.mrf.mxu0 }
 0x3e0   : > { %v6667_v26 = vmax.f32 %v6635_v8, 0.0  ;;  %v6633_v20 = vadd.f32 %v11344_v34, %v6440_v59  ;;  %v6445_v10 = vadd.f32 %v11357_v43, %v6310_v23  ;;  %v6308_v9 = vadd.f32 %v11301_v15, %v5389_v21 }
 0x3e1   : > { %6826 = vst.msk [vmem:[%s11399_s25 + $0x18] sm:$0xf] %vm3591_vm6, %v7684_v52  ;;  %v7682_v28 = vpack.c.bf16 %v6664_v1, %v6664_v1  ;;  %v5400_v47 = vadd.f32 %v8035_v62, %v11238_v58  ;;  %v5391_v54 = vpop.f32.mrf.mxu1  ;;  %v6567_v2 = vrot.slane %v7733_v31, 1  ;;  %v11484_v59 = vsel %vm778_vm1, %v6571_v16, %v6572_v12  ;;  %v7597_v1 = vld [vmem:[%s8531_s27 + $0xb4] sm:$0xff]  }
 0x3e2   : > { %v7685_v48 = vpack.c.bf16 %v6667_v26, %v6667_v26  ;;  %v6665_v19 = vmax.f32 %v6633_v20, 0.0  ;;  %v6638_v37 = vadd.f32 %v11347_v32, %v6445_v10  ;;  %v6443_v34 = vadd.f32 %v11357_v43, %v6308_v9 }
 0x3e3   : > { %6824 = vst.msk [vmem:[%s11399_s25 + $0x10] sm:$0xf] %vm3591_vm6, %v7682_v28  ;;  %v6311_v15 = vadd.f32 %v11319_v56, %v5400_v47  ;;  %v5392_v4 = vadd.f32 %v5391_v54, %v11240_v44  ;;  %v8038_v58 = vpop.f32.mrf.mxu1  ;;  %v6574_v44 = vrot.slane %v6415_v57, 1  ;;  %v6412_v23 = vunpack.c.l.bf16 %v7590_v63  ;;  %v11735_v28 = vld [vmem:[#allocation11_spill] sm:$0xff]  ;;  %v7748_v47 = vld [vmem:[%s8531_s27 + $0xa8] sm:$0xff]  }
 0x3e4   : > { %6827 = vst.msk [vmem:[%s11399_s25 + $0x1c] sm:$0xf] %vm3591_vm6, %v7685_v48  ;;  %v7683_v27 = vpack.c.bf16 %v6665_v19, %v6665_v19  ;;  %v6670_v14 = vmax.f32 %v6638_v37, 0.0  ;;  %v6636_v32 = vadd.f32 %v11362_v51, %v6443_v34  ;;  %v5413_v33 = vadd.f32 %v8038_v58, %v11244_v53  ;;  %v11736_v58 = vld [vmem:[#allocation12_spill] sm:$0xff] }
 0x3e5   : > { %v6446_v41 = vadd.f32 %v11357_v43, %v6311_v15  ;;  %v6309_v56 = vadd.f32 %v11335_v6, %v5392_v4  ;;  %v5404_v5 = vpop.f32.mrf.mxu1  ;;  %v11496_v16 = vsel %vm778_vm1, %v6566_v55, %v6567_v2  ;;  %v11499_v20 = vsel %vm778_vm1, %v6572_v12, %v6574_v44 }
 0x3e6   : > { %6825 = vst.msk [vmem:[%s11399_s25 + $0x14] sm:$0xf] %vm3591_vm6, %v7683_v27  ;;  %v7688_v11 = vpack.c.bf16 %v6670_v14, %v6670_v14  ;;  %v6668_v25 = vmax.f32 %v6636_v32, 0.0  ;;  %v6314_v22 = vadd.f32 %v11352_v18, %v5413_v33  ;;  %v5405_v51 = vadd.f32 %v5404_v5, %v11246_v35  ;;  %v11493_v49 = vpop.f32.mrf.mxu0 }
 0x3e7   : > { %v6639_v53 = vadd.f32 %v11365_v0, %v6446_v41  ;;  %v6444_v8 = vadd.f32 %v11357_v43, %v6309_v56  ;;  %v8039_v6 = vpop.f32.mrf.mxu1  ;;  %v6569_v48 = vrot.slane %v6412_v23, 1  ;;  %v6419_v19 = vunpack.c.l.bf16 %v7597_v1  ;;  %v11737_v41 = vld [vmem:[#allocation9_spill] sm:$0xff] }
 0x3e8   : > { %6830 = vst.msk [vmem:[%s11399_s25 + $0x28] sm:$0xf] %vm3591_vm6, %v7688_v11  ;;  %v7686_v21 = vpack.c.bf16 %v6668_v25, %v6668_v25  ;;  %v6449_v18 = vadd.f32 %v11357_v43, %v6314_v22  ;;  %v6312_v35 = vadd.f32 %v11373_v60, %v5405_v51  ;;  %v5416_v52 = vadd.f32 %v8039_v6, %v11734_v38  ;;  %v11738_v51 = vld [vmem:[#allocation8_spill] sm:$0xff] }
 0x3e9   : > { %v6671_v0 = vmax.f32 %v6639_v53, 0.0  ;;  %v6637_v62 = vadd.f32 %v11371_v39, %v6444_v8  ;;  %v5407_v26 = vpop.f32.mrf.mxu1  ;;  %v6420_v27 = vunpack.c.h.bf16 %v7597_v1  ;;  %v7736_v14 = vunpack.c.l.bf16 %v7748_v47  ;;  %v7599_v8 = vld [vmem:[%s8531_s27 + $0xbc] sm:$0x1] }
 0x3ea   : > { %6828 = vst.msk [vmem:[%s11399_s25 + $0x20] sm:$0xf] %vm3591_vm6, %v7686_v21  ;;  %v6642_v60 = vadd.f32 %v11376_v61, %v6449_v18  ;;  %v6447_v10 = vadd.f32 %v11357_v43, %v6312_v35  ;;  %v6315_v9 = vadd.f32 %v11394_v7, %v5416_v52  ;;  %v5408_v39 = vadd.f32 %v5407_v26, %v11735_v28  ;;  %v11513_v7 = vpop.f32.mrf.mxu0  ;;  %v11739_v1 = vld [vmem:[#allocation3_spill] sm:$0xff] }
 0x3eb   : > { %v7689_v54 = vpack.c.bf16 %v6671_v0, %v6671_v0  ;;  %v6669_v31 = vmax.f32 %v6637_v62, 0.0  ;;  %v8042_v57 = vpop.f32.mrf.mxu1  ;;  %v11523_v44 = vsel %vm778_vm1, %v6567_v2, %v6569_v48  ;;  %v7737_v11 = vunpack.c.h.bf16 %v7748_v47  ;;  %v7596_v0 = vld [vmem:[%s8531_s27 + $0xb0] sm:$0x1]  ;;  %v11740_v47 = vld [vmem:[#allocation16_spill] sm:$0xff] }
 0x3ec   : > { %v6674_v37 = vmax.f32 %v6642_v60, 0.0  ;;  %v6640_v34 = vadd.f32 %v11379_v40, %v6447_v10  ;;  %v6450_v15 = vadd.f32 %v11357_v43, %v6315_v9  ;;  %v6313_v61 = vadd.f32 %v11420_v13, %v5408_v39  ;;  %v8083_v6 = vpop.f32.mrf.mxu0 }
 0x3ed   : > { %6831 = vst.msk [vmem:[%s11399_s25 + $0x2c] sm:$0xf] %vm3591_vm6, %v7689_v54  ;;  %v7687_v4 = vpack.c.bf16 %v6669_v31, %v6669_v31  ;;  %v5429_v12 = vadd.f32 %v8042_v57, %v11736_v58  ;;  %v5420_v55 = vpop.f32.mrf.mxu1  ;;  %v6581_v2 = vrot.slane %v6419_v19, 1  ;;  %v6582_v18 = vrot.slane %v6420_v27, 1 }
 0x3ee   : > { %v7692_v32 = vpack.c.bf16 %v6674_v37, %v6674_v37  ;;  %v6672_v33 = vmax.f32 %v6640_v34, 0.0  ;;  %v6643_v40 = vadd.f32 %v11382_v17, %v6450_v15  ;;  %v6448_v63 = vadd.f32 %v11357_v43, %v6313_v61  ;;  %v6256_v31 = vpop.f32.mrf.mxu0 }
 0x3ef   : > { %6829 = vst.msk [vmem:[%s11399_s25 + $0x24] sm:$0xf] %vm3591_vm6, %v7687_v4  ;;  %v6318_v13 = vadd.f32 %v11430_v45, %v5429_v12  ;;  %v5421_v56 = vadd.f32 %v5420_v55, %v11737_v41  ;;  %v8043_v5 = vpop.f32.mrf.mxu1  ;;  %v6576_v10 = vrot.slane %v7736_v14, 1  ;;  %v6577_v48 = vrot.slane %v7737_v11, 1 }
 0x3f0   : > { %6834 = vst.msk [vmem:[%s11399_s25 + $0x38] sm:$0xf] %vm3591_vm6, %v7692_v32  ;;  %v7690_v25 = vpack.c.bf16 %v6672_v33, %v6672_v33  ;;  %v6675_v22 = vmax.f32 %v6643_v40, 0.0  ;;  %v6641_v17 = vadd.f32 %v11403_v50, %v6448_v63  ;;  %v5432_v53 = vadd.f32 %v8043_v5, %v11738_v51  ;;  %v7603_v40 = vld [vmem:[%s8531_s27 + $0xcc] sm:$0xff]   ;;  %v11742_v63 = vld [vmem:[#allocation7_spill] sm:$0xff] }
 0x3f1   : > { %v6453_v45 = vadd.f32 %v11357_v43, %v6318_v13  ;;  %v6316_v23 = vadd.f32 %v11452_v3, %v5421_v56  ;;  %v5423_v21 = vpop.f32.mrf.mxu1  ;;  %v6421_v3 = vunpack.c.l.bf16 %v7599_v8  ;;  %v6418_v19 = vunpack.c.l.bf16 %v7596_v0  ;;  %v11743_v51 = vld [vmem:[#allocation17_spill] sm:$0xff] }
 0x3f2   : > { %6832 = vst.msk [vmem:[%s11399_s25 + $0x30] sm:$0xf] %vm3591_vm6, %v7690_v25  ;;  %v7693_v35 = vpack.c.bf16 %v6675_v22, %v6675_v22  ;;  %v6673_v38 = vmax.f32 %v6641_v17, 0.0  ;;  %v6319_v52 = vadd.f32 %v11464_v29, %v5432_v53  ;;  %v5424_v50 = vadd.f32 %v5423_v21, %v11739_v1 }
 0x3f3   : > { %v6646_v62 = vadd.f32 %v11410_v36, %v6453_v45  ;;  %v6451_v26 = vadd.f32 %v11357_v43, %v6316_v23  ;;  %v8046_v60 = vpop.f32.mrf.mxu1  ;;  %v6584_v27 = vrot.slane %v6421_v3, 1  ;;  %v6578_v56 = vsel %vm778_vm1, %v6576_v10, %v6577_v48  ;;  %v11745_v10 = vld [vmem:[#allocation14_spill] sm:$0xff] }
 0x3f4   : > { %6835 = vst.msk [vmem:[%s11399_s25 + $0x3c] sm:$0xf] %vm3591_vm6, %v7693_v35  ;;  %v7691_v9 = vpack.c.bf16 %v6673_v38, %v6673_v38  ;;  %v6454_v28 = vadd.f32 %v11357_v43, %v6319_v52  ;;  %v6317_v39 = vadd.f32 %v11479_v46, %v5424_v50  ;;  %v5445_v29 = vadd.f32 %v8046_v60, %v11740_v47  ;;  %v11741_v46 = vld [vmem:[#allocation6_spill] sm:$0xff]  ;;  %v7749_v52 = vld [vmem:[%s8531_s27 + $0xc0] sm:$0xff]  }
 0x3f5   : > { %v6678_v54 = vmax.f32 %v6646_v62, 0.0  ;;  %v6644_v57 = vadd.f32 %v11413_v30, %v6451_v26  ;;  %v5436_v36 = vpop.f32.mrf.mxu1  ;;  %v6583_v30 = vsel %vm778_vm1, %v6581_v2, %v6582_v18  ;;  %v6579_v5 = vrot.slane %v6418_v19, 1  ;;  %v7605_v19 = vld [vmem:[%s8531_s27 + $0xd4] sm:$0x1] }
 0x3f6   : > { %6833 = vst.msk [vmem:[%s11399_s25 + $0x34] sm:$0xf] %vm3591_vm6, %v7691_v9  ;;  %v6647_v37 = vadd.f32 %v11440_v42, %v6454_v28  ;;  %v6452_v34 = vadd.f32 %v11357_v43, %v6317_v39  ;;  %v6322_v15 = vadd.f32 %v11493_v49, %v5445_v29  ;;  %v5437_v61 = vadd.f32 %v5436_v36, %v11741_v46  ;;  %v8086_v12 = vpop.f32.mrf.mxu0  ;;  %v11746_v36 = vld [vmem:[#allocation4_spill] sm:$0xff] }
 0x3f7   : > { %v7696_v4 = vpack.c.bf16 %v6678_v54, %v6678_v54  ;;  %v6676_v58 = vmax.f32 %v6644_v57, 0.0  ;;  %v8047_v55 = vpop.f32.mrf.mxu1  ;;  %v6585_v45 = vsel %vm778_vm1, %v6582_v18, %v6584_v27  ;;  %v6425_v23 = vunpack.c.l.bf16 %v7603_v40  ;;  %v7602_v27 = vld [vmem:[%s8531_s27 + $0xc8] sm:$0x1] }
 0x3f8   : > { %v6679_v14 = vmax.f32 %v6647_v37, 0.0  ;;  %v6645_v32 = vadd.f32 %v11443_v24, %v6452_v34  ;;  %v6457_v33 = vadd.f32 %v11357_v43, %v6322_v15  ;;  %v6320_v42 = vadd.f32 %v11513_v7, %v5437_v61  ;;  %v6269_v17 = vpop.f32.mrf.mxu0 }
 0x3f9   : > { %6838 = vst.msk [vmem:[%s11399_s25 + $0x48] sm:$0xf] %vm3591_vm6, %v7696_v4  ;;  %v7694_v49 = vpack.c.bf16 %v6676_v58, %v6676_v58  ;;  %v5448_v13 = vadd.f32 %v8047_v55, %v11742_v63  ;;  %v5439_v41 = vpop.f32.mrf.mxu1  ;;  %v6580_v0 = vsel %vm778_vm1, %v6577_v48, %v6579_v5  ;;  %v6426_v62 = vunpack.c.h.bf16 %v7603_v40  ;;  %v11748_v5 = vld [vmem:[#allocation15_spill] sm:$0xff] }
 0x3fa   : > { %v7697_v11 = vpack.c.bf16 %v6679_v14, %v6679_v14  ;;  %v6677_v25 = vmax.f32 %v6645_v32, 0.0  ;;  %v6650_v24 = vadd.f32 %v11484_v59, %v6457_v33  ;;  %v6455_v22 = vadd.f32 %v11357_v43, %v6320_v42  ;;  %v11744_v59 = vld [vmem:[#allocation13_spill] sm:$0xff]  ;;  %v8087_v28 = vpop.f32.mrf.mxu0 }
 0x3fb   : > { %6836 = vst.msk [vmem:[%s11399_s25 + $0x40] sm:$0xf] %vm3591_vm6, %v7694_v49  ;;  %v6323_v7 = vadd.f32 %v8083_v6, %v5448_v13  ;;  %v5440_v53 = vadd.f32 %v5439_v41, %v11743_v51  ;;  %v8050_v8 = vpop.f32.mrf.mxu1  ;;  %v6591_v47 = vrot.slane %v6425_v23, 1  ;;  %v7740_v29 = vunpack.c.l.bf16 %v7749_v52 }
 0x3fc   : > { %6839 = vst.msk [vmem:[%s11399_s25 + $0x4c] sm:$0xf] %vm3591_vm6, %v7697_v11  ;;  %v7695_v21 = vpack.c.bf16 %v6677_v25, %v6677_v25  ;;  %v6682_v2 = vmax.f32 %v6650_v24, 0.0  ;;  %v6648_v35 = vadd.f32 %v11496_v16, %v6455_v22  ;;  %v5461_v38 = vadd.f32 %v8050_v8, %v11744_v59  ;;  %v6272_v33 = vpop.f32.mrf.mxu0 }
 0x3fd   : > { %v6458_v1 = vadd.f32 %v11357_v43, %v6323_v7  ;;  %v6321_v6 = vadd.f32 %v6256_v31, %v5440_v53  ;;  %v5452_v50 = vpop.f32.mrf.mxu1  ;;  %v6592_v15 = vrot.slane %v6426_v62, 1  ;;  %v7741_v46 = vunpack.c.h.bf16 %v7749_v52 }
 0x3fe   : > { %6837 = vst.msk [vmem:[%s11399_s25 + $0x44] sm:$0xf] %vm3591_vm6, %v7695_v21  ;;  %v7700_v18 = vpack.c.bf16 %v6682_v2, %v6682_v2  ;;  %v6680_v26 = vmax.f32 %v6648_v35, 0.0  ;;  %v6326_v60 = vadd.f32 %v8086_v12, %v5461_v38  ;;  %v5453_v3 = vadd.f32 %v5452_v50, %v11745_v10  ;;  %v11747_v12 = vld [vmem:[#allocation10_spill] sm:$0xff] }
 0x3ff   : > { %v6651_v16 = vadd.f32 %v11499_v20, %v6458_v1  ;;  %v6456_v9 = vadd.f32 %v11357_v43, %v6321_v6  ;;  %v8051_v39 = vpop.f32.mrf.mxu1  ;;  %v6586_v40 = vrot.slane %v7740_v29, 1  ;;  %v6427_v49 = vunpack.c.l.bf16 %v7605_v19  ;;  %v11750_v6 = vld [vmem:[#allocation19_spill] sm:$0xff] }
 0x400   : > { %6842 = vst.msk [vmem:[%s11399_s25 + $0x58] sm:$0xf] %vm3591_vm6, %v7700_v18  ;;  %v7698_v54 = vpack.c.bf16 %v6680_v26, %v6680_v26  ;;  %v6461_v31 = vadd.f32 %v11357_v43, %v6326_v60  ;;  %v6324_v57 = vadd.f32 %v6269_v17, %v5453_v3  ;;  %v5464_v48 = vadd.f32 %v8051_v39, %v11746_v36 }
 0x401   : > { %v6683_v37 = vmax.f32 %v6651_v16, 0.0  ;;  %v6649_v20 = vadd.f32 %v11523_v44, %v6456_v9  ;;  %v5455_v34 = vpop.f32.mrf.mxu1  ;;  %v6587_v24 = vrot.slane %v7741_v46, 1  ;;  %v6424_v22 = vunpack.c.l.bf16 %v7602_v27  ;;  %v11751_v16 = vld [vmem:[#allocation20_spill] sm:$0xff] }
 0x402   : > { %6840 = vst.msk [vmem:[%s11399_s25 + $0x50] sm:$0xf] %vm3591_vm6, %v7698_v54  ;;  %v6654_v61 = vadd.f32 %v6583_v30, %v6461_v31  ;;  %v6459_v4 = vadd.f32 %v11357_v43, %v6324_v57  ;;  %v6327_v58 = vadd.f32 %v8087_v28, %v5464_v48  ;;  %v5456_v55 = vadd.f32 %v5455_v34, %v11747_v12 }
 0x403   : > { %v7701_v14 = vpack.c.bf16 %v6683_v37, %v6683_v37  ;;  %v6681_v32 = vmax.f32 %v6649_v20, 0.0  ;;  %v8054_v42 = vpop.f32.mrf.mxu1  ;;  %v6593_v2 = vsel %vm778_vm1, %v6591_v47, %v6592_v15  ;;  %v6594_v59 = vrot.slane %v6427_v49, 1 }
 0x404   : > { %v6686_v44 = vmax.f32 %v6654_v61, 0.0  ;;  %v6652_v63 = vadd.f32 %v6578_v56, %v6459_v4  ;;  %v6462_v13 = vadd.f32 %v11357_v43, %v6327_v58  ;;  %v6325_v41 = vadd.f32 %v6272_v33, %v5456_v55  ;;  %v11749_v56 = vld [vmem:[#allocation18_spill] sm:$0xff] }
 0x405   : > { %6843 = vst.msk [vmem:[%s11399_s25 + $0x5c] sm:$0xf] %vm3591_vm6, %v7701_v14  ;;  %v7699_v30 = vpack.c.bf16 %v6681_v32, %v6681_v32  ;;  %v5477_v11 = vadd.f32 %v8054_v42, %v11748_v5  ;;  %v5468_v25 = vpop.f32.mrf.mxu1  ;;  %v6588_v26 = vsel %vm778_vm1, %v6586_v40, %v6587_v24  ;;  %v6589_v39 = vrot.slane %v6424_v22, 1 }
 0x406   : > { %v7704_v7 = vpack.c.bf16 %v6686_v44, %v6686_v44  ;;  %v6684_v17 = vmax.f32 %v6652_v63, 0.0  ;;  %v6655_v51 = vadd.f32 %v6585_v45, %v6462_v13  ;;  %v6460_v53 = vadd.f32 %v11357_v43, %v6325_v41  ;;  %v8090_v8 = vpop.f32.mrf.mxu0 }
 0x407   : > { %6841 = vst.msk [vmem:[%s11399_s25 + $0x54] sm:$0xf] %vm3591_vm6, %v7699_v30  ;;  %v5469_v23 = vadd.f32 %v5468_v25, %v11749_v56  ;;  %v6330_v21 = vadd.f32 %v8090_v8, %v5477_v11  ;;  %v8055_v35 = vpop.f32.mrf.mxu1  ;;  %v6595_v31 = vsel %vm778_vm1, %v6592_v15, %v6594_v59  ;;  %v6590_v20 = vsel %vm778_vm1, %v6587_v24, %v6589_v39 }
 0x408   : > { %6846 = vst.msk [vmem:[%s11399_s25 + $0x68] sm:$0xf] %vm3591_vm6, %v7704_v7  ;;  %v7702_v38 = vpack.c.bf16 %v6684_v17, %v6684_v17  ;;  %v6687_v52 = vmax.f32 %v6655_v51, 0.0  ;;  %v6653_v1 = vadd.f32 %v6580_v0, %v6460_v53  ;;  %v5480_v45 = vadd.f32 %v8055_v35, %v11750_v6  ;;  %v6285_v50 = vpop.f32.mrf.mxu0 }
 0x409   : > { %v6465_v62 = vadd.f32 %v11357_v43, %v6330_v21  ;;  %v6328_v18 = vadd.f32 %v6285_v50, %v5469_v23  ;;  %v5471_v60 = vpop.f32.mrf.mxu1 }
 0x40a   : > { %6844 = vst.msk [vmem:[%s11399_s25 + $0x60] sm:$0xf] %vm3591_vm6, %v7702_v38  ;;  %v7705_v10 = vpack.c.bf16 %v6687_v52, %v6687_v52  ;;  %v6685_v3 = vmax.f32 %v6653_v1, 0.0  ;;  %v5472_v9 = vadd.f32 %v5471_v60, %v11751_v16  ;;  %v8091_v28 = vpop.f32.mrf.mxu0 }
 0x40b   : > { %v6658_v0 = vadd.f32 %v6593_v2, %v6465_v62  ;;  %v6463_v47 = vadd.f32 %v11357_v43, %v6328_v18  ;;  %v6331_v29 = vadd.f32 %v8091_v28, %v5480_v45 }
 0x40c   : > { %6847 = vst.msk [vmem:[%s11399_s25 + $0x6c] sm:$0xf] %vm3591_vm6, %v7705_v10  ;;  %v7703_v54 = vpack.c.bf16 %v6685_v3, %v6685_v3  ;;  %v6288_v57 = vpop.f32.mrf.mxu0 }
 0x40d   : > { %v6690_v36 = vmax.f32 %v6658_v0, 0.0  ;;  %v6656_v48 = vadd.f32 %v6588_v26, %v6463_v47  ;;  %v6466_v19 = vadd.f32 %v11357_v43, %v6331_v29  ;;  %v6329_v37 = vadd.f32 %v6288_v57, %v5472_v9 }
 0x40e   : > { %6845 = vst.msk [vmem:[%s11399_s25 + $0x64] sm:$0xf] %vm3591_vm6, %v7703_v54 }
 0x40f   : > { %v7708_v34 = vpack.c.bf16 %v6690_v36, %v6690_v36  ;;  %v6688_v46 = vmax.f32 %v6656_v48, 0.0  ;;  %v6659_v61 = vadd.f32 %v6595_v31, %v6466_v19  ;;  %v6464_v4 = vadd.f32 %v11357_v43, %v6329_v37 }
 0x411   : > { %6850 = vst.msk [vmem:[%s11399_s25 + $0x78] sm:$0xf] %vm3591_vm6, %v7708_v34  ;;  %v7706_v15 = vpack.c.bf16 %v6688_v46, %v6688_v46  ;;  %v6691_v58 = vmax.f32 %v6659_v61, 0.0  ;;  %v6657_v12 = vadd.f32 %v6590_v20, %v6464_v4 }
 0x413   : > { %6848 = vst.msk [vmem:[%s11399_s25 + $0x70] sm:$0xf] %vm3591_vm6, %v7706_v15  ;;  %v7709_v55 = vpack.c.bf16 %v6691_v58, %v6691_v58  ;;  %v6689_v27 = vmax.f32 %v6657_v12, 0.0 }
 0x415   : > { %6851 = vst.msk [vmem:[%s11399_s25 + $0x7c] sm:$0xf] %vm3591_vm6, %v7709_v55  ;;  %v7707_v14 = vpack.c.bf16 %v6689_v27, %v6689_v27 }
 0x417   : > { %6849 = vst.msk [vmem:[%s11399_s25 + $0x74] sm:$0xf] %vm3591_vm6, %v7707_v14 }
 0x418 PF: > { %s15_s20 = sadd.s32 1, %s8469_s20   ;;  %s11752_s18 = smov %s8465_s19 }
 0x419   : > { %p12_p5 = scmp.ge.s32.totalorder %s15_s20, 4   ;;  %s11753_s19 = smov %s11755_s21 }
 0x41b   :  { %14 = sbr.rel (!%p12_p5) target bundleno = 2 (0x2), region = 84 }

</bundles_post_ra>
